<compile_context>
chip_gen: v6e
topology: v6e:2x2x1
jax: 0.10.0
libtpu: 0.0.40
codegen_flags: <defaults>
</compile_context>

<pallas_src>
import functools

import jax
import jax.numpy as jnp
from jax.experimental import pallas as pl
from jax.experimental.pallas import tpu as pltpu


# ---------------------------------------------------------------------------
# Fused kernel: all GRU layers + final linear, single grid step.
#
# ref order:
#   x_ref      : (T*Bp, Hp)   bf16  time-major embedded inputs (rows t*Bp..t*Bp+Bp-1 = step t)
#   len_ref    : (Bp, 1)      i32   sequence lengths (0 for padded batch rows)
#   per layer  : wi_ref (Hp, 3*Hp) bf16, bi_ref (1, 3*Hp) f32,
#                wh_ref (Hp, 3*Hp) bf16, bh_ref (1, 3*Hp) f32
#                (gate g occupies lanes [g*Hp, g*Hp+H); padding lanes/rows are zero)
#   fcw_ref    : (Hp, Cp)     bf16
#   fcb_ref    : (1, Cp)      f32
#   out_ref    : (Bp, Cp)     f32
#   seq_scr    : (T*Bp, Hp)   f32   VMEM scratch with the running layer's output sequence
#                                   (only present when num_layers > 1)
# ---------------------------------------------------------------------------
def fused_gru_fc_kernel(*refs, num_layers, T, Bp, Hp):
    x_ref, len_ref = refs[0], refs[1]
    pos = 2
    layer_refs = []
    for _ in range(num_layers):
        layer_refs.append(refs[pos:pos + 4])
        pos += 4
    fcw_ref, fcb_ref = refs[pos], refs[pos + 1]
    out_ref = refs[pos + 2]
    seq_scr = refs[pos + 3] if num_layers > 1 else None

    # --- Hoisted length masks: one compare + one broadcast per timestep, reused by
    #     every layer (pack_padded_sequence "freeze at length" semantics). ---
    len_vec = len_ref[...]                                           # (Bp, 1) i32
    step_masks = [jnp.broadcast_to(t < len_vec, (Bp, Hp)) for t in range(T)]

    h = None
    for li, (wi_ref, bi_ref, wh_ref, bh_ref) in enumerate(layer_refs):
        # --- Hoisted input projection: ONE big MXU matmul over every timestep. ---
        if li == 0:
            x_all = x_ref[...]                                       # already bf16
        else:
            x_all = seq_scr[...].astype(jnp.bfloat16)                # bulk cast, once/layer
        gi_all = jnp.dot(x_all, wi_ref[...],
                         preferred_element_type=jnp.float32) + bi_ref[...]   # (T*Bp, 3*Hp)
        # Lane-tile-aligned gate split, once per layer (offsets are multiples of 128).
        gi_r_all = gi_all[:, 0 * Hp:1 * Hp]
        gi_z_all = gi_all[:, 1 * Hp:2 * Hp]
        gi_n_all = gi_all[:, 2 * Hp:3 * Hp]

        # Fused hidden-gate weights; bias broadcast hoisted out of the time loop.
        w_h = wh_ref[...]                                            # (Hp, 3*Hp) bf16
        bh_full = jnp.broadcast_to(bh_ref[...], (Bp, 3 * Hp))        # (Bp, 3*Hp) f32

        h = jnp.zeros((Bp, Hp), jnp.float32)
        # Short, static time loop -> fully unrolled; every slice offset is a
        # compile-time constant and a multiple of the (8,128) f32 tile.
        for t in range(T):
            lo = t * Bp
            gi_r = gi_r_all[lo:lo + Bp, :]
            gi_z = gi_z_all[lo:lo + Bp, :]
            gi_n = gi_n_all[lo:lo + Bp, :]

            # Single fused hidden-gate matmul (review #1): (Bp,Hp) @ (Hp,3*Hp).
            gh = jnp.dot(h.astype(jnp.bfloat16), w_h,
                         preferred_element_type=jnp.float32) + bh_full       # (Bp, 3*Hp)
            gh_r = gh[:, 0 * Hp:1 * Hp]
            gh_z = gh[:, 1 * Hp:2 * Hp]
            gh_n = gh[:, 2 * Hp:3 * Hp]

            r = jax.nn.sigmoid(gi_r + gh_r)
            z = jax.nn.sigmoid(gi_z + gh_z)
            n = jnp.tanh(gi_n + r * gh_n)
            h_new = (1.0 - z) * n + z * h

            # Freeze state once t >= lengths[b] (mask precomputed above).
            h = jnp.where(step_masks[t], h_new, h)

            if li < num_layers - 1:
                seq_scr[lo:lo + Bp, :] = h                           # tile-aligned f32 store

    # Final linear layer on hidden[-1]; lane-dense padded (Bp, Cp) store.
    out_ref[...] = (jnp.dot(h.astype(jnp.bfloat16), fcw_ref[...],
                            preferred_element_type=jnp.float32) + fcb_ref[...])


def _full_spec(shape):
    zeros = (0,) * len(shape)
    return pl.BlockSpec(shape, lambda i, _z=zeros: _z)


def _fused_call(x_flat, lengths_b1, layer_params, fc_w, fc_b, *, T, Bp, Hp):
    num_layers = len(layer_params)
    c_pad = fc_w.shape[1]

    flat_inputs = [x_flat, lengths_b1]
    in_specs = [_full_spec(x_flat.shape), _full_spec(lengths_b1.shape)]
    for lp in layer_params:
        for name in ("w_i", "b_i", "w_h", "b_h"):
            arr = lp[name]
            flat_inputs.append(arr)
            in_specs.append(_full_spec(arr.shape))
    flat_inputs += [fc_w, fc_b]
    in_specs += [_full_spec(fc_w.shape), _full_spec(fc_b.shape)]

    scratch_shapes = ([pltpu.VMEM((T * Bp, Hp), jnp.float32)]
                      if num_layers > 1 else [])

    kernel = functools.partial(fused_gru_fc_kernel,
                               num_layers=num_layers, T=T, Bp=Bp, Hp=Hp)

    # TODO(synk): for realistic batch sizes, tile the grid over batch ("parallel" axis,
    # per-generation vmem_limit_bytes) instead of a single whole-array-resident step.
    return pl.pallas_call(
        kernel,
        out_shape=jax.ShapeDtypeStruct((Bp, c_pad), jnp.float32),
        grid_spec=pltpu.PrefetchScalarGridSpec(
            num_scalar_prefetch=0,
            grid=(1,),
            in_specs=in_specs,
            out_specs=_full_spec((Bp, c_pad)),
            scratch_shapes=scratch_shapes,
        ),
        compiler_params=pltpu.CompilerParams(
            dimension_semantics=("arbitrary",)),
    )(*flat_inputs)


# ---------------------------------------------------------------------------
# Full forward pass.  The embedding gather stays as JAX glue (time-major token ids so no
# big activation transpose is materialized); batch is padded to the sublane width.
# TODO(synk): the embedding table gather itself is host-side JAX (no in-kernel DMA gather
# at these tiny sizes).
# ---------------------------------------------------------------------------
@functools.partial(jax.jit, static_argnames=("num_classes",))
def multitask_char_rnn_forward(inputs, lengths, params, num_classes):
    emb = params["embedding"]                          # (V, Hp) bf16, row 0 zeroed
    B, T = inputs.shape
    Hp = emb.shape[1]
    Bp = ((B + 7) // 8) * 8                            # pad batch to f32 sublane tile

    inputs_p = jnp.pad(inputs, ((0, Bp - B), (0, 0)))                  # pad token id 0
    lengths_p = jnp.pad(lengths.astype(jnp.int32), (0, Bp - B))        # length 0 -> dead rows
    tokens_tm = jnp.transpose(inputs_p).reshape(-1)                    # (T*Bp,) time-major ids
    x_flat = jnp.take(emb, tokens_tm, axis=0)                          # (T*Bp, Hp) bf16
    lengths_b1 = lengths_p[:, None]                                    # (Bp, 1)

    logits_pad = _fused_call(x_flat, lengths_b1, params["gru"],
                             params["fc_w"], params["fc_b"],
                             T=T, Bp=Bp, Hp=Hp)
    return logits_pad[:B, :num_classes]


# ---------------------------------------------------------------------------
# Pure-JAX reference (same math, same padded-weight layout and bf16 matmul-input casting).
# ---------------------------------------------------------------------------
def reference_forward(inputs, lengths, params, num_classes):
    emb = params["embedding"]                                        # (V, Hp) bf16
    B, T = inputs.shape
    Hp = emb.shape[1]
    x = jnp.take(emb, inputs, axis=0).astype(jnp.float32)            # (B, T, Hp)
    mask = jnp.arange(T)[None, :] < lengths[:, None]                 # (B, T)

    h_last = None
    for layer in params["gru"]:
        w_i, b_i = layer["w_i"], layer["b_i"]                        # (Hp,3Hp) bf16, (1,3Hp) f32
        w_h, b_h = layer["w_h"], layer["b_h"]

        def step(h, inp):
            xt, m = inp
            gi = jnp.dot(xt.astype(jnp.bfloat16), w_i,
                         preferred_element_type=jnp.float32) + b_i
            gh = jnp.dot(h.astype(jnp.bfloat16), w_h,
                         preferred_element_type=jnp.float32) + b_h
            r = jax.nn.sigmoid(gi[:, 0 * Hp:1 * Hp] + gh[:, 0 * Hp:1 * Hp])
            z = jax.nn.sigmoid(gi[:, 1 * Hp:2 * Hp] + gh[:, 1 * Hp:2 * Hp])
            n = jnp.tanh(gi[:, 2 * Hp:3 * Hp] + r * gh[:, 2 * Hp:3 * Hp])
            h_new = (1.0 - z) * n + z * h
            h_next = jnp.where(m[:, None], h_new, h)
            return h_next, h_next

        h0 = jnp.zeros((B, Hp), jnp.float32)
        h_last, ys = jax.lax.scan(step, h0,
                                  (jnp.transpose(x, (1, 0, 2)), mask.T))
        x = jnp.transpose(ys, (1, 0, 2))

    logits = (jnp.dot(h_last.astype(jnp.bfloat16), params["fc_w"],
                      preferred_element_type=jnp.float32) + params["fc_b"])
    return logits[:, :num_classes]


# ---------------------------------------------------------------------------
# Deterministic parameter construction (shapes from the nn.Module __init__).
# All matmul weights are padded so every gate occupies its own 128-lane tile and the
# hidden/contraction dim is a full lane tile; padding rows/lanes are zero.
# ---------------------------------------------------------------------------
def make_params(key, input_size, hidden_size, num_layers, num_classes):
    H = hidden_size
    Hp = ((H + 127) // 128) * 128
    Cp = ((num_classes + 127) // 128) * 128
    scale = 1.0 / jnp.sqrt(jnp.float32(H))
    ks = jax.random.split(key, 2 + 4 * num_layers + 2)
    it = iter(ks)

    emb = jax.random.normal(next(it), (input_size, H), jnp.float32) * 0.1
    emb = emb.at[0].set(0.0)                                         # padding_idx=0
    emb_pad = (jnp.zeros((input_size, Hp), jnp.float32)
               .at[:, :H].set(emb).astype(jnp.bfloat16))

    gru_layers = []
    for _ in range(num_layers):
        w_ih = jax.random.uniform(next(it), (3 * H, H), jnp.float32, -scale, scale)
        w_hh = jax.random.uniform(next(it), (3 * H, H), jnp.float32, -scale, scale)
        b_ih = jax.random.uniform(next(it), (3 * H,), jnp.float32, -scale, scale)
        b_hh = jax.random.uniform(next(it), (3 * H,), jnp.float32, -scale, scale)

        w_i = jnp.zeros((Hp, 3 * Hp), jnp.float32)
        w_h = jnp.zeros((Hp, 3 * Hp), jnp.float32)
        b_i = jnp.zeros((1, 3 * Hp), jnp.float32)
        b_h = jnp.zeros((1, 3 * Hp), jnp.float32)
        for g in range(3):                                           # gate order r, z, n
            w_i = w_i.at[:H, g * Hp:g * Hp + H].set(w_ih[g * H:(g + 1) * H].T)
            w_h = w_h.at[:H, g * Hp:g * Hp + H].set(w_hh[g * H:(g + 1) * H].T)
            b_i = b_i.at[0, g * Hp:g * Hp + H].set(b_ih[g * H:(g + 1) * H])
            b_h = b_h.at[0, g * Hp:g * Hp + H].set(b_hh[g * H:(g + 1) * H])

        gru_layers.append({"w_i": w_i.astype(jnp.bfloat16), "b_i": b_i,
                           "w_h": w_h.astype(jnp.bfloat16), "b_h": b_h})

    fc_w = jax.random.uniform(next(it), (num_classes, H), jnp.float32, -scale, scale)
    fc_b = jax.random.uniform(next(it), (num_classes,), jnp.float32, -scale, scale)
    fc_w_pad = (jnp.zeros((Hp, Cp), jnp.float32)
                .at[:H, :num_classes].set(fc_w.T).astype(jnp.bfloat16))
    fc_b_pad = jnp.zeros((1, Cp), jnp.float32).at[0, :num_classes].set(fc_b)

    return {"embedding": emb_pad, "gru": gru_layers,
            "fc_w": fc_w_pad, "fc_b": fc_b_pad}


if __name__ == "__main__":
    # Small shapes consistent with the module's forward.
    VOCAB, HIDDEN, NUM_LAYERS, NUM_CLASSES = 20, 32, 2, 5
    BATCH, SEQ = 2, 8

    key = jax.random.PRNGKey(0)
    k_inp, k_par = jax.random.split(key)

    # Token ids in [1, VOCAB), then pad with 0 past each sequence's length.
    lengths = jnp.array([8, 5], dtype=jnp.int32)
    inputs = jax.random.randint(k_inp, (BATCH, SEQ), 1, VOCAB, dtype=jnp.int32)
    pad_mask = jnp.arange(SEQ)[None, :] < lengths[:, None]
    inputs = jnp.where(pad_mask, inputs, 0)

    params = make_params(k_par, VOCAB, HIDDEN, NUM_LAYERS, NUM_CLASSES)

    logits = multitask_char_rnn_forward(inputs, lengths, params, NUM_CLASSES)
    logits = jax.block_until_ready(logits)

    ref = reference_forward(inputs, lengths, params, NUM_CLASSES)
    assert logits.shape == (BATCH, NUM_CLASSES)
    assert jnp.allclose(logits, ref, atol=2e-3, rtol=2e-3), (logits, ref)

    print("KERNEL_OK")
</pallas_src>

<mosaic_0001>
module attributes {stable_mosaic.version = 11 : i64} {
  func.func @fused_gru_fc_kernel(%arg0: i32, %arg1: memref<64x128xbf16, #tpu.memory_space<vmem>>, %arg2: memref<8x1xi32, #tpu.memory_space<vmem>>, %arg3: memref<128x384xbf16, #tpu.memory_space<vmem>>, %arg4: memref<1x384xf32, #tpu.memory_space<vmem>>, %arg5: memref<128x384xbf16, #tpu.memory_space<vmem>>, %arg6: memref<1x384xf32, #tpu.memory_space<vmem>>, %arg7: memref<128x384xbf16, #tpu.memory_space<vmem>>, %arg8: memref<1x384xf32, #tpu.memory_space<vmem>>, %arg9: memref<128x384xbf16, #tpu.memory_space<vmem>>, %arg10: memref<1x384xf32, #tpu.memory_space<vmem>>, %arg11: memref<128x128xbf16, #tpu.memory_space<vmem>>, %arg12: memref<1x128xf32, #tpu.memory_space<vmem>>, %arg13: memref<8x128xf32, #tpu.memory_space<vmem>>, %arg14: memref<64x128xf32, #tpu.memory_space<vmem>>) attributes {dimension_semantics = [#tpu.dimension_semantics<arbitrary>], iteration_bounds = array<i64: 1>, scalar_prefetch = 0 : i64, scratch_operands = 1 : i64, tpu.core_type = #tpu.core_type<tc>, window_params = [{pipeline_mode = #tpu.pipeline_mode<synchronous>, transform_indices = @transform_0, window_bounds = array<i64: 64, 128>}, {pipeline_mode = #tpu.pipeline_mode<synchronous>, transform_indices = @transform_1, window_bounds = array<i64: 8, 1>}, {pipeline_mode = #tpu.pipeline_mode<synchronous>, transform_indices = @transform_2, window_bounds = array<i64: 128, 384>}, {pipeline_mode = #tpu.pipeline_mode<synchronous>, transform_indices = @transform_3, window_bounds = array<i64: 1, 384>}, {pipeline_mode = #tpu.pipeline_mode<synchronous>, transform_indices = @transform_4, window_bounds = array<i64: 128, 384>}, {pipeline_mode = #tpu.pipeline_mode<synchronous>, transform_indices = @transform_5, window_bounds = array<i64: 1, 384>}, {pipeline_mode = #tpu.pipeline_mode<synchronous>, transform_indices = @transform_6, window_bounds = array<i64: 128, 384>}, {pipeline_mode = #tpu.pipeline_mode<synchronous>, transform_indices = @transform_7, window_bounds = array<i64: 1, 384>}, {pipeline_mode = #tpu.pipeline_mode<synchronous>, transform_indices = @transform_8, window_bounds = array<i64: 128, 384>}, {pipeline_mode = #tpu.pipeline_mode<synchronous>, transform_indices = @transform_9, window_bounds = array<i64: 1, 384>}, {pipeline_mode = #tpu.pipeline_mode<synchronous>, transform_indices = @transform_10, window_bounds = array<i64: 128, 128>}, {pipeline_mode = #tpu.pipeline_mode<synchronous>, transform_indices = @transform_11, window_bounds = array<i64: 1, 128>}, {pipeline_mode = #tpu.pipeline_mode<synchronous>, transform_indices = @transform_12, window_bounds = array<i64: 8, 128>}]} {
    %c0 = arith.constant 0 : index
    %c0_0 = arith.constant 0 : index
    %0 = vector.load %arg2[%c0, %c0_0] : memref<8x1xi32, #tpu.memory_space<vmem>>, vector<8x1xi32>
    %c0_i32 = arith.constant 0 : i32
    %1 = vector.broadcast %c0_i32 : i32 to vector<8x1xi32>
    %2 = arith.cmpi sgt, %0, %1 : vector<8x1xi32>
    %3 = vector.shape_cast %2 : vector<8x1xi1> to vector<8x1xi1>
    %4 = vector.broadcast %3 : vector<8x1xi1> to vector<8x128xi1>
    %c1_i32 = arith.constant 1 : i32
    %5 = vector.broadcast %c1_i32 : i32 to vector<8x1xi32>
    %6 = arith.cmpi sgt, %0, %5 : vector<8x1xi32>
    %7 = vector.shape_cast %6 : vector<8x1xi1> to vector<8x1xi1>
    %8 = vector.broadcast %7 : vector<8x1xi1> to vector<8x128xi1>
    %c2_i32 = arith.constant 2 : i32
    %9 = vector.broadcast %c2_i32 : i32 to vector<8x1xi32>
    %10 = arith.cmpi sgt, %0, %9 : vector<8x1xi32>
    %11 = vector.shape_cast %10 : vector<8x1xi1> to vector<8x1xi1>
    %12 = vector.broadcast %11 : vector<8x1xi1> to vector<8x128xi1>
    %c3_i32 = arith.constant 3 : i32
    %13 = vector.broadcast %c3_i32 : i32 to vector<8x1xi32>
    %14 = arith.cmpi sgt, %0, %13 : vector<8x1xi32>
    %15 = vector.shape_cast %14 : vector<8x1xi1> to vector<8x1xi1>
    %16 = vector.broadcast %15 : vector<8x1xi1> to vector<8x128xi1>
    %c4_i32 = arith.constant 4 : i32
    %17 = vector.broadcast %c4_i32 : i32 to vector<8x1xi32>
    %18 = arith.cmpi sgt, %0, %17 : vector<8x1xi32>
    %19 = vector.shape_cast %18 : vector<8x1xi1> to vector<8x1xi1>
    %20 = vector.broadcast %19 : vector<8x1xi1> to vector<8x128xi1>
    %c5_i32 = arith.constant 5 : i32
    %21 = vector.broadcast %c5_i32 : i32 to vector<8x1xi32>
    %22 = arith.cmpi sgt, %0, %21 : vector<8x1xi32>
    %23 = vector.shape_cast %22 : vector<8x1xi1> to vector<8x1xi1>
    %24 = vector.broadcast %23 : vector<8x1xi1> to vector<8x128xi1>
    %c6_i32 = arith.constant 6 : i32
    %25 = vector.broadcast %c6_i32 : i32 to vector<8x1xi32>
    %26 = arith.cmpi sgt, %0, %25 : vector<8x1xi32>
    %27 = vector.shape_cast %26 : vector<8x1xi1> to vector<8x1xi1>
    %28 = vector.broadcast %27 : vector<8x1xi1> to vector<8x128xi1>
    %c7_i32 = arith.constant 7 : i32
    %29 = vector.broadcast %c7_i32 : i32 to vector<8x1xi32>
    %30 = arith.cmpi sgt, %0, %29 : vector<8x1xi32>
    %31 = vector.shape_cast %30 : vector<8x1xi1> to vector<8x1xi1>
    %32 = vector.broadcast %31 : vector<8x1xi1> to vector<8x128xi1>
    %c0_1 = arith.constant 0 : index
    %c0_2 = arith.constant 0 : index
    %33 = vector.load %arg1[%c0_1, %c0_2] : memref<64x128xbf16, #tpu.memory_space<vmem>>, vector<64x128xbf16>
    %c0_3 = arith.constant 0 : index
    %c0_4 = arith.constant 0 : index
    %34 = vector.load %arg3[%c0_3, %c0_4] : memref<128x384xbf16, #tpu.memory_space<vmem>>, vector<128x384xbf16>
    %cst = arith.constant dense<0.000000e+00> : vector<64x384xf32>
    %35 = tpu.matmul %33, %34, %cst {dimension_numbers = #tpu.dot_dimension_numbers<[1], [0], [0], [1], [0, 0, 1, 1], [], []>} : vector<64x128xbf16>, vector<128x384xbf16>, vector<64x384xf32> -> vector<64x384xf32>
    %c0_5 = arith.constant 0 : index
    %c0_6 = arith.constant 0 : index
    %36 = vector.load %arg4[%c0_5, %c0_6] : memref<1x384xf32, #tpu.memory_space<vmem>>, vector<1x384xf32>
    %37 = vector.broadcast %36 : vector<1x384xf32> to vector<64x384xf32>
    %38 = arith.addf %35, %37 : vector<64x384xf32>
    %39 = vector.extract_strided_slice %38 {offsets = [0, 0], sizes = [64, 128], strides = [1, 1]} : vector<64x384xf32> to vector<64x128xf32>
    %40 = vector.extract_strided_slice %38 {offsets = [0, 128], sizes = [64, 128], strides = [1, 1]} : vector<64x384xf32> to vector<64x128xf32>
    %41 = vector.extract_strided_slice %38 {offsets = [0, 256], sizes = [64, 128], strides = [1, 1]} : vector<64x384xf32> to vector<64x128xf32>
    %c0_7 = arith.constant 0 : index
    %c0_8 = arith.constant 0 : index
    %42 = vector.load %arg5[%c0_7, %c0_8] : memref<128x384xbf16, #tpu.memory_space<vmem>>, vector<128x384xbf16>
    %c0_9 = arith.constant 0 : index
    %c0_10 = arith.constant 0 : index
    %43 = vector.load %arg6[%c0_9, %c0_10] : memref<1x384xf32, #tpu.memory_space<vmem>>, vector<1x384xf32>
    %44 = vector.shape_cast %43 : vector<1x384xf32> to vector<1x384xf32>
    %45 = vector.broadcast %44 : vector<1x384xf32> to vector<8x384xf32>
    %cst_11 = arith.constant 0.000000e+00 : f32
    %46 = vector.broadcast %cst_11 : f32 to vector<8x128xf32>
    %47 = vector.extract_strided_slice %39 {offsets = [0, 0], sizes = [8, 128], strides = [1, 1]} : vector<64x128xf32> to vector<8x128xf32>
    %48 = vector.extract_strided_slice %40 {offsets = [0, 0], sizes = [8, 128], strides = [1, 1]} : vector<64x128xf32> to vector<8x128xf32>
    %49 = vector.extract_strided_slice %41 {offsets = [0, 0], sizes = [8, 128], strides = [1, 1]} : vector<64x128xf32> to vector<8x128xf32>
    %50 = arith.truncf %46 : vector<8x128xf32> to vector<8x128xbf16>
    %cst_12 = arith.constant dense<0.000000e+00> : vector<8x384xf32>
    %51 = tpu.matmul %50, %42, %cst_12 {dimension_numbers = #tpu.dot_dimension_numbers<[1], [0], [0], [1], [0, 0, 1, 1], [], []>} : vector<8x128xbf16>, vector<128x384xbf16>, vector<8x384xf32> -> vector<8x384xf32>
    %52 = arith.addf %51, %45 : vector<8x384xf32>
    %53 = vector.extract_strided_slice %52 {offsets = [0, 0], sizes = [8, 128], strides = [1, 1]} : vector<8x384xf32> to vector<8x128xf32>
    %54 = vector.extract_strided_slice %52 {offsets = [0, 128], sizes = [8, 128], strides = [1, 1]} : vector<8x384xf32> to vector<8x128xf32>
    %55 = vector.extract_strided_slice %52 {offsets = [0, 256], sizes = [8, 128], strides = [1, 1]} : vector<8x384xf32> to vector<8x128xf32>
    %56 = arith.addf %47, %53 : vector<8x128xf32>
    %57 = arith.negf %56 : vector<8x128xf32>
    %58 = math.exp %57 : vector<8x128xf32>
    %cst_13 = arith.constant 1.000000e+00 : f32
    %59 = vector.broadcast %cst_13 : f32 to vector<8x128xf32>
    %60 = arith.addf %59, %58 : vector<8x128xf32>
    %61 = arith.divf %59, %60 : vector<8x128xf32>
    %62 = arith.addf %48, %54 : vector<8x128xf32>
    %63 = arith.negf %62 : vector<8x128xf32>
    %64 = math.exp %63 : vector<8x128xf32>
    %cst_14 = arith.constant 1.000000e+00 : f32
    %65 = vector.broadcast %cst_14 : f32 to vector<8x128xf32>
    %66 = arith.addf %65, %64 : vector<8x128xf32>
    %67 = arith.divf %65, %66 : vector<8x128xf32>
    %68 = arith.mulf %61, %55 : vector<8x128xf32>
    %69 = arith.addf %49, %68 : vector<8x128xf32>
    %70 = math.tanh %69 : vector<8x128xf32>
    %cst_15 = arith.constant 1.000000e+00 : f32
    %71 = vector.broadcast %cst_15 : f32 to vector<8x128xf32>
    %72 = arith.subf %71, %67 : vector<8x128xf32>
    %73 = arith.mulf %72, %70 : vector<8x128xf32>
    %74 = arith.mulf %67, %46 : vector<8x128xf32>
    %75 = arith.addf %73, %74 : vector<8x128xf32>
    %76 = arith.select %4, %75, %46 : vector<8x128xi1>, vector<8x128xf32>
    %c0_16 = arith.constant 0 : index
    %c0_17 = arith.constant 0 : index
    %77 = vector.load %arg14[%c0_16, %c0_17] : memref<64x128xf32, #tpu.memory_space<vmem>>, vector<8x128xf32>
    tpu.vector_store %arg14[%c0_16, %c0_17], %76 {strides = array<i32>} : memref<64x128xf32, #tpu.memory_space<vmem>>, vector<8x128xf32>,
    %78 = vector.extract_strided_slice %39 {offsets = [8, 0], sizes = [8, 128], strides = [1, 1]} : vector<64x128xf32> to vector<8x128xf32>
    %79 = vector.extract_strided_slice %40 {offsets = [8, 0], sizes = [8, 128], strides = [1, 1]} : vector<64x128xf32> to vector<8x128xf32>
    %80 = vector.extract_strided_slice %41 {offsets = [8, 0], sizes = [8, 128], strides = [1, 1]} : vector<64x128xf32> to vector<8x128xf32>
    %81 = arith.truncf %76 : vector<8x128xf32> to vector<8x128xbf16>
    %cst_18 = arith.constant dense<0.000000e+00> : vector<8x384xf32>
    %82 = tpu.matmul %81, %42, %cst_18 {dimension_numbers = #tpu.dot_dimension_numbers<[1], [0], [0], [1], [0, 0, 1, 1], [], []>} : vector<8x128xbf16>, vector<128x384xbf16>, vector<8x384xf32> -> vector<8x384xf32>
    %83 = arith.addf %82, %45 : vector<8x384xf32>
    %84 = vector.extract_strided_slice %83 {offsets = [0, 0], sizes = [8, 128], strides = [1, 1]} : vector<8x384xf32> to vector<8x128xf32>
    %85 = vector.extract_strided_slice %83 {offsets = [0, 128], sizes = [8, 128], strides = [1, 1]} : vector<8x384xf32> to vector<8x128xf32>
    %86 = vector.extract_strided_slice %83 {offsets = [0, 256], sizes = [8, 128], strides = [1, 1]} : vector<8x384xf32> to vector<8x128xf32>
    %87 = arith.addf %78, %84 : vector<8x128xf32>
    %88 = arith.negf %87 : vector<8x128xf32>
    %89 = math.exp %88 : vector<8x128xf32>
    %cst_19 = arith.constant 1.000000e+00 : f32
    %90 = vector.broadcast %cst_19 : f32 to vector<8x128xf32>
    %91 = arith.addf %90, %89 : vector<8x128xf32>
    %92 = arith.divf %90, %91 : vector<8x128xf32>
    %93 = arith.addf %79, %85 : vector<8x128xf32>
    %94 = arith.negf %93 : vector<8x128xf32>
    %95 = math.exp %94 : vector<8x128xf32>
    %cst_20 = arith.constant 1.000000e+00 : f32
    %96 = vector.broadcast %cst_20 : f32 to vector<8x128xf32>
    %97 = arith.addf %96, %95 : vector<8x128xf32>
    %98 = arith.divf %96, %97 : vector<8x128xf32>
    %99 = arith.mulf %92, %86 : vector<8x128xf32>
    %100 = arith.addf %80, %99 : vector<8x128xf32>
    %101 = math.tanh %100 : vector<8x128xf32>
    %cst_21 = arith.constant 1.000000e+00 : f32
    %102 = vector.broadcast %cst_21 : f32 to vector<8x128xf32>
    %103 = arith.subf %102, %98 : vector<8x128xf32>
    %104 = arith.mulf %103, %101 : vector<8x128xf32>
    %105 = arith.mulf %98, %76 : vector<8x128xf32>
    %106 = arith.addf %104, %105 : vector<8x128xf32>
    %107 = arith.select %8, %106, %76 : vector<8x128xi1>, vector<8x128xf32>
    %c8 = arith.constant 8 : index
    %c0_22 = arith.constant 0 : index
    %108 = vector.load %arg14[%c8, %c0_22] : memref<64x128xf32, #tpu.memory_space<vmem>>, vector<8x128xf32>
    tpu.vector_store %arg14[%c8, %c0_22], %107 {strides = array<i32>} : memref<64x128xf32, #tpu.memory_space<vmem>>, vector<8x128xf32>,
    %109 = vector.extract_strided_slice %39 {offsets = [16, 0], sizes = [8, 128], strides = [1, 1]} : vector<64x128xf32> to vector<8x128xf32>
    %110 = vector.extract_strided_slice %40 {offsets = [16, 0], sizes = [8, 128], strides = [1, 1]} : vector<64x128xf32> to vector<8x128xf32>
    %111 = vector.extract_strided_slice %41 {offsets = [16, 0], sizes = [8, 128], strides = [1, 1]} : vector<64x128xf32> to vector<8x128xf32>
    %112 = arith.truncf %107 : vector<8x128xf32> to vector<8x128xbf16>
    %cst_23 = arith.constant dense<0.000000e+00> : vector<8x384xf32>
    %113 = tpu.matmul %112, %42, %cst_23 {dimension_numbers = #tpu.dot_dimension_numbers<[1], [0], [0], [1], [0, 0, 1, 1], [], []>} : vector<8x128xbf16>, vector<128x384xbf16>, vector<8x384xf32> -> vector<8x384xf32>
    %114 = arith.addf %113, %45 : vector<8x384xf32>
    %115 = vector.extract_strided_slice %114 {offsets = [0, 0], sizes = [8, 128], strides = [1, 1]} : vector<8x384xf32> to vector<8x128xf32>
    %116 = vector.extract_strided_slice %114 {offsets = [0, 128], sizes = [8, 128], strides = [1, 1]} : vector<8x384xf32> to vector<8x128xf32>
    %117 = vector.extract_strided_slice %114 {offsets = [0, 256], sizes = [8, 128], strides = [1, 1]} : vector<8x384xf32> to vector<8x128xf32>
    %118 = arith.addf %109, %115 : vector<8x128xf32>
    %119 = arith.negf %118 : vector<8x128xf32>
    %120 = math.exp %119 : vector<8x128xf32>
    %cst_24 = arith.constant 1.000000e+00 : f32
    %121 = vector.broadcast %cst_24 : f32 to vector<8x128xf32>
    %122 = arith.addf %121, %120 : vector<8x128xf32>
    %123 = arith.divf %121, %122 : vector<8x128xf32>
    %124 = arith.addf %110, %116 : vector<8x128xf32>
    %125 = arith.negf %124 : vector<8x128xf32>
    %126 = math.exp %125 : vector<8x128xf32>
    %cst_25 = arith.constant 1.000000e+00 : f32
    %127 = vector.broadcast %cst_25 : f32 to vector<8x128xf32>
    %128 = arith.addf %127, %126 : vector<8x128xf32>
    %129 = arith.divf %127, %128 : vector<8x128xf32>
    %130 = arith.mulf %123, %117 : vector<8x128xf32>
    %131 = arith.addf %111, %130 : vector<8x128xf32>
    %132 = math.tanh %131 : vector<8x128xf32>
    %cst_26 = arith.constant 1.000000e+00 : f32
    %133 = vector.broadcast %cst_26 : f32 to vector<8x128xf32>
    %134 = arith.subf %133, %129 : vector<8x128xf32>
    %135 = arith.mulf %134, %132 : vector<8x128xf32>
    %136 = arith.mulf %129, %107 : vector<8x128xf32>
    %137 = arith.addf %135, %136 : vector<8x128xf32>
    %138 = arith.select %12, %137, %107 : vector<8x128xi1>, vector<8x128xf32>
    %c16 = arith.constant 16 : index
    %c0_27 = arith.constant 0 : index
    %139 = vector.load %arg14[%c16, %c0_27] : memref<64x128xf32, #tpu.memory_space<vmem>>, vector<8x128xf32>
    tpu.vector_store %arg14[%c16, %c0_27], %138 {strides = array<i32>} : memref<64x128xf32, #tpu.memory_space<vmem>>, vector<8x128xf32>,
    %140 = vector.extract_strided_slice %39 {offsets = [24, 0], sizes = [8, 128], strides = [1, 1]} : vector<64x128xf32> to vector<8x128xf32>
    %141 = vector.extract_strided_slice %40 {offsets = [24, 0], sizes = [8, 128], strides = [1, 1]} : vector<64x128xf32> to vector<8x128xf32>
    %142 = vector.extract_strided_slice %41 {offsets = [24, 0], sizes = [8, 128], strides = [1, 1]} : vector<64x128xf32> to vector<8x128xf32>
    %143 = arith.truncf %138 : vector<8x128xf32> to vector<8x128xbf16>
    %cst_28 = arith.constant dense<0.000000e+00> : vector<8x384xf32>
    %144 = tpu.matmul %143, %42, %cst_28 {dimension_numbers = #tpu.dot_dimension_numbers<[1], [0], [0], [1], [0, 0, 1, 1], [], []>} : vector<8x128xbf16>, vector<128x384xbf16>, vector<8x384xf32> -> vector<8x384xf32>
    %145 = arith.addf %144, %45 : vector<8x384xf32>
    %146 = vector.extract_strided_slice %145 {offsets = [0, 0], sizes = [8, 128], strides = [1, 1]} : vector<8x384xf32> to vector<8x128xf32>
    %147 = vector.extract_strided_slice %145 {offsets = [0, 128], sizes = [8, 128], strides = [1, 1]} : vector<8x384xf32> to vector<8x128xf32>
    %148 = vector.extract_strided_slice %145 {offsets = [0, 256], sizes = [8, 128], strides = [1, 1]} : vector<8x384xf32> to vector<8x128xf32>
    %149 = arith.addf %140, %146 : vector<8x128xf32>
    %150 = arith.negf %149 : vector<8x128xf32>
    %151 = math.exp %150 : vector<8x128xf32>
    %cst_29 = arith.constant 1.000000e+00 : f32
    %152 = vector.broadcast %cst_29 : f32 to vector<8x128xf32>
    %153 = arith.addf %152, %151 : vector<8x128xf32>
    %154 = arith.divf %152, %153 : vector<8x128xf32>
    %155 = arith.addf %141, %147 : vector<8x128xf32>
    %156 = arith.negf %155 : vector<8x128xf32>
    %157 = math.exp %156 : vector<8x128xf32>
    %cst_30 = arith.constant 1.000000e+00 : f32
    %158 = vector.broadcast %cst_30 : f32 to vector<8x128xf32>
    %159 = arith.addf %158, %157 : vector<8x128xf32>
    %160 = arith.divf %158, %159 : vector<8x128xf32>
    %161 = arith.mulf %154, %148 : vector<8x128xf32>
    %162 = arith.addf %142, %161 : vector<8x128xf32>
    %163 = math.tanh %162 : vector<8x128xf32>
    %cst_31 = arith.constant 1.000000e+00 : f32
    %164 = vector.broadcast %cst_31 : f32 to vector<8x128xf32>
    %165 = arith.subf %164, %160 : vector<8x128xf32>
    %166 = arith.mulf %165, %163 : vector<8x128xf32>
    %167 = arith.mulf %160, %138 : vector<8x128xf32>
    %168 = arith.addf %166, %167 : vector<8x128xf32>
    %169 = arith.select %16, %168, %138 : vector<8x128xi1>, vector<8x128xf32>
    %c24 = arith.constant 24 : index
    %c0_32 = arith.constant 0 : index
    %170 = vector.load %arg14[%c24, %c0_32] : memref<64x128xf32, #tpu.memory_space<vmem>>, vector<8x128xf32>
    tpu.vector_store %arg14[%c24, %c0_32], %169 {strides = array<i32>} : memref<64x128xf32, #tpu.memory_space<vmem>>, vector<8x128xf32>,
    %171 = vector.extract_strided_slice %39 {offsets = [32, 0], sizes = [8, 128], strides = [1, 1]} : vector<64x128xf32> to vector<8x128xf32>
    %172 = vector.extract_strided_slice %40 {offsets = [32, 0], sizes = [8, 128], strides = [1, 1]} : vector<64x128xf32> to vector<8x128xf32>
    %173 = vector.extract_strided_slice %41 {offsets = [32, 0], sizes = [8, 128], strides = [1, 1]} : vector<64x128xf32> to vector<8x128xf32>
    %174 = arith.truncf %169 : vector<8x128xf32> to vector<8x128xbf16>
    %cst_33 = arith.constant dense<0.000000e+00> : vector<8x384xf32>
    %175 = tpu.matmul %174, %42, %cst_33 {dimension_numbers = #tpu.dot_dimension_numbers<[1], [0], [0], [1], [0, 0, 1, 1], [], []>} : vector<8x128xbf16>, vector<128x384xbf16>, vector<8x384xf32> -> vector<8x384xf32>
    %176 = arith.addf %175, %45 : vector<8x384xf32>
    %177 = vector.extract_strided_slice %176 {offsets = [0, 0], sizes = [8, 128], strides = [1, 1]} : vector<8x384xf32> to vector<8x128xf32>
    %178 = vector.extract_strided_slice %176 {offsets = [0, 128], sizes = [8, 128], strides = [1, 1]} : vector<8x384xf32> to vector<8x128xf32>
    %179 = vector.extract_strided_slice %176 {offsets = [0, 256], sizes = [8, 128], strides = [1, 1]} : vector<8x384xf32> to vector<8x128xf32>
    %180 = arith.addf %171, %177 : vector<8x128xf32>
    %181 = arith.negf %180 : vector<8x128xf32>
    %182 = math.exp %181 : vector<8x128xf32>
    %cst_34 = arith.constant 1.000000e+00 : f32
    %183 = vector.broadcast %cst_34 : f32 to vector<8x128xf32>
    %184 = arith.addf %183, %182 : vector<8x128xf32>
    %185 = arith.divf %183, %184 : vector<8x128xf32>
    %186 = arith.addf %172, %178 : vector<8x128xf32>
    %187 = arith.negf %186 : vector<8x128xf32>
    %188 = math.exp %187 : vector<8x128xf32>
    %cst_35 = arith.constant 1.000000e+00 : f32
    %189 = vector.broadcast %cst_35 : f32 to vector<8x128xf32>
    %190 = arith.addf %189, %188 : vector<8x128xf32>
    %191 = arith.divf %189, %190 : vector<8x128xf32>
    %192 = arith.mulf %185, %179 : vector<8x128xf32>
    %193 = arith.addf %173, %192 : vector<8x128xf32>
    %194 = math.tanh %193 : vector<8x128xf32>
    %cst_36 = arith.constant 1.000000e+00 : f32
    %195 = vector.broadcast %cst_36 : f32 to vector<8x128xf32>
    %196 = arith.subf %195, %191 : vector<8x128xf32>
    %197 = arith.mulf %196, %194 : vector<8x128xf32>
    %198 = arith.mulf %191, %169 : vector<8x128xf32>
    %199 = arith.addf %197, %198 : vector<8x128xf32>
    %200 = arith.select %20, %199, %169 : vector<8x128xi1>, vector<8x128xf32>
    %c32 = arith.constant 32 : index
    %c0_37 = arith.constant 0 : index
    %201 = vector.load %arg14[%c32, %c0_37] : memref<64x128xf32, #tpu.memory_space<vmem>>, vector<8x128xf32>
    tpu.vector_store %arg14[%c32, %c0_37], %200 {strides = array<i32>} : memref<64x128xf32, #tpu.memory_space<vmem>>, vector<8x128xf32>,
    %202 = vector.extract_strided_slice %39 {offsets = [40, 0], sizes = [8, 128], strides = [1, 1]} : vector<64x128xf32> to vector<8x128xf32>
    %203 = vector.extract_strided_slice %40 {offsets = [40, 0], sizes = [8, 128], strides = [1, 1]} : vector<64x128xf32> to vector<8x128xf32>
    %204 = vector.extract_strided_slice %41 {offsets = [40, 0], sizes = [8, 128], strides = [1, 1]} : vector<64x128xf32> to vector<8x128xf32>
    %205 = arith.truncf %200 : vector<8x128xf32> to vector<8x128xbf16>
    %cst_38 = arith.constant dense<0.000000e+00> : vector<8x384xf32>
    %206 = tpu.matmul %205, %42, %cst_38 {dimension_numbers = #tpu.dot_dimension_numbers<[1], [0], [0], [1], [0, 0, 1, 1], [], []>} : vector<8x128xbf16>, vector<128x384xbf16>, vector<8x384xf32> -> vector<8x384xf32>
    %207 = arith.addf %206, %45 : vector<8x384xf32>
    %208 = vector.extract_strided_slice %207 {offsets = [0, 0], sizes = [8, 128], strides = [1, 1]} : vector<8x384xf32> to vector<8x128xf32>
    %209 = vector.extract_strided_slice %207 {offsets = [0, 128], sizes = [8, 128], strides = [1, 1]} : vector<8x384xf32> to vector<8x128xf32>
    %210 = vector.extract_strided_slice %207 {offsets = [0, 256], sizes = [8, 128], strides = [1, 1]} : vector<8x384xf32> to vector<8x128xf32>
    %211 = arith.addf %202, %208 : vector<8x128xf32>
    %212 = arith.negf %211 : vector<8x128xf32>
    %213 = math.exp %212 : vector<8x128xf32>
    %cst_39 = arith.constant 1.000000e+00 : f32
    %214 = vector.broadcast %cst_39 : f32 to vector<8x128xf32>
    %215 = arith.addf %214, %213 : vector<8x128xf32>
    %216 = arith.divf %214, %215 : vector<8x128xf32>
    %217 = arith.addf %203, %209 : vector<8x128xf32>
    %218 = arith.negf %217 : vector<8x128xf32>
    %219 = math.exp %218 : vector<8x128xf32>
    %cst_40 = arith.constant 1.000000e+00 : f32
    %220 = vector.broadcast %cst_40 : f32 to vector<8x128xf32>
    %221 = arith.addf %220, %219 : vector<8x128xf32>
    %222 = arith.divf %220, %221 : vector<8x128xf32>
    %223 = arith.mulf %216, %210 : vector<8x128xf32>
    %224 = arith.addf %204, %223 : vector<8x128xf32>
    %225 = math.tanh %224 : vector<8x128xf32>
    %cst_41 = arith.constant 1.000000e+00 : f32
    %226 = vector.broadcast %cst_41 : f32 to vector<8x128xf32>
    %227 = arith.subf %226, %222 : vector<8x128xf32>
    %228 = arith.mulf %227, %225 : vector<8x128xf32>
    %229 = arith.mulf %222, %200 : vector<8x128xf32>
    %230 = arith.addf %228, %229 : vector<8x128xf32>
    %231 = arith.select %24, %230, %200 : vector<8x128xi1>, vector<8x128xf32>
    %c40 = arith.constant 40 : index
    %c0_42 = arith.constant 0 : index
    %232 = vector.load %arg14[%c40, %c0_42] : memref<64x128xf32, #tpu.memory_space<vmem>>, vector<8x128xf32>
    tpu.vector_store %arg14[%c40, %c0_42], %231 {strides = array<i32>} : memref<64x128xf32, #tpu.memory_space<vmem>>, vector<8x128xf32>,
    %233 = vector.extract_strided_slice %39 {offsets = [48, 0], sizes = [8, 128], strides = [1, 1]} : vector<64x128xf32> to vector<8x128xf32>
    %234 = vector.extract_strided_slice %40 {offsets = [48, 0], sizes = [8, 128], strides = [1, 1]} : vector<64x128xf32> to vector<8x128xf32>
    %235 = vector.extract_strided_slice %41 {offsets = [48, 0], sizes = [8, 128], strides = [1, 1]} : vector<64x128xf32> to vector<8x128xf32>
    %236 = arith.truncf %231 : vector<8x128xf32> to vector<8x128xbf16>
    %cst_43 = arith.constant dense<0.000000e+00> : vector<8x384xf32>
    %237 = tpu.matmul %236, %42, %cst_43 {dimension_numbers = #tpu.dot_dimension_numbers<[1], [0], [0], [1], [0, 0, 1, 1], [], []>} : vector<8x128xbf16>, vector<128x384xbf16>, vector<8x384xf32> -> vector<8x384xf32>
    %238 = arith.addf %237, %45 : vector<8x384xf32>
    %239 = vector.extract_strided_slice %238 {offsets = [0, 0], sizes = [8, 128], strides = [1, 1]} : vector<8x384xf32> to vector<8x128xf32>
    %240 = vector.extract_strided_slice %238 {offsets = [0, 128], sizes = [8, 128], strides = [1, 1]} : vector<8x384xf32> to vector<8x128xf32>
    %241 = vector.extract_strided_slice %238 {offsets = [0, 256], sizes = [8, 128], strides = [1, 1]} : vector<8x384xf32> to vector<8x128xf32>
    %242 = arith.addf %233, %239 : vector<8x128xf32>
    %243 = arith.negf %242 : vector<8x128xf32>
    %244 = math.exp %243 : vector<8x128xf32>
    %cst_44 = arith.constant 1.000000e+00 : f32
    %245 = vector.broadcast %cst_44 : f32 to vector<8x128xf32>
    %246 = arith.addf %245, %244 : vector<8x128xf32>
    %247 = arith.divf %245, %246 : vector<8x128xf32>
    %248 = arith.addf %234, %240 : vector<8x128xf32>
    %249 = arith.negf %248 : vector<8x128xf32>
    %250 = math.exp %249 : vector<8x128xf32>
    %cst_45 = arith.constant 1.000000e+00 : f32
    %251 = vector.broadcast %cst_45 : f32 to vector<8x128xf32>
    %252 = arith.addf %251, %250 : vector<8x128xf32>
    %253 = arith.divf %251, %252 : vector<8x128xf32>
    %254 = arith.mulf %247, %241 : vector<8x128xf32>
    %255 = arith.addf %235, %254 : vector<8x128xf32>
    %256 = math.tanh %255 : vector<8x128xf32>
    %cst_46 = arith.constant 1.000000e+00 : f32
    %257 = vector.broadcast %cst_46 : f32 to vector<8x128xf32>
    %258 = arith.subf %257, %253 : vector<8x128xf32>
    %259 = arith.mulf %258, %256 : vector<8x128xf32>
    %260 = arith.mulf %253, %231 : vector<8x128xf32>
    %261 = arith.addf %259, %260 : vector<8x128xf32>
    %262 = arith.select %28, %261, %231 : vector<8x128xi1>, vector<8x128xf32>
    %c48 = arith.constant 48 : index
    %c0_47 = arith.constant 0 : index
    %263 = vector.load %arg14[%c48, %c0_47] : memref<64x128xf32, #tpu.memory_space<vmem>>, vector<8x128xf32>
    tpu.vector_store %arg14[%c48, %c0_47], %262 {strides = array<i32>} : memref<64x128xf32, #tpu.memory_space<vmem>>, vector<8x128xf32>,
    %264 = vector.extract_strided_slice %39 {offsets = [56, 0], sizes = [8, 128], strides = [1, 1]} : vector<64x128xf32> to vector<8x128xf32>
    %265 = vector.extract_strided_slice %40 {offsets = [56, 0], sizes = [8, 128], strides = [1, 1]} : vector<64x128xf32> to vector<8x128xf32>
    %266 = vector.extract_strided_slice %41 {offsets = [56, 0], sizes = [8, 128], strides = [1, 1]} : vector<64x128xf32> to vector<8x128xf32>
    %267 = arith.truncf %262 : vector<8x128xf32> to vector<8x128xbf16>
    %cst_48 = arith.constant dense<0.000000e+00> : vector<8x384xf32>
    %268 = tpu.matmul %267, %42, %cst_48 {dimension_numbers = #tpu.dot_dimension_numbers<[1], [0], [0], [1], [0, 0, 1, 1], [], []>} : vector<8x128xbf16>, vector<128x384xbf16>, vector<8x384xf32> -> vector<8x384xf32>
    %269 = arith.addf %268, %45 : vector<8x384xf32>
    %270 = vector.extract_strided_slice %269 {offsets = [0, 0], sizes = [8, 128], strides = [1, 1]} : vector<8x384xf32> to vector<8x128xf32>
    %271 = vector.extract_strided_slice %269 {offsets = [0, 128], sizes = [8, 128], strides = [1, 1]} : vector<8x384xf32> to vector<8x128xf32>
    %272 = vector.extract_strided_slice %269 {offsets = [0, 256], sizes = [8, 128], strides = [1, 1]} : vector<8x384xf32> to vector<8x128xf32>
    %273 = arith.addf %264, %270 : vector<8x128xf32>
    %274 = arith.negf %273 : vector<8x128xf32>
    %275 = math.exp %274 : vector<8x128xf32>
    %cst_49 = arith.constant 1.000000e+00 : f32
    %276 = vector.broadcast %cst_49 : f32 to vector<8x128xf32>
    %277 = arith.addf %276, %275 : vector<8x128xf32>
    %278 = arith.divf %276, %277 : vector<8x128xf32>
    %279 = arith.addf %265, %271 : vector<8x128xf32>
    %280 = arith.negf %279 : vector<8x128xf32>
    %281 = math.exp %280 : vector<8x128xf32>
    %cst_50 = arith.constant 1.000000e+00 : f32
    %282 = vector.broadcast %cst_50 : f32 to vector<8x128xf32>
    %283 = arith.addf %282, %281 : vector<8x128xf32>
    %284 = arith.divf %282, %283 : vector<8x128xf32>
    %285 = arith.mulf %278, %272 : vector<8x128xf32>
    %286 = arith.addf %266, %285 : vector<8x128xf32>
    %287 = math.tanh %286 : vector<8x128xf32>
    %cst_51 = arith.constant 1.000000e+00 : f32
    %288 = vector.broadcast %cst_51 : f32 to vector<8x128xf32>
    %289 = arith.subf %288, %284 : vector<8x128xf32>
    %290 = arith.mulf %289, %287 : vector<8x128xf32>
    %291 = arith.mulf %284, %262 : vector<8x128xf32>
    %292 = arith.addf %290, %291 : vector<8x128xf32>
    %293 = arith.select %32, %292, %262 : vector<8x128xi1>, vector<8x128xf32>
    %c56 = arith.constant 56 : index
    %c0_52 = arith.constant 0 : index
    %294 = vector.load %arg14[%c56, %c0_52] : memref<64x128xf32, #tpu.memory_space<vmem>>, vector<8x128xf32>
    tpu.vector_store %arg14[%c56, %c0_52], %293 {strides = array<i32>} : memref<64x128xf32, #tpu.memory_space<vmem>>, vector<8x128xf32>,
    %c0_53 = arith.constant 0 : index
    %c0_54 = arith.constant 0 : index
    %295 = vector.load %arg14[%c0_53, %c0_54] : memref<64x128xf32, #tpu.memory_space<vmem>>, vector<64x128xf32>
    %296 = arith.truncf %295 : vector<64x128xf32> to vector<64x128xbf16>
    %c0_55 = arith.constant 0 : index
    %c0_56 = arith.constant 0 : index
    %297 = vector.load %arg7[%c0_55, %c0_56] : memref<128x384xbf16, #tpu.memory_space<vmem>>, vector<128x384xbf16>
    %cst_57 = arith.constant dense<0.000000e+00> : vector<64x384xf32>
    %298 = tpu.matmul %296, %297, %cst_57 {dimension_numbers = #tpu.dot_dimension_numbers<[1], [0], [0], [1], [0, 0, 1, 1], [], []>} : vector<64x128xbf16>, vector<128x384xbf16>, vector<64x384xf32> -> vector<64x384xf32>
    %c0_58 = arith.constant 0 : index
    %c0_59 = arith.constant 0 : index
    %299 = vector.load %arg8[%c0_58, %c0_59] : memref<1x384xf32, #tpu.memory_space<vmem>>, vector<1x384xf32>
    %300 = vector.broadcast %299 : vector<1x384xf32> to vector<64x384xf32>
    %301 = arith.addf %298, %300 : vector<64x384xf32>
    %302 = vector.extract_strided_slice %301 {offsets = [0, 0], sizes = [64, 128], strides = [1, 1]} : vector<64x384xf32> to vector<64x128xf32>
    %303 = vector.extract_strided_slice %301 {offsets = [0, 128], sizes = [64, 128], strides = [1, 1]} : vector<64x384xf32> to vector<64x128xf32>
    %304 = vector.extract_strided_slice %301 {offsets = [0, 256], sizes = [64, 128], strides = [1, 1]} : vector<64x384xf32> to vector<64x128xf32>
    %c0_60 = arith.constant 0 : index
    %c0_61 = arith.constant 0 : index
    %305 = vector.load %arg9[%c0_60, %c0_61] : memref<128x384xbf16, #tpu.memory_space<vmem>>, vector<128x384xbf16>
    %c0_62 = arith.constant 0 : index
    %c0_63 = arith.constant 0 : index
    %306 = vector.load %arg10[%c0_62, %c0_63] : memref<1x384xf32, #tpu.memory_space<vmem>>, vector<1x384xf32>
    %307 = vector.shape_cast %306 : vector<1x384xf32> to vector<1x384xf32>
    %308 = vector.broadcast %307 : vector<1x384xf32> to vector<8x384xf32>
    %cst_64 = arith.constant 0.000000e+00 : f32
    %309 = vector.broadcast %cst_64 : f32 to vector<8x128xf32>
    %310 = vector.extract_strided_slice %302 {offsets = [0, 0], sizes = [8, 128], strides = [1, 1]} : vector<64x128xf32> to vector<8x128xf32>
    %311 = vector.extract_strided_slice %303 {offsets = [0, 0], sizes = [8, 128], strides = [1, 1]} : vector<64x128xf32> to vector<8x128xf32>
    %312 = vector.extract_strided_slice %304 {offsets = [0, 0], sizes = [8, 128], strides = [1, 1]} : vector<64x128xf32> to vector<8x128xf32>
    %313 = arith.truncf %309 : vector<8x128xf32> to vector<8x128xbf16>
    %cst_65 = arith.constant dense<0.000000e+00> : vector<8x384xf32>
    %314 = tpu.matmul %313, %305, %cst_65 {dimension_numbers = #tpu.dot_dimension_numbers<[1], [0], [0], [1], [0, 0, 1, 1], [], []>} : vector<8x128xbf16>, vector<128x384xbf16>, vector<8x384xf32> -> vector<8x384xf32>
    %315 = arith.addf %314, %308 : vector<8x384xf32>
    %316 = vector.extract_strided_slice %315 {offsets = [0, 0], sizes = [8, 128], strides = [1, 1]} : vector<8x384xf32> to vector<8x128xf32>
    %317 = vector.extract_strided_slice %315 {offsets = [0, 128], sizes = [8, 128], strides = [1, 1]} : vector<8x384xf32> to vector<8x128xf32>
    %318 = vector.extract_strided_slice %315 {offsets = [0, 256], sizes = [8, 128], strides = [1, 1]} : vector<8x384xf32> to vector<8x128xf32>
    %319 = arith.addf %310, %316 : vector<8x128xf32>
    %320 = arith.negf %319 : vector<8x128xf32>
    %321 = math.exp %320 : vector<8x128xf32>
    %cst_66 = arith.constant 1.000000e+00 : f32
    %322 = vector.broadcast %cst_66 : f32 to vector<8x128xf32>
    %323 = arith.addf %322, %321 : vector<8x128xf32>
    %324 = arith.divf %322, %323 : vector<8x128xf32>
    %325 = arith.addf %311, %317 : vector<8x128xf32>
    %326 = arith.negf %325 : vector<8x128xf32>
    %327 = math.exp %326 : vector<8x128xf32>
    %cst_67 = arith.constant 1.000000e+00 : f32
    %328 = vector.broadcast %cst_67 : f32 to vector<8x128xf32>
    %329 = arith.addf %328, %327 : vector<8x128xf32>
    %330 = arith.divf %328, %329 : vector<8x128xf32>
    %331 = arith.mulf %324, %318 : vector<8x128xf32>
    %332 = arith.addf %312, %331 : vector<8x128xf32>
    %333 = math.tanh %332 : vector<8x128xf32>
    %cst_68 = arith.constant 1.000000e+00 : f32
    %334 = vector.broadcast %cst_68 : f32 to vector<8x128xf32>
    %335 = arith.subf %334, %330 : vector<8x128xf32>
    %336 = arith.mulf %335, %333 : vector<8x128xf32>
    %337 = arith.mulf %330, %309 : vector<8x128xf32>
    %338 = arith.addf %336, %337 : vector<8x128xf32>
    %339 = arith.select %4, %338, %309 : vector<8x128xi1>, vector<8x128xf32>
    %340 = vector.extract_strided_slice %302 {offsets = [8, 0], sizes = [8, 128], strides = [1, 1]} : vector<64x128xf32> to vector<8x128xf32>
    %341 = vector.extract_strided_slice %303 {offsets = [8, 0], sizes = [8, 128], strides = [1, 1]} : vector<64x128xf32> to vector<8x128xf32>
    %342 = vector.extract_strided_slice %304 {offsets = [8, 0], sizes = [8, 128], strides = [1, 1]} : vector<64x128xf32> to vector<8x128xf32>
    %343 = arith.truncf %339 : vector<8x128xf32> to vector<8x128xbf16>
    %cst_69 = arith.constant dense<0.000000e+00> : vector<8x384xf32>
    %344 = tpu.matmul %343, %305, %cst_69 {dimension_numbers = #tpu.dot_dimension_numbers<[1], [0], [0], [1], [0, 0, 1, 1], [], []>} : vector<8x128xbf16>, vector<128x384xbf16>, vector<8x384xf32> -> vector<8x384xf32>
    %345 = arith.addf %344, %308 : vector<8x384xf32>
    %346 = vector.extract_strided_slice %345 {offsets = [0, 0], sizes = [8, 128], strides = [1, 1]} : vector<8x384xf32> to vector<8x128xf32>
    %347 = vector.extract_strided_slice %345 {offsets = [0, 128], sizes = [8, 128], strides = [1, 1]} : vector<8x384xf32> to vector<8x128xf32>
    %348 = vector.extract_strided_slice %345 {offsets = [0, 256], sizes = [8, 128], strides = [1, 1]} : vector<8x384xf32> to vector<8x128xf32>
    %349 = arith.addf %340, %346 : vector<8x128xf32>
    %350 = arith.negf %349 : vector<8x128xf32>
    %351 = math.exp %350 : vector<8x128xf32>
    %cst_70 = arith.constant 1.000000e+00 : f32
    %352 = vector.broadcast %cst_70 : f32 to vector<8x128xf32>
    %353 = arith.addf %352, %351 : vector<8x128xf32>
    %354 = arith.divf %352, %353 : vector<8x128xf32>
    %355 = arith.addf %341, %347 : vector<8x128xf32>
    %356 = arith.negf %355 : vector<8x128xf32>
    %357 = math.exp %356 : vector<8x128xf32>
    %cst_71 = arith.constant 1.000000e+00 : f32
    %358 = vector.broadcast %cst_71 : f32 to vector<8x128xf32>
    %359 = arith.addf %358, %357 : vector<8x128xf32>
    %360 = arith.divf %358, %359 : vector<8x128xf32>
    %361 = arith.mulf %354, %348 : vector<8x128xf32>
    %362 = arith.addf %342, %361 : vector<8x128xf32>
    %363 = math.tanh %362 : vector<8x128xf32>
    %cst_72 = arith.constant 1.000000e+00 : f32
    %364 = vector.broadcast %cst_72 : f32 to vector<8x128xf32>
    %365 = arith.subf %364, %360 : vector<8x128xf32>
    %366 = arith.mulf %365, %363 : vector<8x128xf32>
    %367 = arith.mulf %360, %339 : vector<8x128xf32>
    %368 = arith.addf %366, %367 : vector<8x128xf32>
    %369 = arith.select %8, %368, %339 : vector<8x128xi1>, vector<8x128xf32>
    %370 = vector.extract_strided_slice %302 {offsets = [16, 0], sizes = [8, 128], strides = [1, 1]} : vector<64x128xf32> to vector<8x128xf32>
    %371 = vector.extract_strided_slice %303 {offsets = [16, 0], sizes = [8, 128], strides = [1, 1]} : vector<64x128xf32> to vector<8x128xf32>
    %372 = vector.extract_strided_slice %304 {offsets = [16, 0], sizes = [8, 128], strides = [1, 1]} : vector<64x128xf32> to vector<8x128xf32>
    %373 = arith.truncf %369 : vector<8x128xf32> to vector<8x128xbf16>
    %cst_73 = arith.constant dense<0.000000e+00> : vector<8x384xf32>
    %374 = tpu.matmul %373, %305, %cst_73 {dimension_numbers = #tpu.dot_dimension_numbers<[1], [0], [0], [1], [0, 0, 1, 1], [], []>} : vector<8x128xbf16>, vector<128x384xbf16>, vector<8x384xf32> -> vector<8x384xf32>
    %375 = arith.addf %374, %308 : vector<8x384xf32>
    %376 = vector.extract_strided_slice %375 {offsets = [0, 0], sizes = [8, 128], strides = [1, 1]} : vector<8x384xf32> to vector<8x128xf32>
    %377 = vector.extract_strided_slice %375 {offsets = [0, 128], sizes = [8, 128], strides = [1, 1]} : vector<8x384xf32> to vector<8x128xf32>
    %378 = vector.extract_strided_slice %375 {offsets = [0, 256], sizes = [8, 128], strides = [1, 1]} : vector<8x384xf32> to vector<8x128xf32>
    %379 = arith.addf %370, %376 : vector<8x128xf32>
    %380 = arith.negf %379 : vector<8x128xf32>
    %381 = math.exp %380 : vector<8x128xf32>
    %cst_74 = arith.constant 1.000000e+00 : f32
    %382 = vector.broadcast %cst_74 : f32 to vector<8x128xf32>
    %383 = arith.addf %382, %381 : vector<8x128xf32>
    %384 = arith.divf %382, %383 : vector<8x128xf32>
    %385 = arith.addf %371, %377 : vector<8x128xf32>
    %386 = arith.negf %385 : vector<8x128xf32>
    %387 = math.exp %386 : vector<8x128xf32>
    %cst_75 = arith.constant 1.000000e+00 : f32
    %388 = vector.broadcast %cst_75 : f32 to vector<8x128xf32>
    %389 = arith.addf %388, %387 : vector<8x128xf32>
    %390 = arith.divf %388, %389 : vector<8x128xf32>
    %391 = arith.mulf %384, %378 : vector<8x128xf32>
    %392 = arith.addf %372, %391 : vector<8x128xf32>
    %393 = math.tanh %392 : vector<8x128xf32>
    %cst_76 = arith.constant 1.000000e+00 : f32
    %394 = vector.broadcast %cst_76 : f32 to vector<8x128xf32>
    %395 = arith.subf %394, %390 : vector<8x128xf32>
    %396 = arith.mulf %395, %393 : vector<8x128xf32>
    %397 = arith.mulf %390, %369 : vector<8x128xf32>
    %398 = arith.addf %396, %397 : vector<8x128xf32>
    %399 = arith.select %12, %398, %369 : vector<8x128xi1>, vector<8x128xf32>
    %400 = vector.extract_strided_slice %302 {offsets = [24, 0], sizes = [8, 128], strides = [1, 1]} : vector<64x128xf32> to vector<8x128xf32>
    %401 = vector.extract_strided_slice %303 {offsets = [24, 0], sizes = [8, 128], strides = [1, 1]} : vector<64x128xf32> to vector<8x128xf32>
    %402 = vector.extract_strided_slice %304 {offsets = [24, 0], sizes = [8, 128], strides = [1, 1]} : vector<64x128xf32> to vector<8x128xf32>
    %403 = arith.truncf %399 : vector<8x128xf32> to vector<8x128xbf16>
    %cst_77 = arith.constant dense<0.000000e+00> : vector<8x384xf32>
    %404 = tpu.matmul %403, %305, %cst_77 {dimension_numbers = #tpu.dot_dimension_numbers<[1], [0], [0], [1], [0, 0, 1, 1], [], []>} : vector<8x128xbf16>, vector<128x384xbf16>, vector<8x384xf32> -> vector<8x384xf32>
    %405 = arith.addf %404, %308 : vector<8x384xf32>
    %406 = vector.extract_strided_slice %405 {offsets = [0, 0], sizes = [8, 128], strides = [1, 1]} : vector<8x384xf32> to vector<8x128xf32>
    %407 = vector.extract_strided_slice %405 {offsets = [0, 128], sizes = [8, 128], strides = [1, 1]} : vector<8x384xf32> to vector<8x128xf32>
    %408 = vector.extract_strided_slice %405 {offsets = [0, 256], sizes = [8, 128], strides = [1, 1]} : vector<8x384xf32> to vector<8x128xf32>
    %409 = arith.addf %400, %406 : vector<8x128xf32>
    %410 = arith.negf %409 : vector<8x128xf32>
    %411 = math.exp %410 : vector<8x128xf32>
    %cst_78 = arith.constant 1.000000e+00 : f32
    %412 = vector.broadcast %cst_78 : f32 to vector<8x128xf32>
    %413 = arith.addf %412, %411 : vector<8x128xf32>
    %414 = arith.divf %412, %413 : vector<8x128xf32>
    %415 = arith.addf %401, %407 : vector<8x128xf32>
    %416 = arith.negf %415 : vector<8x128xf32>
    %417 = math.exp %416 : vector<8x128xf32>
    %cst_79 = arith.constant 1.000000e+00 : f32
    %418 = vector.broadcast %cst_79 : f32 to vector<8x128xf32>
    %419 = arith.addf %418, %417 : vector<8x128xf32>
    %420 = arith.divf %418, %419 : vector<8x128xf32>
    %421 = arith.mulf %414, %408 : vector<8x128xf32>
    %422 = arith.addf %402, %421 : vector<8x128xf32>
    %423 = math.tanh %422 : vector<8x128xf32>
    %cst_80 = arith.constant 1.000000e+00 : f32
    %424 = vector.broadcast %cst_80 : f32 to vector<8x128xf32>
    %425 = arith.subf %424, %420 : vector<8x128xf32>
    %426 = arith.mulf %425, %423 : vector<8x128xf32>
    %427 = arith.mulf %420, %399 : vector<8x128xf32>
    %428 = arith.addf %426, %427 : vector<8x128xf32>
    %429 = arith.select %16, %428, %399 : vector<8x128xi1>, vector<8x128xf32>
    %430 = vector.extract_strided_slice %302 {offsets = [32, 0], sizes = [8, 128], strides = [1, 1]} : vector<64x128xf32> to vector<8x128xf32>
    %431 = vector.extract_strided_slice %303 {offsets = [32, 0], sizes = [8, 128], strides = [1, 1]} : vector<64x128xf32> to vector<8x128xf32>
    %432 = vector.extract_strided_slice %304 {offsets = [32, 0], sizes = [8, 128], strides = [1, 1]} : vector<64x128xf32> to vector<8x128xf32>
    %433 = arith.truncf %429 : vector<8x128xf32> to vector<8x128xbf16>
    %cst_81 = arith.constant dense<0.000000e+00> : vector<8x384xf32>
    %434 = tpu.matmul %433, %305, %cst_81 {dimension_numbers = #tpu.dot_dimension_numbers<[1], [0], [0], [1], [0, 0, 1, 1], [], []>} : vector<8x128xbf16>, vector<128x384xbf16>, vector<8x384xf32> -> vector<8x384xf32>
    %435 = arith.addf %434, %308 : vector<8x384xf32>
    %436 = vector.extract_strided_slice %435 {offsets = [0, 0], sizes = [8, 128], strides = [1, 1]} : vector<8x384xf32> to vector<8x128xf32>
    %437 = vector.extract_strided_slice %435 {offsets = [0, 128], sizes = [8, 128], strides = [1, 1]} : vector<8x384xf32> to vector<8x128xf32>
    %438 = vector.extract_strided_slice %435 {offsets = [0, 256], sizes = [8, 128], strides = [1, 1]} : vector<8x384xf32> to vector<8x128xf32>
    %439 = arith.addf %430, %436 : vector<8x128xf32>
    %440 = arith.negf %439 : vector<8x128xf32>
    %441 = math.exp %440 : vector<8x128xf32>
    %cst_82 = arith.constant 1.000000e+00 : f32
    %442 = vector.broadcast %cst_82 : f32 to vector<8x128xf32>
    %443 = arith.addf %442, %441 : vector<8x128xf32>
    %444 = arith.divf %442, %443 : vector<8x128xf32>
    %445 = arith.addf %431, %437 : vector<8x128xf32>
    %446 = arith.negf %445 : vector<8x128xf32>
    %447 = math.exp %446 : vector<8x128xf32>
    %cst_83 = arith.constant 1.000000e+00 : f32
    %448 = vector.broadcast %cst_83 : f32 to vector<8x128xf32>
    %449 = arith.addf %448, %447 : vector<8x128xf32>
    %450 = arith.divf %448, %449 : vector<8x128xf32>
    %451 = arith.mulf %444, %438 : vector<8x128xf32>
    %452 = arith.addf %432, %451 : vector<8x128xf32>
    %453 = math.tanh %452 : vector<8x128xf32>
    %cst_84 = arith.constant 1.000000e+00 : f32
    %454 = vector.broadcast %cst_84 : f32 to vector<8x128xf32>
    %455 = arith.subf %454, %450 : vector<8x128xf32>
    %456 = arith.mulf %455, %453 : vector<8x128xf32>
    %457 = arith.mulf %450, %429 : vector<8x128xf32>
    %458 = arith.addf %456, %457 : vector<8x128xf32>
    %459 = arith.select %20, %458, %429 : vector<8x128xi1>, vector<8x128xf32>
    %460 = vector.extract_strided_slice %302 {offsets = [40, 0], sizes = [8, 128], strides = [1, 1]} : vector<64x128xf32> to vector<8x128xf32>
    %461 = vector.extract_strided_slice %303 {offsets = [40, 0], sizes = [8, 128], strides = [1, 1]} : vector<64x128xf32> to vector<8x128xf32>
    %462 = vector.extract_strided_slice %304 {offsets = [40, 0], sizes = [8, 128], strides = [1, 1]} : vector<64x128xf32> to vector<8x128xf32>
    %463 = arith.truncf %459 : vector<8x128xf32> to vector<8x128xbf16>
    %cst_85 = arith.constant dense<0.000000e+00> : vector<8x384xf32>
    %464 = tpu.matmul %463, %305, %cst_85 {dimension_numbers = #tpu.dot_dimension_numbers<[1], [0], [0], [1], [0, 0, 1, 1], [], []>} : vector<8x128xbf16>, vector<128x384xbf16>, vector<8x384xf32> -> vector<8x384xf32>
    %465 = arith.addf %464, %308 : vector<8x384xf32>
    %466 = vector.extract_strided_slice %465 {offsets = [0, 0], sizes = [8, 128], strides = [1, 1]} : vector<8x384xf32> to vector<8x128xf32>
    %467 = vector.extract_strided_slice %465 {offsets = [0, 128], sizes = [8, 128], strides = [1, 1]} : vector<8x384xf32> to vector<8x128xf32>
    %468 = vector.extract_strided_slice %465 {offsets = [0, 256], sizes = [8, 128], strides = [1, 1]} : vector<8x384xf32> to vector<8x128xf32>
    %469 = arith.addf %460, %466 : vector<8x128xf32>
    %470 = arith.negf %469 : vector<8x128xf32>
    %471 = math.exp %470 : vector<8x128xf32>
    %cst_86 = arith.constant 1.000000e+00 : f32
    %472 = vector.broadcast %cst_86 : f32 to vector<8x128xf32>
    %473 = arith.addf %472, %471 : vector<8x128xf32>
    %474 = arith.divf %472, %473 : vector<8x128xf32>
    %475 = arith.addf %461, %467 : vector<8x128xf32>
    %476 = arith.negf %475 : vector<8x128xf32>
    %477 = math.exp %476 : vector<8x128xf32>
    %cst_87 = arith.constant 1.000000e+00 : f32
    %478 = vector.broadcast %cst_87 : f32 to vector<8x128xf32>
    %479 = arith.addf %478, %477 : vector<8x128xf32>
    %480 = arith.divf %478, %479 : vector<8x128xf32>
    %481 = arith.mulf %474, %468 : vector<8x128xf32>
    %482 = arith.addf %462, %481 : vector<8x128xf32>
    %483 = math.tanh %482 : vector<8x128xf32>
    %cst_88 = arith.constant 1.000000e+00 : f32
    %484 = vector.broadcast %cst_88 : f32 to vector<8x128xf32>
    %485 = arith.subf %484, %480 : vector<8x128xf32>
    %486 = arith.mulf %485, %483 : vector<8x128xf32>
    %487 = arith.mulf %480, %459 : vector<8x128xf32>
    %488 = arith.addf %486, %487 : vector<8x128xf32>
    %489 = arith.select %24, %488, %459 : vector<8x128xi1>, vector<8x128xf32>
    %490 = vector.extract_strided_slice %302 {offsets = [48, 0], sizes = [8, 128], strides = [1, 1]} : vector<64x128xf32> to vector<8x128xf32>
    %491 = vector.extract_strided_slice %303 {offsets = [48, 0], sizes = [8, 128], strides = [1, 1]} : vector<64x128xf32> to vector<8x128xf32>
    %492 = vector.extract_strided_slice %304 {offsets = [48, 0], sizes = [8, 128], strides = [1, 1]} : vector<64x128xf32> to vector<8x128xf32>
    %493 = arith.truncf %489 : vector<8x128xf32> to vector<8x128xbf16>
    %cst_89 = arith.constant dense<0.000000e+00> : vector<8x384xf32>
    %494 = tpu.matmul %493, %305, %cst_89 {dimension_numbers = #tpu.dot_dimension_numbers<[1], [0], [0], [1], [0, 0, 1, 1], [], []>} : vector<8x128xbf16>, vector<128x384xbf16>, vector<8x384xf32> -> vector<8x384xf32>
    %495 = arith.addf %494, %308 : vector<8x384xf32>
    %496 = vector.extract_strided_slice %495 {offsets = [0, 0], sizes = [8, 128], strides = [1, 1]} : vector<8x384xf32> to vector<8x128xf32>
    %497 = vector.extract_strided_slice %495 {offsets = [0, 128], sizes = [8, 128], strides = [1, 1]} : vector<8x384xf32> to vector<8x128xf32>
    %498 = vector.extract_strided_slice %495 {offsets = [0, 256], sizes = [8, 128], strides = [1, 1]} : vector<8x384xf32> to vector<8x128xf32>
    %499 = arith.addf %490, %496 : vector<8x128xf32>
    %500 = arith.negf %499 : vector<8x128xf32>
    %501 = math.exp %500 : vector<8x128xf32>
    %cst_90 = arith.constant 1.000000e+00 : f32
    %502 = vector.broadcast %cst_90 : f32 to vector<8x128xf32>
    %503 = arith.addf %502, %501 : vector<8x128xf32>
    %504 = arith.divf %502, %503 : vector<8x128xf32>
    %505 = arith.addf %491, %497 : vector<8x128xf32>
    %506 = arith.negf %505 : vector<8x128xf32>
    %507 = math.exp %506 : vector<8x128xf32>
    %cst_91 = arith.constant 1.000000e+00 : f32
    %508 = vector.broadcast %cst_91 : f32 to vector<8x128xf32>
    %509 = arith.addf %508, %507 : vector<8x128xf32>
    %510 = arith.divf %508, %509 : vector<8x128xf32>
    %511 = arith.mulf %504, %498 : vector<8x128xf32>
    %512 = arith.addf %492, %511 : vector<8x128xf32>
    %513 = math.tanh %512 : vector<8x128xf32>
    %cst_92 = arith.constant 1.000000e+00 : f32
    %514 = vector.broadcast %cst_92 : f32 to vector<8x128xf32>
    %515 = arith.subf %514, %510 : vector<8x128xf32>
    %516 = arith.mulf %515, %513 : vector<8x128xf32>
    %517 = arith.mulf %510, %489 : vector<8x128xf32>
    %518 = arith.addf %516, %517 : vector<8x128xf32>
    %519 = arith.select %28, %518, %489 : vector<8x128xi1>, vector<8x128xf32>
    %520 = vector.extract_strided_slice %302 {offsets = [56, 0], sizes = [8, 128], strides = [1, 1]} : vector<64x128xf32> to vector<8x128xf32>
    %521 = vector.extract_strided_slice %303 {offsets = [56, 0], sizes = [8, 128], strides = [1, 1]} : vector<64x128xf32> to vector<8x128xf32>
    %522 = vector.extract_strided_slice %304 {offsets = [56, 0], sizes = [8, 128], strides = [1, 1]} : vector<64x128xf32> to vector<8x128xf32>
    %523 = arith.truncf %519 : vector<8x128xf32> to vector<8x128xbf16>
    %cst_93 = arith.constant dense<0.000000e+00> : vector<8x384xf32>
    %524 = tpu.matmul %523, %305, %cst_93 {dimension_numbers = #tpu.dot_dimension_numbers<[1], [0], [0], [1], [0, 0, 1, 1], [], []>} : vector<8x128xbf16>, vector<128x384xbf16>, vector<8x384xf32> -> vector<8x384xf32>
    %525 = arith.addf %524, %308 : vector<8x384xf32>
    %526 = vector.extract_strided_slice %525 {offsets = [0, 0], sizes = [8, 128], strides = [1, 1]} : vector<8x384xf32> to vector<8x128xf32>
    %527 = vector.extract_strided_slice %525 {offsets = [0, 128], sizes = [8, 128], strides = [1, 1]} : vector<8x384xf32> to vector<8x128xf32>
    %528 = vector.extract_strided_slice %525 {offsets = [0, 256], sizes = [8, 128], strides = [1, 1]} : vector<8x384xf32> to vector<8x128xf32>
    %529 = arith.addf %520, %526 : vector<8x128xf32>
    %530 = arith.negf %529 : vector<8x128xf32>
    %531 = math.exp %530 : vector<8x128xf32>
    %cst_94 = arith.constant 1.000000e+00 : f32
    %532 = vector.broadcast %cst_94 : f32 to vector<8x128xf32>
    %533 = arith.addf %532, %531 : vector<8x128xf32>
    %534 = arith.divf %532, %533 : vector<8x128xf32>
    %535 = arith.addf %521, %527 : vector<8x128xf32>
    %536 = arith.negf %535 : vector<8x128xf32>
    %537 = math.exp %536 : vector<8x128xf32>
    %cst_95 = arith.constant 1.000000e+00 : f32
    %538 = vector.broadcast %cst_95 : f32 to vector<8x128xf32>
    %539 = arith.addf %538, %537 : vector<8x128xf32>
    %540 = arith.divf %538, %539 : vector<8x128xf32>
    %541 = arith.mulf %534, %528 : vector<8x128xf32>
    %542 = arith.addf %522, %541 : vector<8x128xf32>
    %543 = math.tanh %542 : vector<8x128xf32>
    %cst_96 = arith.constant 1.000000e+00 : f32
    %544 = vector.broadcast %cst_96 : f32 to vector<8x128xf32>
    %545 = arith.subf %544, %540 : vector<8x128xf32>
    %546 = arith.mulf %545, %543 : vector<8x128xf32>
    %547 = arith.mulf %540, %519 : vector<8x128xf32>
    %548 = arith.addf %546, %547 : vector<8x128xf32>
    %549 = arith.select %32, %548, %519 : vector<8x128xi1>, vector<8x128xf32>
    %550 = arith.truncf %549 : vector<8x128xf32> to vector<8x128xbf16>
    %c0_97 = arith.constant 0 : index
    %c0_98 = arith.constant 0 : index
    %551 = vector.load %arg11[%c0_97, %c0_98] : memref<128x128xbf16, #tpu.memory_space<vmem>>, vector<128x128xbf16>
    %cst_99 = arith.constant dense<0.000000e+00> : vector<8x128xf32>
    %552 = tpu.matmul %550, %551, %cst_99 {dimension_numbers = #tpu.dot_dimension_numbers<[1], [0], [0], [1], [0, 0, 1, 1], [], []>} : vector<8x128xbf16>, vector<128x128xbf16>, vector<8x128xf32> -> vector<8x128xf32>
    %c0_100 = arith.constant 0 : index
    %c0_101 = arith.constant 0 : index
    %553 = vector.load %arg12[%c0_100, %c0_101] : memref<1x128xf32, #tpu.memory_space<vmem>>, vector<1x128xf32>
    %554 = vector.broadcast %553 : vector<1x128xf32> to vector<8x128xf32>
    %555 = arith.addf %552, %554 : vector<8x128xf32>
    %c0_102 = arith.constant 0 : index
    %c0_103 = arith.constant 0 : index
    %556 = vector.load %arg13[%c0_102, %c0_103] : memref<8x128xf32, #tpu.memory_space<vmem>>, vector<8x128xf32>
    tpu.vector_store %arg13[%c0_102, %c0_103], %555 {strides = array<i32>} : memref<8x128xf32, #tpu.memory_space<vmem>>, vector<8x128xf32>,
    return
  }
  func.func @transform_0(%arg0: i32) -> (i32, i32) {
    %c0_i32 = arith.constant 0 : i32
    %c0_i32_0 = arith.constant 0 : i32
    %c0_i32_1 = arith.constant 0 : i32
    return %c0_i32, %c0_i32_0 : i32, i32
  }
  func.func @transform_1(%arg0: i32) -> (i32, i32) {
    %c0_i32 = arith.constant 0 : i32
    %c0_i32_0 = arith.constant 0 : i32
    %c0_i32_1 = arith.constant 0 : i32
    return %c0_i32, %c0_i32_0 : i32, i32
  }
  func.func @transform_2(%arg0: i32) -> (i32, i32) {
    %c0_i32 = arith.constant 0 : i32
    %c0_i32_0 = arith.constant 0 : i32
    %c0_i32_1 = arith.constant 0 : i32
    return %c0_i32, %c0_i32_0 : i32, i32
  }
  func.func @transform_3(%arg0: i32) -> (i32, i32) {
    %c0_i32 = arith.constant 0 : i32
    %c0_i32_0 = arith.constant 0 : i32
    %c0_i32_1 = arith.constant 0 : i32
    return %c0_i32, %c0_i32_0 : i32, i32
  }
  func.func @transform_4(%arg0: i32) -> (i32, i32) {
    %c0_i32 = arith.constant 0 : i32
    %c0_i32_0 = arith.constant 0 : i32
    %c0_i32_1 = arith.constant 0 : i32
    return %c0_i32, %c0_i32_0 : i32, i32
  }
  func.func @transform_5(%arg0: i32) -> (i32, i32) {
    %c0_i32 = arith.constant 0 : i32
    %c0_i32_0 = arith.constant 0 : i32
    %c0_i32_1 = arith.constant 0 : i32
    return %c0_i32, %c0_i32_0 : i32, i32
  }
  func.func @transform_6(%arg0: i32) -> (i32, i32) {
    %c0_i32 = arith.constant 0 : i32
    %c0_i32_0 = arith.constant 0 : i32
    %c0_i32_1 = arith.constant 0 : i32
    return %c0_i32, %c0_i32_0 : i32, i32
  }
  func.func @transform_7(%arg0: i32) -> (i32, i32) {
    %c0_i32 = arith.constant 0 : i32
    %c0_i32_0 = arith.constant 0 : i32
    %c0_i32_1 = arith.constant 0 : i32
    return %c0_i32, %c0_i32_0 : i32, i32
  }
  func.func @transform_8(%arg0: i32) -> (i32, i32) {
    %c0_i32 = arith.constant 0 : i32
    %c0_i32_0 = arith.constant 0 : i32
    %c0_i32_1 = arith.constant 0 : i32
    return %c0_i32, %c0_i32_0 : i32, i32
  }
  func.func @transform_9(%arg0: i32) -> (i32, i32) {
    %c0_i32 = arith.constant 0 : i32
    %c0_i32_0 = arith.constant 0 : i32
    %c0_i32_1 = arith.constant 0 : i32
    return %c0_i32, %c0_i32_0 : i32, i32
  }
  func.func @transform_10(%arg0: i32) -> (i32, i32) {
    %c0_i32 = arith.constant 0 : i32
    %c0_i32_0 = arith.constant 0 : i32
    %c0_i32_1 = arith.constant 0 : i32
    return %c0_i32, %c0_i32_0 : i32, i32
  }
  func.func @transform_11(%arg0: i32) -> (i32, i32) {
    %c0_i32 = arith.constant 0 : i32
    %c0_i32_0 = arith.constant 0 : i32
    %c0_i32_1 = arith.constant 0 : i32
    return %c0_i32, %c0_i32_0 : i32, i32
  }
  func.func @transform_12(%arg0: i32) -> (i32, i32) {
    %c0_i32 = arith.constant 0 : i32
    %c0_i32_0 = arith.constant 0 : i32
    %c0_i32_1 = arith.constant 0 : i32
    return %c0_i32, %c0_i32_0 : i32, i32
  }
}

</mosaic_0001>

<bundles_post_ra>
// kernel: multitask_char_rnn_forward.1
= control target key start
LH: loop header
LB: loop body
LE: loop exit
PB: predicated region body
PF: predicated region fallthrough
CT: control target
= control target key end

     0   :  { %17 = vsyncpa [#allocation4], 0  ;;  %s5559_s0 = inlined_call_operand.vmem [shape: bf16[64,128], index: 0, kind: input, shape index: {}]   ;;  %s5560_s1 = inlined_call_operand.vmem [shape: s32[8,1], index: 1, kind: input, shape index: {}]   ;;  %s5561_s2 = inlined_call_operand.vmem [shape: bf16[128,384], index: 2, kind: input, shape index: {}]   ;;  %s5562_s3 = inlined_call_operand.vmem [shape: f32[1,384], index: 3, kind: input, shape index: {}]   ;;  %s5563_s4 = inlined_call_operand.vmem [shape: bf16[128,384], index: 4, kind: input, shape index: {}]   ;;  %s5564_s5 = inlined_call_operand.vmem [shape: f32[1,384], index: 5, kind: input, shape index: {}]   ;;  %s5565_s6 = inlined_call_operand.hbm [shape: bf16[128,384], index: 6, kind: input, shape index: {}]   ;;  %s5566_s7 = inlined_call_operand.vmem [shape: f32[1,384], index: 7, kind: input, shape index: {}]   ;;  %s5567_s8 = inlined_call_operand.hbm [shape: bf16[128,384], index: 8, kind: input, shape index: {}]   ;;  %s5568_s9 = inlined_call_operand.vmem [shape: f32[1,384], index: 9, kind: input, shape index: {}]   ;;  %s5569_s10 = inlined_call_operand.hbm [shape: bf16[128,128], index: 10, kind: input, shape index: {}]   ;;  %s5570_s11 = inlined_call_operand.vmem [shape: f32[1,128], index: 11, kind: input, shape index: {}]   ;;  %s5571_s12 = inlined_call_operand.vmem [shape: f32[8,128], index: 12, kind: output, shape index: {}]  }
   0x1   :  { %18 = vsyncpa [#allocation6], 0  ;;  %s4098_s21 = smov [#allocation5]   ;;  %s4099_s23 = smov [#allocation3]  }
   0x2   :  { %s50_s22 = sshll.u32 %s4098_s21, 4  ;;  %s36_s24 = sshll.u32 %s4099_s23, 4  ;;  %s51_s22 = int_to_ptr.vmem [resolvable:$true] %s50_s22  ;;  %s37_s24 = int_to_ptr.vmem [resolvable:$true] %s36_s24 }
   0x3   :  { %s4042_s25 = scalar_lea.vmem %s51_s22, 3072  ;;  %p4047_p1 = scmp.lt.s32.totalorder %s51_s22, %s51_s22 }
   0x4   :  { %p4043_p0 = scmp.ne.s32.totalorder %s51_s22, %s4042_s25  ;;  %p4048_p2 = scmp.lt.s32.totalorder %s4042_s25, %s4042_s25 }
   0x6   :  { %p4049_p3 = por %p4048_p2, %p4047_p1 }
   0x8   :  { %p4050_p4 = pnand %p4049_p3, %p4043_p0 }
   0xa   :  { %4053 = shalt.err (!%p4050_p4)
}
   0xb   :  { %s4100_s26 = smov 192   ;;  %s4101_s27 = smov 12  }
   0xc   :  { %56 = dma.hbm_to_vmem [thread:$0]  %s5567_s8, 3072, %s51_s22, [#allocation6], %s4100_s26, %s4100_s26, %s4101_s27  }
   0xd   :  { %s4062_s30 = scalar_lea.vmem %s37_s24, 3072  ;;  %p4067_p6 = scmp.lt.s32.totalorder %s37_s24, %s37_s24 }
   0xe   :  { %p4063_p5 = scmp.ne.s32.totalorder %s37_s24, %s4062_s30  ;;  %p4068_p7 = scmp.lt.s32.totalorder %s4062_s30, %s4062_s30 }
  0x10   :  { %p4069_p8 = por %p4068_p7, %p4067_p6 }
  0x12   :  { %p4070_p9 = pnand %p4069_p8, %p4063_p5 }
  0x14   :  { %4073 = shalt.err (!%p4070_p9)
}
  0x15   :  { %42 = dma.hbm_to_vmem [thread:$0]  %s5565_s6, 3072, %s37_s24, [#allocation4], %s4100_s26, %s4100_s26, %s4101_s27  }
  0x16   :  { %s4102_s15 = smov [#allocation7]  }
  0x17   :  { %s64_s16 = sshll.u32 %s4102_s15, 4  ;;  %s65_s16 = int_to_ptr.vmem [resolvable:$true] %s64_s16 }
  0x18   :  { %s4082_s17 = scalar_lea.vmem %s65_s16, 1024  ;;  %p4087_p11 = scmp.lt.s32.totalorder %s65_s16, %s65_s16 }
  0x19   :  { %p4083_p10 = scmp.ne.s32.totalorder %s65_s16, %s4082_s17  ;;  %p4088_p12 = scmp.lt.s32.totalorder %s4082_s17, %s4082_s17 }
  0x1b   :  { %p4089_p13 = por %p4088_p12, %p4087_p11 }
  0x1d   :  { %p4090_p0 = pnand %p4089_p13, %p4083_p10 }
  0x1f   :  { %4093 = shalt.err (!%p4090_p0)
}
  0x20   :  { %s4103_s8 = smov 64   ;;  %s4104_s18 = smov 4  }
  0x21   :  { %70 = dma.hbm_to_vmem [thread:$0]  %s5569_s10, 1024, %s65_s16, [#allocation6], %s4103_s8, %s4103_s8, %s4104_s18  }
  0x22   :  { %4094 = dma.done.wait [#allocation4], 3072  }
  0x23   :  { %4095 = vsyncadd [#allocation4], 4294964224 }
  0x24   :  { %4096 = dma.done.wait [#allocation6], 4096  }
  0x25   :  { %4097 = vsyncadd [#allocation6], 4294963200  ;;  %v5572_v0 = vmov 0   ;;  %v3686_v1 = vld [vmem:[%s5561_s2 + $0xac] ss:$12 sps:$4 sm:$0xff]   ;;  %v3711_v11 = vld [vmem:[%s5559_s0] sm:$0xff]   ;;  %v174_v59 = vlaneseq }
  0x26   :  { %373 = vmatprep.mubr.bf16.mxu0 %v5572_v0  ;;  %3684 = vset.pattern.permute.xlu0 %v5572_v0  ;;  %v3688_v2 = vld [vmem:[%s5561_s2 + $0xa8] ss:$12 sps:$4 sm:$0xff]   ;;  %v3691_v4 = vld [vmem:[%s5561_s2 + $0x90] ss:$12 sps:$4 sm:$0xff]   ;;  %v3694_v6 = vld [vmem:[%s5561_s2 + $0x78] ss:$12 sps:$4 sm:$0xff]  }
  0x27   :  { %3685 = vset.pattern.permute.xlu1 %v5572_v0  ;;  %341 = vmatprep.subr.bf16.mxu0 %v3686_v1  ;;  %v3689_v3 = vld [vmem:[%s5561_s2 + $0x94] ss:$12 sps:$4 sm:$0xff]   ;;  %v3692_v5 = vld [vmem:[%s5561_s2 + $0x7c] ss:$12 sps:$4 sm:$0xff]   ;;  %v3695_v7 = vld [vmem:[%s5561_s2 + $0x64] ss:$12 sps:$4 sm:$0xff]  }
  0x28   :  { %342 = vmatpush1.bf16.msra.mxu0 %v3688_v2  ;;  %v3697_v8 = vld [vmem:[%s5561_s2 + $0x60] ss:$12 sps:$4 sm:$0xff]   ;;  %v3710_v10 = vld [vmem:[%s5561_s2 + $0xb0] ss:$12 sps:$4 sm:$0xff]   ;;  %v3700_v12 = vld [vmem:[%s5561_s2 + $0x48] ss:$12 sps:$4 sm:$0xff]   ;;  %3301 = vmatprep.mubr.bf16.mxu1 %v3711_v11 }
  0x29   :  { %343 = vmatprep.subr.bf16.mxu0 %v3689_v3  ;;  %v3698_v9 = vld [vmem:[%s5561_s2 + $0x4c] ss:$12 sps:$4 sm:$0xff]   ;;  %3285 = vmatprep.subr.bf16.mxu1 %v3710_v10  ;;  %v3701_v14 = vld [vmem:[%s5561_s2 + $0x34] ss:$12 sps:$4 sm:$0xff]   ;;  %v3703_v16 = vld [vmem:[%s5561_s2 + $0x30] ss:$12 sps:$4 sm:$0xff]  }
  0x2a   :  { %3286 = vmatpush3.bf16.msra.mxu1 %v3710_v10  ;;  %v3714_v13 = vld [vmem:[%s5561_s2 + $0x98] ss:$12 sps:$4 sm:$0xff]   ;;  %v3718_v15 = vld [vmem:[%s5561_s2 + $0x80] ss:$12 sps:$4 sm:$0xff]   ;;  %v3704_v17 = vld [vmem:[%s5561_s2 + $0x1c] ss:$12 sps:$4 sm:$0xff]  }
  0x2b   :  { %3287 = vmatprep.subr.bf16.mxu1 %v3714_v13  ;;  %v3723_v18 = vld [vmem:[%s5561_s2 + $0x68] ss:$12 sps:$4 sm:$0xff]   ;;  %v3706_v19 = vld [vmem:[%s5561_s2 + $0x18] ss:$12 sps:$4 sm:$0xff]   ;;  %v3727_v20 = vld [vmem:[%s5561_s2 + $0x50] ss:$12 sps:$4 sm:$0xff]  }
  0x2c   :  { %344 = vmatpush1.bf16.msra.mxu0 %v3691_v4  ;;  %v3707_v21 = vld [vmem:[%s5561_s2 + $0x4] ss:$12 sps:$4 sm:$0xff]   ;;  %v3709_v22 = vld [vmem:[%s5561_s2] ss:$12 sps:$4 sm:$0xff]   ;;  %v4263_v25 = vld [vmem:[%s5563_s4 + $0xa8] ss:$12 sps:$4 sm:$0xff]  }
  0x2d   :  { %345 = vmatprep.subr.bf16.mxu0 %v3692_v5  ;;  %v3732_v23 = vld [vmem:[%s5561_s2 + $0x38] ss:$12 sps:$4 sm:$0xff]   ;;  %v4268_v26 = vld [vmem:[%s5563_s4 + $0x94] ss:$12 sps:$4 sm:$0xff]   ;;  %v4277_v28 = vld [vmem:[%s5563_s4 + $0x90] ss:$12 sps:$4 sm:$0xff]  }
  0x2e   :  { %3288 = vmatpush3.bf16.msra.mxu1 %v3714_v13  ;;  %v4258_v24 = vld [vmem:[%s5563_s4 + $0xac] ss:$12 sps:$4 sm:$0xff]   ;;  %v3741_v29 = vld [vmem:[%s5561_s2 + $0x8] ss:$12 sps:$4 sm:$0xff]   ;;  %v4303_v33 = vld [vmem:[%s5563_s4 + $0x64] ss:$12 sps:$4 sm:$0xff]  }
  0x2f   :  { %3289 = vmatprep.subr.bf16.mxu1 %v3718_v15  ;;  %v3736_v27 = vld [vmem:[%s5561_s2 + $0x20] ss:$12 sps:$4 sm:$0xff]   ;;  %v4288_v30 = vld [vmem:[%s5563_s4 + $0x7c] ss:$12 sps:$4 sm:$0xff]   ;;  %v4297_v32 = vld [vmem:[%s5563_s4 + $0x78] ss:$12 sps:$4 sm:$0xff]  }
  0x30   :  { %346 = vmatpush1.bf16.msra.mxu0 %v3694_v6  ;;  %v3720_v31 = vld [vmem:[%s5559_s0 + $0x8] sm:$0xff]   ;;  %v4313_v35 = vld [vmem:[%s5560_s1] sm:$0xff]  ;;  %v3729_v36 = vld [vmem:[%s5559_s0 + $0x10] sm:$0xff]   ;;  %v5574_v40 = vmov 0.0   ;;  %vm4107_vm4 = vmmov 0   ;;  %v175_v60 = vshrl.u32 %v174_v59, 7 }
  0x31   :  { %347 = vmatprep.subr.bf16.mxu0 %v3695_v7  ;;  %v4308_v34 = vld [vmem:[%s5563_s4 + $0x60] ss:$12 sps:$4 sm:$0xff]   ;;  %v4321_v37 = vld [vmem:[%s5563_s4 + $0xb0] ss:$12 sps:$4 sm:$0xff]   ;;  %vm84_vm0 = vcmp.gt.s32.totalorder %v4313_v35, 0  ;;  %vm90_vm1 = vcmp.gt.s32.totalorder %v4313_v35, 1 }
  0x32   :  { %3290 = vmatpush3.bf16.msra.mxu1 %v3718_v15  ;;  %v4329_v38 = vld [vmem:[%s5563_s4 + $0x4c] ss:$12 sps:$4 sm:$0xff]   ;;  %v85_v39 = vsel %vm84_vm0, 1, %v5572_v0  ;;  %v4343_v42 = vld [vmem:[%s5563_s4 + $0x48] ss:$12 sps:$4 sm:$0xff]   ;;  %v91_v44 = vsel %vm90_vm1, 1, %v5572_v0 }
  0x33   :  { %3291 = vmatprep.subr.bf16.mxu1 %v3723_v18  ;;  %v4338_v41 = vld [vmem:[%s5563_s4 + $0x98] ss:$12 sps:$4 sm:$0xff]   ;;  %87 = vperm.xlu0 %3684, %v85_v39   ;;  %v4348_v43 = vld [vmem:[%s5563_s4 + $0x34] ss:$12 sps:$4 sm:$0xff]   ;;  %vm108_vm2 = vcmp.gt.s32.totalorder %v4313_v35, 4  ;;  %vm120_vm3 = vcmp.gt.s32.totalorder %v4313_v35, 6 }
  0x34   :  { %348 = vmatpush1.bf16.msra.mxu0 %v3697_v8  ;;  %v4359_v45 = vld [vmem:[%s5563_s4 + $0x80] ss:$12 sps:$4 sm:$0xff]   ;;  %v4364_v46 = vld [vmem:[%s5563_s4 + $0x30] ss:$12 sps:$4 sm:$0xff]   ;;  %v109_v49 = vsel %vm108_vm2, 1, %v5572_v0  ;;  %v121_v53 = vsel %vm120_vm3, 1, %v5572_v0 }
  0x35   :  { %349 = vmatprep.subr.bf16.mxu0 %v3698_v9  ;;  %v3738_v47 = vld [vmem:[%s5559_s0 + $0x18] sm:$0xff]   ;;  %v4384_v50 = vld [vmem:[%s5563_s4 + $0x68] ss:$12 sps:$4 sm:$0xff]   ;;  %v4394_v52 = vld [vmem:[%s5563_s4 + $0x4] ss:$12 sps:$4 sm:$0xff]   ;;  %v4480_v61 = vsub.s32 0, %v175_v60 }
  0x36   :  { %3292 = vmatpush3.bf16.msra.mxu1 %v3723_v18  ;;  %v4372_v48 = vld [vmem:[%s5563_s4 + $0x1c] ss:$12 sps:$4 sm:$0xff]   ;;  %v4389_v51 = vld [vmem:[%s5563_s4 + $0x18] ss:$12 sps:$4 sm:$0xff]   ;;  %v4411_v55 = vld [vmem:[%s5563_s4] ss:$12 sps:$4 sm:$0xff]  }
  0x37   :  { %3293 = vmatprep.subr.bf16.mxu1 %v3727_v20  ;;  %93 = vperm.xlu0 %3684, %v91_v44   ;;  %v4406_v54 = vld [vmem:[%s5563_s4 + $0x50] ss:$12 sps:$4 sm:$0xff]   ;;  %v4421_v56 = vld [vmem:[%s5563_s4 + $0x38] ss:$12 sps:$4 sm:$0xff]   ;;  %v4429_v57 = vld [vmem:[%s5563_s4 + $0x20] ss:$12 sps:$4 sm:$0xff]  }
  0x38   :  { %350 = vmatpush1.bf16.msra.mxu0 %v3700_v12  ;;  %v4442_v58 = vld [vmem:[%s5563_s4 + $0x8] ss:$12 sps:$4 sm:$0xff]   ;;  %5585 = vst [vmem:[#allocation10_spill] sm:$0xff] %v4480_v61  ;;  %v172_v62 = vld [vmem:[%s5562_s3] sm:$0x7]  ;;  %v4485_v1 = vsub.s32 1, %v175_v60 }
  0x39   :  { %351 = vmatprep.subr.bf16.mxu0 %v3701_v14  ;;  %v177_v3 = vrot.slane %v172_v62, %v4480_v61  ;;  %v4488_v5 = vsub.s32 2, %v175_v60  ;;  %vm96_vm7 = vcmp.gt.s32.totalorder %v4313_v35, 2  ;;  %vm102_vm8 = vcmp.gt.s32.totalorder %v4313_v35, 3 }
  0x3a   :  { %3294 = vmatpush3.bf16.msra.mxu1 %v3727_v20  ;;  %5586 = vst [vmem:[#allocation11_spill] sm:$0xff] %v4485_v1  ;;  %v181_v6 = vrot.slane %v172_v62, %v4485_v1  ;;  %vm114_vm9 = vcmp.gt.s32.totalorder %v4313_v35, 5  ;;  %vm126_vm10 = vcmp.gt.s32.totalorder %v4313_v35, 7  ;;  %vm4108_vm1 = vmmov 1  }
  0x3b   :  { %3295 = vmatprep.subr.bf16.mxu1 %v3732_v23  ;;  %111 = vperm.xlu0 %3684, %v109_v49  }
  0x3c   :  { %352 = vmatpush1.bf16.msra.mxu0 %v3703_v16 }
  0x3d   :  { %353 = vmatprep.subr.bf16.mxu0 %v3704_v17 }
  0x3e   :  { %3296 = vmatpush3.bf16.msra.mxu1 %v3732_v23 }
  0x3f   :  { %3297 = vmatprep.subr.bf16.mxu1 %v3736_v27  ;;  %123 = vperm.xlu0 %3684, %v121_v53  }
  0x40   :  { %354 = vmatpush1.bf16.msra.mxu0 %v3706_v19 }
  0x41   :  { %355 = vmatprep.subr.bf16.mxu0 %v3707_v21 }
  0x42   :  { %3298 = vmatpush3.bf16.msra.mxu1 %v3736_v27 }
  0x43   :  { %3299 = vmatprep.subr.bf16.mxu1 %v3741_v29 }
  0x44   :  { %356 = vmatpush1.bf16.msra.mxu0 %v3709_v22 }
  0x45   :  { %656 = vmatprep.subr.bf16.mxu0 %v4258_v24 }
  0x46   :  { %3300 = vmatpush3.bf16.msra.mxu1 %v3741_v29 }
  0x47   :  { %374 = vmatmul.mubr.bf16.vlgmr.msra.gmra.mxu0 %v3711_v11  ;;  %3309 = vmatprep.subr.bf16.mxu1 %v5574_v40  ;;  %v4496_v11 = vrot.slane %v172_v62, %v4488_v5 }
  0x48   :  { %657 = vmatpush1.bf16.msra.mxu0 %v4263_v25  ;;  %383 = vmatprep.mubr.bf16.mxu0 %v5572_v0 }
  0x49   :  { %658 = vmatprep.subr.bf16.mxu0 %v4268_v26  ;;  %3302 = vmatmul.mubr.bf16.vlgmr.msra.gmra.mxu1 %v3720_v31 }
  0x4a   :  { %3310 = vmatpush3.bf16.msra.mxu1 %v4321_v37  ;;  %3305 = vmatprep.mubr.bf16.mxu1 %v3729_v36 }
  0x4b   :  { %3311 = vmatprep.subr.bf16.mxu1 %v5574_v40 }
  0x4c   :  { %659 = vmatpush1.bf16.msra.mxu0 %v4277_v28 }
  0x4d   :  { %660 = vmatprep.subr.bf16.mxu0 %v4288_v30 }
  0x4e   :  { %3312 = vmatpush3.bf16.msra.mxu1 %v4338_v41 }
  0x4f   :  { %384 = vmatmul.mubr.bf16.gmra.mxu0 %v3720_v31  ;;  %3313 = vmatprep.subr.bf16.mxu1 %v5574_v40 }
  0x50   :  { %661 = vmatpush1.bf16.msra.mxu0 %v4297_v32  ;;  %393 = vmatprep.mubr.bf16.mxu0 %v5572_v0 }
  0x51   :  { %662 = vmatprep.subr.bf16.mxu0 %v4303_v33  ;;  %3306 = vmatmul.mubr.bf16.gmra.mxu1 %v3738_v47 }
  0x52   :  { %3314 = vmatpush3.bf16.msra.mxu1 %v4359_v45  ;;  %3325 = vmatprep.mubr.msk.bf16.mxu1 %vm4107_vm4, %v5574_v40 }
  0x53   :  { %3315 = vmatprep.subr.bf16.mxu1 %v5574_v40 }
  0x54   :  { %663 = vmatpush1.bf16.msra.mxu0 %v4308_v34 }
  0x55   :  { %664 = vmatprep.subr.bf16.mxu0 %v4329_v38 }
  0x56   :  { %3316 = vmatpush3.bf16.msra.mxu1 %v4384_v50 }
  0x57   :  { %394 = vmatmul.mubr.bf16.gmra.mxu0 %v3729_v36  ;;  %3317 = vmatprep.subr.bf16.mxu1 %v5574_v40 }
  0x58   :  { %665 = vmatpush1.bf16.msra.mxu0 %v4343_v42  ;;  %403 = vmatprep.mubr.bf16.mxu0 %v5572_v0 }
  0x59   :  { %666 = vmatprep.subr.bf16.mxu0 %v4348_v43 }
  0x5a   :  { %3318 = vmatpush3.bf16.msra.mxu1 %v4406_v54 }
  0x5b   :  { %3319 = vmatprep.subr.bf16.mxu1 %v5574_v40 }
  0x5c   :  { %667 = vmatpush1.bf16.msra.mxu0 %v4364_v46 }
  0x5d   :  { %668 = vmatprep.subr.bf16.mxu0 %v4372_v48 }
  0x5e   :  { %3320 = vmatpush3.bf16.msra.mxu1 %v4421_v56 }
  0x5f   :  { %404 = vmatmul.mubr.bf16.gmra.mxu0 %v3738_v47  ;;  %3321 = vmatprep.subr.bf16.mxu1 %v5574_v40 }
  0x60   :  { %669 = vmatpush1.bf16.msra.mxu0 %v4389_v51  ;;  %688 = vmatprep.mubr.bf16.mxu0 %v5572_v0 }
  0x61   :  { %670 = vmatprep.subr.bf16.mxu0 %v4394_v52 }
  0x62   :  { %3322 = vmatpush3.bf16.msra.mxu1 %v4429_v57 }
  0x63   :  { %3323 = vmatprep.subr.bf16.mxu1 %v5574_v40 }
  0x64   :  { %671 = vmatpush1.bf16.msra.mxu0 %v4411_v55 }
  0x65   :  { %761 = vmatprep.subr.bf16.mxu0 %v4258_v24 }
  0x66   :  { %3324 = vmatpush3.bf16.msra.mxu1 %v4442_v58 }
  0x67   :  { %689 = vmatmul.mubr.bf16.vlgmr.msra.gmra.mxu0 %v5572_v0  ;;  %3329 = vmatprep.subr.bf16.mxu1 %v5574_v40 }
  0x68   :  { %762 = vmatpush1.bf16.msra.mxu0 %v4263_v25  ;;  %793 = vmatprep.mubr.bf16.mxu0 %v5572_v0 }
  0x69   :  { %763 = vmatprep.subr.bf16.mxu0 %v4268_v26  ;;  %3326 = vmatmul.mubr.bf16.vlgmr.msra.gmra.mxu1 %v5572_v0 }
  0x6a   :  { %3330 = vmatpush3.bf16.msra.mxu1 %v4321_v37  ;;  %3345 = vmatprep.mubr.msk.bf16.mxu1 %vm4107_vm4, %v5574_v40 }
  0x6b   :  { %3331 = vmatprep.subr.bf16.mxu1 %v5574_v40 }
  0x6c   :  { %764 = vmatpush1.bf16.msra.mxu0 %v4277_v28 }
  0x6d   :  { %765 = vmatprep.subr.bf16.mxu0 %v4288_v30 }
  0x6e   :  { %3332 = vmatpush3.bf16.msra.mxu1 %v4338_v41 }
  0x6f   :  { %3333 = vmatprep.subr.bf16.mxu1 %v5574_v40 }
  0x70   :  { %766 = vmatpush1.bf16.msra.mxu0 %v4297_v32 }
  0x71   :  { %767 = vmatprep.subr.bf16.mxu0 %v4303_v33 }
  0x72   :  { %3334 = vmatpush3.bf16.msra.mxu1 %v4359_v45 }
  0x73   :  { %3335 = vmatprep.subr.bf16.mxu1 %v5574_v40 }
  0x74   :  { %768 = vmatpush1.bf16.msra.mxu0 %v4308_v34 }
  0x75   :  { %769 = vmatprep.subr.bf16.mxu0 %v4329_v38 }
  0x76   :  { %3336 = vmatpush3.bf16.msra.mxu1 %v4384_v50 }
  0x77   :  { %3337 = vmatprep.subr.bf16.mxu1 %v5574_v40 }
  0x78   :  { %770 = vmatpush1.bf16.msra.mxu0 %v4343_v42 }
  0x79   :  { %771 = vmatprep.subr.bf16.mxu0 %v4348_v43 }
  0x7a   :  { %3338 = vmatpush3.bf16.msra.mxu1 %v4406_v54 }
  0x7b   :  { %3339 = vmatprep.subr.bf16.mxu1 %v5574_v40 }
  0x7c   :  { %772 = vmatpush1.bf16.msra.mxu0 %v4364_v46 }
  0x7d   :  { %773 = vmatprep.subr.bf16.mxu0 %v4372_v48 }
  0x7e   :  { %3340 = vmatpush3.bf16.msra.mxu1 %v4421_v56 }
  0x7f   :  { %3341 = vmatprep.subr.bf16.mxu1 %v5574_v40 }
  0x80   :  { %774 = vmatpush1.bf16.msra.mxu0 %v4389_v51 }
  0x81   :  { %775 = vmatprep.subr.bf16.mxu0 %v4394_v52 }
  0x82   :  { %3342 = vmatpush3.bf16.msra.mxu1 %v4429_v57 }
  0x83   :  { %3343 = vmatprep.subr.bf16.mxu1 %v5574_v40 }
  0x84   :  { %776 = vmatpush1.bf16.msra.mxu0 %v4411_v55 }
  0x85   :  { %866 = vmatprep.subr.bf16.mxu0 %v4258_v24 }
  0x86   :  { %3344 = vmatpush3.bf16.msra.mxu1 %v4442_v58 }
  0x87   :  { %3349 = vmatprep.subr.bf16.mxu1 %v5574_v40 }
 0x107   :  { %v375_v63 = vpop.f32.mrf.mxu0 }
 0x108   :  { %v376_v0 = vadd.f32 %v375_v63, %v177_v3 }
 0x109   :  { %v377_v2 = vpop.f32.mrf.mxu0  ;;  %v3303_v15 = vpop.f32.mrf.mxu1 }
 0x10a   :  { %v4503_v17 = vadd.f32 %v3303_v15, %v4496_v11 }
 0x10b   :  { %v379_v4 = vpop.f32.mrf.mxu0  ;;  %v448_v19 = vpop.f32.mrf.mxu1 }
 0x10c   :  { %v4491_v7 = vadd.f32 %v379_v4, %v177_v3 }
 0x10d   :  { %v381_v8 = vpop.f32.mrf.mxu0  ;;  %v3304_v22 = vpop.f32.mrf.mxu1 }
 0x10e   :  { %v4493_v9 = vadd.f32 %v381_v8, %v181_v6  ;;  %v4510_v27 = vadd.f32 %v3304_v22, %v4496_v11 }
 0x10f   :  { %v385_v10 = vpop.f32.mrf.mxu0  ;;  %v451_v31 = vpop.f32.mrf.mxu1 }
 0x110   :  { %v4498_v12 = vadd.f32 %v385_v10, %v177_v3  ;;  %v4515_v39 = vadd.f32 %v451_v31, %v4496_v11 }
 0x111   :  { %v387_v13 = vpop.f32.mrf.mxu0  ;;  %v3307_v47 = vpop.f32.mrf.mxu1 }
 0x112   :  { %v4500_v14 = vadd.f32 %v387_v13, %v181_v6  ;;  %v4520_v53 = vadd.f32 %v3307_v47, %v4496_v11 }
 0x113   :  { %v389_v16 = vpop.f32.mrf.mxu0  ;;  %v464_v60 = vpop.f32.mrf.mxu1 }
 0x114   :  { %v4505_v18 = vadd.f32 %v389_v16, %v177_v3  ;;  %5587 = vst [vmem:[#allocation12_spill] sm:$0xff] %v4520_v53  ;;  %v4525_v4 = vadd.f32 %v464_v60, %v4496_v11 }
 0x115   :  { %v391_v20 = vpop.f32.mrf.mxu0  ;;  %v3308_v10 = vpop.f32.mrf.mxu1 }
 0x116   :  { %v4507_v21 = vadd.f32 %v391_v20, %v181_v6  ;;  %v4530_v15 = vadd.f32 %v3308_v10, %v4496_v11 }
 0x117   :  { %v395_v23 = vpop.f32.mrf.mxu0  ;;  %v467_v20 = vpop.f32.mrf.mxu1 }
 0x118   :  { %v4512_v29 = vadd.f32 %v395_v23, %v177_v3  ;;  %5589 = vst [vmem:[#allocation14_spill] sm:$0xff] %v4530_v15  ;;  %v511_v23 = vld [vmem:[%s5564_s5] sm:$0x7]  ;;  %v4538_v31 = vadd.f32 %v467_v20, %v4496_v11 }
 0x119   :  { %v397_v36 = vpop.f32.mrf.mxu0  ;;  %v4545_v60 = vrot.slane %v511_v23, %v4480_v61  ;;  %v4551_v15 = vrot.slane %v511_v23, %v4485_v1  ;;  %v4555_v1 = vrot.slane %v511_v23, %v4488_v5 }
 0x11a   :  { %v4517_v44 = vadd.f32 %v397_v36, %v181_v6  ;;  %5591 = vst [vmem:[#allocation16_spill] sm:$0xff] %v4538_v31 }
 0x11b   :  { %v399_v49 = vpop.f32.mrf.mxu0 }
 0x11c   :  { %v4522_v59 = vadd.f32 %v399_v49, %v177_v3 }
 0x11d   :  { %v401_v62 = vpop.f32.mrf.mxu0 }
 0x11e   :  { %v4527_v8 = vadd.f32 %v401_v62, %v181_v6 }
 0x11f   :  { %v405_v13 = vpop.f32.mrf.mxu0 }
 0x120   :  { %5588 = vst [vmem:[#allocation13_spill] sm:$0xff] %v4527_v8  ;;  %v4532_v16 = vadd.f32 %v405_v13, %v177_v3 }
 0x121   :  { %v407_v22 = vpop.f32.mrf.mxu0 }
 0x122   :  { %5590 = vst [vmem:[#allocation15_spill] sm:$0xff] %v4532_v16  ;;  %v4540_v36 = vadd.f32 %v407_v22, %v181_v6  ;;  %v378_v16 = vadd.f32 %v377_v2, %v181_v6  ;;  %v449_v2 = vadd.f32 %v448_v19, %v4496_v11 }
 0x123   :  { %v409_v47 = vpop.f32.mrf.mxu0 }
 0x124   :  { %5592 = vst [vmem:[#allocation17_spill] sm:$0xff] %v4540_v36  ;;  %v4542_v49 = vadd.f32 %v409_v47, %v177_v3 }
 0x125   :  { %v411_v62 = vpop.f32.mrf.mxu0 }
 0x126   :  { %5593 = vst [vmem:[#allocation18_spill] sm:$0xff] %v4542_v49  ;;  %v4547_v10 = vadd.f32 %v411_v62, %v181_v6 }
 0x127   :  { %v690_v13 = vpop.f32.mrf.mxu0 }
 0x128   :  { %5594 = vst [vmem:[#allocation19_spill] sm:$0xff] %v4547_v10  ;;  %v691_v40 = vadd.f32 %v690_v13, %v4545_v60 }
 0x129   :  { %v692_v20 = vpop.f32.mrf.mxu0  ;;  %v731_v31 = vpop.f32.mrf.mxu1 }
 0x12a   :  { %v737_v53 = vadd.f32 %v691_v40, %v376_v0  ;;  %v693_v47 = vadd.f32 %v692_v20, %v4551_v15 }
 0x12b   :  { %v694_v22 = vpop.f32.mrf.mxu0  ;;  %v3327_v10 = vpop.f32.mrf.mxu1 }
 0x12c   :  { %v3001_v36 = vmul.f32 -1.442695, %v737_v53  ;;  %v744_v61 = vadd.f32 %v693_v47, %v378_v16  ;;  %v732_v53 = vadd.f32 %v731_v31, %v4555_v1  ;;  %v4559_v10 = vpop.permute.xlu0 %87  ;;  %v5597_v31 = vmov 0.0  }
 0x12d   :  { %v695_v49 = vpop.f32.mrf.mxu0  ;;  %v734_v8 = vpop.f32.mrf.mxu1  ;;  %vm89_vm5 = vcmp.eq.s32.totalorder %v4559_v10, 1  ;;  %v5598_v47 = vmov 0  }
 0x12e   :  { %3826 = vpow2.f32 %v3001_v36  ;;  %v3002_v62 = vmul.f32 -1.442695, %v744_v61  ;;  %vm4567_vm6 = vmpackc.low %vm89_vm5, %vm89_vm5 }
 0x12f   :  { %v3328_v63 = vpop.f32.mrf.mxu1  ;;  %vm5011_vm2 = vmpackc.low %vm4108_vm1, %vm89_vm5 }
 0x130   :  { %3828 = vpow2.f32 %v3002_v62  ;;  %v97_v62 = vsel %vm96_vm7, 1, %v5598_v47  ;;  %v103_v63 = vsel %vm102_vm8, 1, %v5598_v47 }
 0x131   :  { %99 = vperm.xlu1 %3685, %v97_v62  }
 0x135   :  { %105 = vperm.xlu1 %3685, %v103_v63  }
 0x13b   :  { %v3827_v3 = vpop.eup %3826 }
 0x13c   :  { %v741_v13 = vadd.f32 1.0, %v3827_v3  ;;  %v115_v3 = vsel %vm114_vm9, 1, %v5598_v47 }
 0x13d   :  { %v3829_v0 = vpop.eup %3828  ;;  %117 = vperm.xlu1 %3685, %v115_v3  }
 0x13e   :  { %3830 = vrcp.f32 %v741_v13  ;;  %v748_v40 = vadd.f32 1.0, %v3829_v0  ;;  %v127_v13 = vsel %vm126_vm10, 1, %v5598_v47 }
 0x140   :  { %3832 = vrcp.f32 %v748_v40 }
 0x141   :  { %129 = vperm.xlu1 %3685, %v127_v13  }
 0x14b   :  { %v3831_v49 = vpop.eup %3830 }
 0x14c   :  { %v751_v6 = vmul.f32 %v3831_v49, %v732_v53 }
 0x14d   :  { %v3833_v8 = vpop.eup %3832 }
 0x14e   :  { %v752_v61 = vadd.f32 %v751_v6, %v449_v2  ;;  %v754_v16 = vsub.f32 1.0, %v3833_v8  ;;  %v756_v22 = vmul.f32 0.0, %v3833_v8 }
 0x150   :  { %3834 = vtanh.f32 %v752_v61 }
 0x15d   :  { %v3835_v36 = vpop.eup %3834 }
 0x15e   :  { %v755_v20 = vmul.f32 %v3835_v36, %v754_v16 }
 0x160   :  { %v4562_v23 = vadd.f32 %v756_v22, %v755_v20 }
 0x162   :  { %v3004_v19 = vpack.c.bf16 %v4562_v23, %v4562_v23 }
 0x164   :  { %3005 = vmatmul.mubr.msk.bf16.vlgmr.msra.gmra.mxu0 %vm4567_vm6, %v3004_v19  ;;  %3346 = vmatmul.mubr.msk.bf16.vlgmr.msra.gmra.mxu1 %vm4567_vm6, %v3004_v19 }
 0x165   :  { %867 = vmatpush1.bf16.msra.mxu0 %v4263_v25  ;;  %3350 = vmatpush3.bf16.msra.mxu1 %v4321_v37 }
 0x166   :  { %868 = vmatprep.subr.bf16.mxu0 %v4268_v26  ;;  %3351 = vmatprep.subr.bf16.mxu1 %v5597_v31 }
 0x167   :  { %898 = vmatprep.mubr.bf16.mxu0 %v5598_v47  ;;  %3365 = vmatprep.mubr.msk.bf16.mxu1 %vm4107_vm4, %v5597_v31 }
 0x169   :  { %869 = vmatpush1.bf16.msra.mxu0 %v4277_v28  ;;  %3352 = vmatpush3.bf16.msra.mxu1 %v4338_v41 }
 0x16a   :  { %870 = vmatprep.subr.bf16.mxu0 %v4288_v30  ;;  %3353 = vmatprep.subr.bf16.mxu1 %v5597_v31 }
 0x16d   :  { %871 = vmatpush1.bf16.msra.mxu0 %v4297_v32  ;;  %3354 = vmatpush3.bf16.msra.mxu1 %v4359_v45 }
 0x16e   :  { %872 = vmatprep.subr.bf16.mxu0 %v4303_v33  ;;  %3355 = vmatprep.subr.bf16.mxu1 %v5597_v31 }
 0x171   :  { %873 = vmatpush1.bf16.msra.mxu0 %v4308_v34  ;;  %3356 = vmatpush3.bf16.msra.mxu1 %v4384_v50 }
 0x172   :  { %874 = vmatprep.subr.bf16.mxu0 %v4329_v38  ;;  %3357 = vmatprep.subr.bf16.mxu1 %v5597_v31 }
 0x175   :  { %875 = vmatpush1.bf16.msra.mxu0 %v4343_v42  ;;  %3358 = vmatpush3.bf16.msra.mxu1 %v4406_v54 }
 0x176   :  { %876 = vmatprep.subr.bf16.mxu0 %v4348_v43  ;;  %3359 = vmatprep.subr.bf16.mxu1 %v5597_v31 }
 0x179   :  { %877 = vmatpush1.bf16.msra.mxu0 %v4364_v46  ;;  %3360 = vmatpush3.bf16.msra.mxu1 %v4421_v56 }
 0x17a   :  { %878 = vmatprep.subr.bf16.mxu0 %v4372_v48  ;;  %3361 = vmatprep.subr.bf16.mxu1 %v5597_v31 }
 0x17d   :  { %879 = vmatpush1.bf16.msra.mxu0 %v4389_v51  ;;  %3362 = vmatpush3.bf16.msra.mxu1 %v4429_v57 }
 0x17e   :  { %880 = vmatprep.subr.bf16.mxu0 %v4394_v52  ;;  %3363 = vmatprep.subr.bf16.mxu1 %v5597_v31 }
 0x181   :  { %881 = vmatpush1.bf16.msra.mxu0 %v4411_v55  ;;  %3364 = vmatpush3.bf16.msra.mxu1 %v4442_v58 }
 0x182   :  { %971 = vmatprep.subr.bf16.mxu0 %v4258_v24  ;;  %3369 = vmatprep.subr.bf16.mxu1 %v5597_v31 }
 0x224   :  { %v795_v0 = vpop.f32.mrf.mxu0  ;;  %v836_v40 = vpop.f32.mrf.mxu1 }
 0x225   :  { %v796_v53 = vadd.f32 %v795_v0, %v4545_v60  ;;  %v837_v0 = vadd.f32 %v836_v40, %v4555_v1 }
 0x226   :  { %v797_v49 = vpop.f32.mrf.mxu0  ;;  %v3347_v2 = vpop.f32.mrf.mxu1 }
 0x227   :  { %v842_v6 = vadd.f32 %v796_v53, %v4491_v7  ;;  %v798_v36 = vadd.f32 %v797_v49, %v4551_v15 }
 0x228   :  { %v799_v61 = vpop.f32.mrf.mxu0  ;;  %v839_v8 = vpop.f32.mrf.mxu1 }
 0x229   :  { %v3009_v16 = vmul.f32 -1.442695, %v842_v6  ;;  %v849_v35 = vadd.f32 %v798_v36, %v4493_v9  ;;  %v758_v9 = vsel %vm89_vm5, %v4562_v23, 0.0  ;;  %v4629_v36 = vpop.permute.xlu0 %93 }
 0x22a   :  { %v800_v20 = vpop.f32.mrf.mxu0  ;;  %v3348_v22 = vpop.f32.mrf.mxu1  ;;  %vm95_vm11 = vcmp.eq.s32.totalorder %v4629_v36, 1 }
 0x22b   :  { %3836 = vpow2.f32 %v3009_v16  ;;  %v3010_v19 = vmul.f32 -1.442695, %v849_v35 }
 0x22d   :  { %3838 = vpow2.f32 %v3010_v19 }
 0x238   :  { %v3837_v62 = vpop.eup %3836 }
 0x239   :  { %v846_v63 = vadd.f32 1.0, %v3837_v62 }
 0x23a   :  { %v3839_v3 = vpop.eup %3838 }
 0x23b   :  { %3840 = vrcp.f32 %v846_v63  ;;  %v853_v13 = vadd.f32 1.0, %v3839_v3 }
 0x23d   :  { %3842 = vrcp.f32 %v853_v13 }
 0x248   :  { %v3841_v7 = vpop.eup %3840 }
 0x249   :  { %v856_v53 = vmul.f32 %v3841_v7, %v837_v0 }
 0x24a   :  { %v3843_v49 = vpop.eup %3842 }
 0x24b   :  { %v857_v2 = vadd.f32 %v856_v53, %v4515_v39  ;;  %v859_v6 = vsub.f32 1.0, %v3843_v49  ;;  %v861_v16 = vmul.f32 %v3843_v49, %v758_v9 }
 0x24d   :  { %3844 = vtanh.f32 %v857_v2 }
 0x25a   :  { %v3845_v61 = vpop.eup %3844 }
 0x25b   :  { %v860_v8 = vmul.f32 %v3845_v61, %v859_v6 }
 0x25d   :  { %v862_v20 = vadd.f32 %v861_v16, %v860_v8 }
 0x25f   :  { %v4634_v40 = vsel %vm95_vm11, %v862_v20, %v758_v9 }
 0x260   :  { %v865_v39 = vpack.c.bf16 %v4634_v40, %v4634_v40 }
 0x262   :  { %899 = vmatmul.mubr.bf16.vlgmr.msra.gmra.mxu0 %v865_v39  ;;  %3366 = vmatmul.mubr.bf16.vlgmr.msra.gmra.mxu1 %v865_v39 }
 0x263   :  { %972 = vmatpush1.bf16.msra.mxu0 %v4263_v25  ;;  %3370 = vmatpush3.bf16.msra.mxu1 %v4321_v37 }
 0x264   :  { %973 = vmatprep.subr.bf16.mxu0 %v4268_v26  ;;  %3371 = vmatprep.subr.bf16.mxu1 %v5597_v31 }
 0x265   :  { %1003 = vmatprep.mubr.bf16.mxu0 %v5598_v47  ;;  %3385 = vmatprep.mubr.msk.bf16.mxu1 %vm4107_vm4, %v5597_v31 }
 0x267   :  { %974 = vmatpush1.bf16.msra.mxu0 %v4277_v28  ;;  %3372 = vmatpush3.bf16.msra.mxu1 %v4338_v41 }
 0x268   :  { %975 = vmatprep.subr.bf16.mxu0 %v4288_v30  ;;  %3373 = vmatprep.subr.bf16.mxu1 %v5597_v31 }
 0x26b   :  { %976 = vmatpush1.bf16.msra.mxu0 %v4297_v32  ;;  %3374 = vmatpush3.bf16.msra.mxu1 %v4359_v45 }
 0x26c   :  { %977 = vmatprep.subr.bf16.mxu0 %v4303_v33  ;;  %3375 = vmatprep.subr.bf16.mxu1 %v5597_v31 }
 0x26f   :  { %978 = vmatpush1.bf16.msra.mxu0 %v4308_v34  ;;  %3376 = vmatpush3.bf16.msra.mxu1 %v4384_v50 }
 0x270   :  { %979 = vmatprep.subr.bf16.mxu0 %v4329_v38  ;;  %3377 = vmatprep.subr.bf16.mxu1 %v5597_v31 }
 0x273   :  { %980 = vmatpush1.bf16.msra.mxu0 %v4343_v42  ;;  %3378 = vmatpush3.bf16.msra.mxu1 %v4406_v54 }
 0x274   :  { %981 = vmatprep.subr.bf16.mxu0 %v4348_v43  ;;  %3379 = vmatprep.subr.bf16.mxu1 %v5597_v31 }
 0x277   :  { %982 = vmatpush1.bf16.msra.mxu0 %v4364_v46  ;;  %3380 = vmatpush3.bf16.msra.mxu1 %v4421_v56 }
 0x278   :  { %983 = vmatprep.subr.bf16.mxu0 %v4372_v48  ;;  %3381 = vmatprep.subr.bf16.mxu1 %v5597_v31 }
 0x27b   :  { %984 = vmatpush1.bf16.msra.mxu0 %v4389_v51  ;;  %3382 = vmatpush3.bf16.msra.mxu1 %v4429_v57 }
 0x27c   :  { %985 = vmatprep.subr.bf16.mxu0 %v4394_v52  ;;  %3383 = vmatprep.subr.bf16.mxu1 %v5597_v31 }
 0x27f   :  { %986 = vmatpush1.bf16.msra.mxu0 %v4411_v55  ;;  %3384 = vmatpush3.bf16.msra.mxu1 %v4442_v58 }
 0x280   :  { %1076 = vmatprep.subr.bf16.mxu0 %v4258_v24  ;;  %3389 = vmatprep.subr.bf16.mxu1 %v5597_v31 }
 0x322   :  { %v900_v22 = vpop.f32.mrf.mxu0  ;;  %v941_v35 = vpop.f32.mrf.mxu1 }
 0x323   :  { %v901_v19 = vadd.f32 %v900_v22, %v4545_v60  ;;  %v942_v20 = vadd.f32 %v941_v35, %v4555_v1 }
 0x324   :  { %v902_v62 = vpop.f32.mrf.mxu0  ;;  %v3367_v63 = vpop.f32.mrf.mxu1 }
 0x325   :  { %v947_v3 = vadd.f32 %v901_v19, %v4498_v12  ;;  %v903_v53 = vadd.f32 %v902_v62, %v4551_v15 }
 0x326   :  { %v904_v13 = vpop.f32.mrf.mxu0  ;;  %v944_v0 = vpop.f32.mrf.mxu1 }
 0x327   :  { %v3011_v7 = vmul.f32 -1.442695, %v947_v3  ;;  %v954_v24 = vadd.f32 %v903_v53, %v4500_v14  ;;  %v4679_v3 = vpop.permute.xlu1 %99 }
 0x328   :  { %v905_v2 = vpop.f32.mrf.mxu0  ;;  %v3368_v49 = vpop.f32.mrf.mxu1  ;;  %vm101_vm12 = vcmp.eq.s32.totalorder %v4679_v3, 1 }
 0x329   :  { %3846 = vpow2.f32 %v3011_v7  ;;  %v3012_v6 = vmul.f32 -1.442695, %v954_v24 }
 0x32b   :  { %3848 = vpow2.f32 %v3012_v6 }
 0x336   :  { %v3847_v61 = vpop.eup %3846 }
 0x337   :  { %v951_v9 = vadd.f32 1.0, %v3847_v61 }
 0x338   :  { %v3849_v8 = vpop.eup %3848 }
 0x339   :  { %3850 = vrcp.f32 %v951_v9  ;;  %v958_v16 = vadd.f32 1.0, %v3849_v8 }
 0x33b   :  { %3852 = vrcp.f32 %v958_v16 }
 0x346   :  { %v3851_v12 = vpop.eup %3850 }
 0x347   :  { %v961_v39 = vmul.f32 %v3851_v12, %v942_v20 }
 0x348   :  { %v3853_v19 = vpop.eup %3852 }
 0x349   :  { %v962_v22 = vadd.f32 %v961_v39, %v4503_v17  ;;  %v964_v62 = vsub.f32 1.0, %v3853_v19  ;;  %v966_v13 = vmul.f32 %v3853_v19, %v4634_v40 }
 0x34b   :  { %3854 = vtanh.f32 %v962_v22 }
 0x358   :  { %v3855_v63 = vpop.eup %3854 }
 0x359   :  { %v965_v14 = vmul.f32 %v3855_v63, %v964_v62  ;;  %v4737_v62 = vpop.permute.xlu1 %105 }
 0x35a   :  { %5599 = vst [vmem:[#allocation20_spill] sm:$0xff] %v4737_v62  ;;  %vm107_vm13 = vcmp.eq.s32.totalorder %v4737_v62, 1 }
 0x35b   :  { %v967_v0 = vadd.f32 %v966_v13, %v965_v14  ;;  %v4750_v13 = vld [vmem:[%s5563_s4 + $0xa8] ss:$12 sps:$4 sm:$0xff]  }
 0x35d   :  { %v4686_v35 = vsel %vm101_vm12, %v967_v0, %v4634_v40  ;;  %v4756_v0 = vld [vmem:[%s5563_s4 + $0xb0] ss:$12 sps:$4 sm:$0xff]  }
 0x35e   :  { %v970_v17 = vpack.c.bf16 %v4686_v35, %v4686_v35 }
 0x360   :  { %1004 = vmatmul.mubr.bf16.vlgmr.msra.gmra.mxu0 %v970_v17  ;;  %3386 = vmatmul.mubr.bf16.vlgmr.msra.gmra.mxu1 %v970_v17  ;;  %v4762_v17 = vld [vmem:[%s5563_s4 + $0x94] ss:$12 sps:$4 sm:$0xff]  }
 0x361   :  { %1077 = vmatpush1.bf16.msra.mxu0 %v4263_v25  ;;  %3390 = vmatpush3.bf16.msra.mxu1 %v4321_v37  ;;  %v4726_v25 = vld [vmem:[%s5563_s4 + $0xac] ss:$12 sps:$4 sm:$0xff]  }
 0x362   :  { %1078 = vmatprep.subr.bf16.mxu0 %v4268_v26  ;;  %3391 = vmatprep.subr.bf16.mxu1 %v5597_v31 }
 0x363   :  { %1108 = vmatprep.mubr.bf16.mxu0 %v5598_v47  ;;  %3405 = vmatprep.mubr.msk.bf16.mxu1 %vm4107_vm4, %v5597_v31 }
 0x365   :  { %1079 = vmatpush1.bf16.msra.mxu0 %v4277_v28  ;;  %3392 = vmatpush3.bf16.msra.mxu1 %v4338_v41 }
 0x366   :  { %1080 = vmatprep.subr.bf16.mxu0 %v4288_v30  ;;  %3393 = vmatprep.subr.bf16.mxu1 %v5597_v31 }
 0x369   :  { %1081 = vmatpush1.bf16.msra.mxu0 %v4297_v32  ;;  %3394 = vmatpush3.bf16.msra.mxu1 %v4359_v45 }
 0x36a   :  { %1082 = vmatprep.subr.bf16.mxu0 %v4303_v33  ;;  %3395 = vmatprep.subr.bf16.mxu1 %v5597_v31 }
 0x36d   :  { %1083 = vmatpush1.bf16.msra.mxu0 %v4308_v34  ;;  %3396 = vmatpush3.bf16.msra.mxu1 %v4384_v50 }
 0x36e   :  { %1084 = vmatprep.subr.bf16.mxu0 %v4329_v38  ;;  %3397 = vmatprep.subr.bf16.mxu1 %v5597_v31 }
 0x371   :  { %1085 = vmatpush1.bf16.msra.mxu0 %v4343_v42  ;;  %3398 = vmatpush3.bf16.msra.mxu1 %v4406_v54 }
 0x372   :  { %1086 = vmatprep.subr.bf16.mxu0 %v4348_v43  ;;  %3399 = vmatprep.subr.bf16.mxu1 %v5597_v31 }
 0x375   :  { %1087 = vmatpush1.bf16.msra.mxu0 %v4364_v46  ;;  %3400 = vmatpush3.bf16.msra.mxu1 %v4421_v56 }
 0x376   :  { %1088 = vmatprep.subr.bf16.mxu0 %v4372_v48  ;;  %3401 = vmatprep.subr.bf16.mxu1 %v5597_v31 }
 0x379   :  { %1089 = vmatpush1.bf16.msra.mxu0 %v4389_v51  ;;  %3402 = vmatpush3.bf16.msra.mxu1 %v4429_v57 }
 0x37a   :  { %1090 = vmatprep.subr.bf16.mxu0 %v4394_v52  ;;  %3403 = vmatprep.subr.bf16.mxu1 %v5597_v31 }
 0x37d   :  { %1091 = vmatpush1.bf16.msra.mxu0 %v4411_v55  ;;  %3404 = vmatpush3.bf16.msra.mxu1 %v4442_v58 }
 0x37e   :  { %1181 = vmatprep.subr.bf16.mxu0 %v4726_v25  ;;  %3409 = vmatprep.subr.bf16.mxu1 %v5597_v31 }
 0x420   :  { %v1005_v26 = vpop.f32.mrf.mxu0  ;;  %v1046_v28 = vpop.f32.mrf.mxu1 }
 0x421   :  { %v1006_v30 = vadd.f32 %v1005_v26, %v4545_v60  ;;  %v1047_v8 = vadd.f32 %v1046_v28, %v4555_v1  ;;  %v4772_v26 = vld [vmem:[%s5563_s4 + $0x90] ss:$12 sps:$4 sm:$0xff]  }
 0x422   :  { %v1007_v32 = vpop.f32.mrf.mxu0  ;;  %v3387_v33 = vpop.f32.mrf.mxu1  ;;  %v4779_v28 = vld [vmem:[%s5563_s4 + $0x7c] ss:$12 sps:$4 sm:$0xff]  }
 0x423   :  { %v1052_v34 = vadd.f32 %v1006_v30, %v4505_v18  ;;  %v1008_v43 = vadd.f32 %v1007_v32, %v4551_v15  ;;  %v4786_v30 = vld [vmem:[%s5563_s4 + $0x78] ss:$12 sps:$4 sm:$0xff]   ;;  %v4800_v32 = vld [vmem:[%s5563_s4 + $0x60] ss:$12 sps:$4 sm:$0xff]   ;;  %v4814_v33 = vld [vmem:[%s5563_s4 + $0x48] ss:$12 sps:$4 sm:$0xff]  }
 0x424   :  { %v1009_v37 = vpop.f32.mrf.mxu0  ;;  %v1049_v38 = vpop.f32.mrf.mxu1 }
 0x425   :  { %v3013_v42 = vmul.f32 -1.442695, %v1052_v34  ;;  %v1059_v2 = vadd.f32 %v1008_v43, %v4507_v21 }
 0x426   :  { %v1010_v7 = vpop.f32.mrf.mxu0  ;;  %v3388_v53 = vpop.f32.mrf.mxu1 }
 0x427   :  { %3856 = vpow2.f32 %v3013_v42  ;;  %v3014_v49 = vmul.f32 -1.442695, %v1059_v2 }
 0x429   :  { %3858 = vpow2.f32 %v3014_v49 }
 0x434   :  { %v3857_v24 = vpop.eup %3856 }
 0x435   :  { %v1056_v6 = vadd.f32 1.0, %v3857_v24 }
 0x436   :  { %v3859_v61 = vpop.eup %3858 }
 0x437   :  { %3860 = vrcp.f32 %v1056_v6  ;;  %v1063_v9 = vadd.f32 1.0, %v3859_v61 }
 0x439   :  { %3862 = vrcp.f32 %v1063_v9 }
 0x444   :  { %v3861_v18 = vpop.eup %3860 }
 0x445   :  { %v1066_v16 = vmul.f32 %v3861_v18, %v1047_v8 }
 0x446   :  { %v3863_v12 = vpop.eup %3862 }
 0x447   :  { %v1067_v20 = vadd.f32 %v1066_v16, %v4510_v27  ;;  %v1069_v39 = vsub.f32 1.0, %v3863_v12  ;;  %v1071_v21 = vmul.f32 %v3863_v12, %v4686_v35 }
 0x449   :  { %3864 = vtanh.f32 %v1067_v20 }
 0x456   :  { %v3865_v22 = vpop.eup %3864 }
 0x457   :  { %v1070_v19 = vmul.f32 %v3865_v22, %v1069_v39  ;;  %v4844_v22 = vpop.permute.xlu0 %111 }
 0x458   :  { %5600 = vst [vmem:[#allocation21_spill] sm:$0xff] %v4844_v22  ;;  %vm113_vm14 = vcmp.eq.s32.totalorder %v4844_v22, 1 }
 0x459   :  { %v1072_v63 = vadd.f32 %v1071_v21, %v1070_v19 }
 0x45b   :  { %v4743_v14 = vsel %vm107_vm13, %v1072_v63, %v4686_v35  ;;  %v4865_v63 = vld [vmem:[%s5563_s4 + $0x98] ss:$12 sps:$4 sm:$0xff]  }
 0x45c   :  { %v1075_v27 = vpack.c.bf16 %v4743_v14, %v4743_v14 }
 0x45e   :  { %1109 = vmatmul.mubr.bf16.vlgmr.msra.gmra.mxu0 %v1075_v27  ;;  %3406 = vmatmul.mubr.bf16.vlgmr.msra.gmra.mxu1 %v1075_v27  ;;  %v4874_v27 = vld [vmem:[%s5563_s4 + $0x80] ss:$12 sps:$4 sm:$0xff]  }
 0x45f   :  { %1182 = vmatpush1.bf16.msra.mxu0 %v4750_v13  ;;  %3410 = vmatpush3.bf16.msra.mxu1 %v4756_v0 }
 0x460   :  { %1183 = vmatprep.subr.bf16.mxu0 %v4762_v17  ;;  %3411 = vmatprep.subr.bf16.mxu1 %v5597_v31 }
 0x461   :  { %1213 = vmatprep.mubr.bf16.mxu0 %v5598_v47  ;;  %3425 = vmatprep.mubr.msk.bf16.mxu1 %vm4107_vm4, %v5597_v31 }
 0x463   :  { %1184 = vmatpush1.bf16.msra.mxu0 %v4772_v26  ;;  %3412 = vmatpush3.bf16.msra.mxu1 %v4338_v41  ;;  %v4793_v41 = vld [vmem:[%s5563_s4 + $0x64] ss:$12 sps:$4 sm:$0xff]  }
 0x464   :  { %1185 = vmatprep.subr.bf16.mxu0 %v4779_v28  ;;  %3413 = vmatprep.subr.bf16.mxu1 %v5597_v31 }
 0x467   :  { %1186 = vmatpush1.bf16.msra.mxu0 %v4786_v30  ;;  %3414 = vmatpush3.bf16.msra.mxu1 %v4359_v45  ;;  %v4807_v45 = vld [vmem:[%s5563_s4 + $0x4c] ss:$12 sps:$4 sm:$0xff]  }
 0x468   :  { %1187 = vmatprep.subr.bf16.mxu0 %v4793_v41  ;;  %3415 = vmatprep.subr.bf16.mxu1 %v5597_v31 }
 0x46b   :  { %1188 = vmatpush1.bf16.msra.mxu0 %v4800_v32  ;;  %3416 = vmatpush3.bf16.msra.mxu1 %v4384_v50  ;;  %v4821_v50 = vld [vmem:[%s5563_s4 + $0x34] ss:$12 sps:$4 sm:$0xff]  }
 0x46c   :  { %1189 = vmatprep.subr.bf16.mxu0 %v4807_v45  ;;  %3417 = vmatprep.subr.bf16.mxu1 %v5597_v31 }
 0x46f   :  { %1190 = vmatpush1.bf16.msra.mxu0 %v4814_v33  ;;  %3418 = vmatpush3.bf16.msra.mxu1 %v4406_v54 }
 0x470   :  { %1191 = vmatprep.subr.bf16.mxu0 %v4821_v50  ;;  %3419 = vmatprep.subr.bf16.mxu1 %v5597_v31 }
 0x473   :  { %1192 = vmatpush1.bf16.msra.mxu0 %v4364_v46  ;;  %3420 = vmatpush3.bf16.msra.mxu1 %v4421_v56 }
 0x474   :  { %1193 = vmatprep.subr.bf16.mxu0 %v4372_v48  ;;  %3421 = vmatprep.subr.bf16.mxu1 %v5597_v31 }
 0x477   :  { %1194 = vmatpush1.bf16.msra.mxu0 %v4389_v51  ;;  %3422 = vmatpush3.bf16.msra.mxu1 %v4429_v57 }
 0x478   :  { %1195 = vmatprep.subr.bf16.mxu0 %v4394_v52  ;;  %3423 = vmatprep.subr.bf16.mxu1 %v5597_v31 }
 0x47b   :  { %1196 = vmatpush1.bf16.msra.mxu0 %v4411_v55  ;;  %3424 = vmatpush3.bf16.msra.mxu1 %v4442_v58 }
 0x47c   :  { %1286 = vmatprep.subr.bf16.mxu0 %v4726_v25  ;;  %3429 = vmatprep.subr.bf16.mxu1 %v5597_v31 }
 0x51e   :  { %v1110_v46 = vpop.f32.mrf.mxu0  ;;  %v1151_v48 = vpop.f32.mrf.mxu1 }
 0x51f   :  { %v1111_v54 = vadd.f32 %v1110_v46, %v4545_v60  ;;  %v1152_v9 = vadd.f32 %v1151_v48, %v4555_v1  ;;  %v4883_v46 = vld [vmem:[%s5563_s4 + $0x68] ss:$12 sps:$4 sm:$0xff]   ;;  %v4892_v48 = vld [vmem:[%s5563_s4 + $0x50] ss:$12 sps:$4 sm:$0xff]  }
 0x520   :  { %v1112_v34 = vpop.f32.mrf.mxu0  ;;  %v3407_v51 = vpop.f32.mrf.mxu1 }
 0x521   :  { %v1157_v37 = vadd.f32 %v1111_v54, %v4512_v29  ;;  %v1113_v43 = vadd.f32 %v1112_v34, %v4551_v15  ;;  %v4900_v54 = vld [vmem:[%s5563_s4 + $0x30] ss:$12 sps:$4 sm:$0xff]   ;;  %v4914_v51 = vld [vmem:[%s5563_s4 + $0x18] ss:$12 sps:$4 sm:$0xff]  }
 0x522   :  { %v1114_v38 = vpop.f32.mrf.mxu0  ;;  %v1154_v52 = vpop.f32.mrf.mxu1  ;;  %v4907_v34 = vld [vmem:[%s5563_s4 + $0x1c] ss:$12 sps:$4 sm:$0xff]  }
 0x523   :  { %v3015_v42 = vmul.f32 -1.442695, %v1157_v37  ;;  %v1164_v53 = vadd.f32 %v1113_v43, %v4517_v44  ;;  %v4928_v37 = vld [vmem:[%s5563_s4] ss:$12 sps:$4 sm:$0xff]  }
 0x524   :  { %v1115_v55 = vpop.f32.mrf.mxu0  ;;  %v3408_v7 = vpop.f32.mrf.mxu1 }
 0x525   :  { %3866 = vpow2.f32 %v3015_v42  ;;  %v3016_v2 = vmul.f32 -1.442695, %v1164_v53 }
 0x527   :  { %3868 = vpow2.f32 %v3016_v2 }
 0x532   :  { %v3867_v49 = vpop.eup %3866 }
 0x533   :  { %v1161_v24 = vadd.f32 1.0, %v3867_v49 }
 0x534   :  { %v3869_v6 = vpop.eup %3868 }
 0x535   :  { %3870 = vrcp.f32 %v1161_v24  ;;  %v1168_v61 = vadd.f32 1.0, %v3869_v6 }
 0x537   :  { %3872 = vrcp.f32 %v1168_v61 }
 0x542   :  { %v3871_v29 = vpop.eup %3870 }
 0x543   :  { %v1171_v8 = vmul.f32 %v3871_v29, %v1152_v9 }
 0x544   :  { %v3873_v16 = vpop.eup %3872 }
 0x545   :  { %v1172_v18 = vadd.f32 %v1171_v8, %v4525_v4  ;;  %v1174_v20 = vsub.f32 1.0, %v3873_v16  ;;  %v1176_v44 = vmul.f32 %v3873_v16, %v4743_v14 }
 0x547   :  { %3874 = vtanh.f32 %v1172_v18 }
 0x554   :  { %v3875_v12 = vpop.eup %3874 }
 0x555   :  { %v1175_v39 = vmul.f32 %v3875_v12, %v1174_v20  ;;  %v5602_v12 = vld [vmem:[#allocation16_spill] sm:$0xff] }
 0x557   :  { %v1177_v19 = vadd.f32 %v1176_v44, %v1175_v39 }
 0x559   :  { %v4850_v21 = vsel %vm113_vm14, %v1177_v19, %v4743_v14 }
 0x55a   :  { %v1180_v4 = vpack.c.bf16 %v4850_v21, %v4850_v21 }
 0x55c   :  { %1214 = vmatmul.mubr.bf16.vlgmr.msra.gmra.mxu0 %v1180_v4  ;;  %3426 = vmatmul.mubr.bf16.vlgmr.msra.gmra.mxu1 %v1180_v4 }
 0x55d   :  { %1287 = vmatpush1.bf16.msra.mxu0 %v4750_v13  ;;  %3430 = vmatpush3.bf16.msra.mxu1 %v4756_v0 }
 0x55e   :  { %1288 = vmatprep.subr.bf16.mxu0 %v4762_v17  ;;  %3431 = vmatprep.subr.bf16.mxu1 %v5597_v31 }
 0x55f   :  { %1318 = vmatprep.mubr.bf16.mxu0 %v5598_v47  ;;  %3445 = vmatprep.mubr.msk.bf16.mxu1 %vm4107_vm4, %v5597_v31 }
 0x561   :  { %1289 = vmatpush1.bf16.msra.mxu0 %v4772_v26  ;;  %3432 = vmatpush3.bf16.msra.mxu1 %v4865_v63 }
 0x562   :  { %1290 = vmatprep.subr.bf16.mxu0 %v4779_v28  ;;  %3433 = vmatprep.subr.bf16.mxu1 %v5597_v31 }
 0x565   :  { %1291 = vmatpush1.bf16.msra.mxu0 %v4786_v30  ;;  %3434 = vmatpush3.bf16.msra.mxu1 %v4874_v27 }
 0x566   :  { %1292 = vmatprep.subr.bf16.mxu0 %v4793_v41  ;;  %3435 = vmatprep.subr.bf16.mxu1 %v5597_v31 }
 0x569   :  { %1293 = vmatpush1.bf16.msra.mxu0 %v4800_v32  ;;  %3436 = vmatpush3.bf16.msra.mxu1 %v4883_v46 }
 0x56a   :  { %1294 = vmatprep.subr.bf16.mxu0 %v4807_v45  ;;  %3437 = vmatprep.subr.bf16.mxu1 %v5597_v31 }
 0x56d   :  { %1295 = vmatpush1.bf16.msra.mxu0 %v4814_v33  ;;  %3438 = vmatpush3.bf16.msra.mxu1 %v4892_v48 }
 0x56e   :  { %1296 = vmatprep.subr.bf16.mxu0 %v4821_v50  ;;  %3439 = vmatprep.subr.bf16.mxu1 %v5597_v31 }
 0x571   :  { %1297 = vmatpush1.bf16.msra.mxu0 %v4900_v54  ;;  %3440 = vmatpush3.bf16.msra.mxu1 %v4421_v56  ;;  %v4921_v56 = vld [vmem:[%s5563_s4 + $0x4] ss:$12 sps:$4 sm:$0xff]  }
 0x572   :  { %1298 = vmatprep.subr.bf16.mxu0 %v4907_v34  ;;  %3441 = vmatprep.subr.bf16.mxu1 %v5597_v31 }
 0x575   :  { %1299 = vmatpush1.bf16.msra.mxu0 %v4914_v51  ;;  %3442 = vmatpush3.bf16.msra.mxu1 %v4429_v57 }
 0x576   :  { %1300 = vmatprep.subr.bf16.mxu0 %v4921_v56  ;;  %3443 = vmatprep.subr.bf16.mxu1 %v5597_v31 }
 0x579   :  { %1301 = vmatpush1.bf16.msra.mxu0 %v4928_v37  ;;  %3444 = vmatpush3.bf16.msra.mxu1 %v4442_v58  ;;  %v5601_v58 = vld [vmem:[#allocation13_spill] sm:$0xff] }
 0x57a   :  { %1391 = vmatprep.subr.bf16.mxu0 %v4726_v25  ;;  %3449 = vmatprep.subr.bf16.mxu1 %v5597_v31 }
 0x61c   :  { %v1215_v57 = vpop.f32.mrf.mxu0  ;;  %v1256_v38 = vpop.f32.mrf.mxu1 }
 0x61d   :  { %v1216_v52 = vadd.f32 %v1215_v57, %v4545_v60  ;;  %v1257_v16 = vadd.f32 %v1256_v38, %v4555_v1 }
 0x61e   :  { %v1217_v42 = vpop.f32.mrf.mxu0  ;;  %v3427_v43 = vpop.f32.mrf.mxu1 }
 0x61f   :  { %v1262_v55 = vadd.f32 %v1216_v52, %v4522_v59  ;;  %v1218_v49 = vadd.f32 %v1217_v42, %v4551_v15  ;;  %v4941_v42 = vpop.permute.xlu1 %117 }
 0x620   :  { %v1219_v7 = vpop.f32.mrf.mxu0  ;;  %v1259_v53 = vpop.f32.mrf.mxu1  ;;  %5603 = vst [vmem:[#allocation13_spill] sm:$0xff] %v4941_v42  ;;  %vm119_vm15 = vcmp.eq.s32.totalorder %v4941_v42, 1  ;;  %v5629_v42 = vld [vmem:[#allocation11_spill] sm:$0xff] }
 0x621   :  { %v3017_v2 = vmul.f32 -1.442695, %v1262_v55  ;;  %v1269_v25 = vadd.f32 %v1218_v49, %v5601_v58 }
 0x622   :  { %v1220_v24 = vpop.f32.mrf.mxu0  ;;  %v3428_v6 = vpop.f32.mrf.mxu1 }
 0x623   :  { %3876 = vpow2.f32 %v3017_v2  ;;  %v3018_v61 = vmul.f32 -1.442695, %v1269_v25 }
 0x625   :  { %3878 = vpow2.f32 %v3018_v61  ;;  %v5606_v61 = vld [vmem:[#allocation12_spill] sm:$0xff] }
 0x630   :  { %v3877_v9 = vpop.eup %3876 }
 0x631   :  { %v1266_v29 = vadd.f32 1.0, %v3877_v9 }
 0x632   :  { %v3879_v8 = vpop.eup %3878 }
 0x633   :  { %3880 = vrcp.f32 %v1266_v29  ;;  %v1273_v18 = vadd.f32 1.0, %v3879_v8 }
 0x635   :  { %3882 = vrcp.f32 %v1273_v18 }
 0x640   :  { %v3881_v59 = vpop.eup %3880 }
 0x641   :  { %v1276_v20 = vmul.f32 %v3881_v59, %v1257_v16  ;;  %v4996_v16 = vpop.permute.xlu0 %123 }
 0x642   :  { %v3883_v44 = vpop.eup %3882  ;;  %5607 = vst [vmem:[#allocation16_spill] sm:$0xff] %v4996_v16  ;;  %vm125_vm0 = vcmp.eq.s32.totalorder %v4996_v16, 1 }
 0x643   :  { %v1277_v39 = vadd.f32 %v1276_v20, %v5602_v12  ;;  %v1279_v19 = vsub.f32 1.0, %v3883_v44  ;;  %v1281_v52 = vmul.f32 %v3883_v44, %v4850_v21 }
 0x645   :  { %3884 = vtanh.f32 %v1277_v39  ;;  %v3754_v39 = vld [vmem:[#allocation3 + $0xa8] ss:$12 sps:$4 sm:$0xff]  }
 0x652   :  { %v3885_v4 = vpop.eup %3884 }
 0x653   :  { %v1280_v57 = vmul.f32 %v3885_v4, %v1279_v19  ;;  %v3760_v4 = vld [vmem:[#allocation3 + $0x94] ss:$12 sps:$4 sm:$0xff]  }
 0x655   :  { %v1282_v43 = vadd.f32 %v1281_v52, %v1280_v57  ;;  %v3761_v57 = vld [vmem:[#allocation3 + $0x98] ss:$12 sps:$4 sm:$0xff]   ;;  %v3103_v52 = vpack.c.bf16 %v4634_v40, %v4562_v23 }
 0x656   :  { %v3762_v23 = vld [vmem:[#allocation3 + $0x78] ss:$12 sps:$4 sm:$0xff]  }
 0x657   :  { %v4947_v38 = vsel %vm119_vm15, %v1282_v43, %v4850_v21  ;;  %v3768_v40 = vld [vmem:[#allocation3 + $0x64] ss:$12 sps:$4 sm:$0xff]  }
 0x658   :  { %v1285_v55 = vpack.c.bf16 %v4947_v38, %v4947_v38 }
 0x65a   :  { %1319 = vmatmul.mubr.bf16.vlgmr.msra.gmra.mxu0 %v1285_v55  ;;  %3446 = vmatmul.mubr.bf16.vlgmr.msra.gmra.mxu1 %v1285_v55  ;;  %v3758_v55 = vld [vmem:[#allocation3 + $0x90] ss:$12 sps:$4 sm:$0xff]  }
 0x65b   :  { %1392 = vmatpush1.bf16.msra.mxu0 %v4750_v13  ;;  %3450 = vmatpush3.bf16.msra.mxu1 %v4756_v0  ;;  %v4007_v13 = vld [vmem:[%s5563_s4 + $0x38] ss:$12 sps:$4 sm:$0xff]   ;;  %v4008_v0 = vld [vmem:[%s5563_s4 + $0x20] ss:$12 sps:$4 sm:$0xff]  }
 0x65c   :  { %1393 = vmatprep.subr.bf16.mxu0 %v4762_v17  ;;  %3451 = vmatprep.subr.bf16.mxu1 %v5597_v31  ;;  %v4009_v17 = vld [vmem:[%s5563_s4 + $0x8] ss:$12 sps:$4 sm:$0xff]  }
 0x65d   :  { %1423 = vmatprep.mubr.bf16.mxu0 %v5598_v47  ;;  %3465 = vmatprep.mubr.msk.bf16.mxu1 %vm4107_vm4, %v5597_v31 }
 0x65f   :  { %1394 = vmatpush1.bf16.msra.mxu0 %v4772_v26  ;;  %3452 = vmatpush3.bf16.msra.mxu1 %v4865_v63  ;;  %v3756_v26 = vld [vmem:[#allocation3 + $0xac] ss:$12 sps:$4 sm:$0xff]  }
 0x660   :  { %1395 = vmatprep.subr.bf16.mxu0 %v4779_v28  ;;  %3453 = vmatprep.subr.bf16.mxu1 %v5597_v31  ;;  %v3757_v28 = vld [vmem:[#allocation3 + $0xb0] ss:$12 sps:$4 sm:$0xff]  }
 0x663   :  { %1396 = vmatpush1.bf16.msra.mxu0 %v4786_v30  ;;  %3454 = vmatpush3.bf16.msra.mxu1 %v4874_v27 }
 0x664   :  { %1397 = vmatprep.subr.bf16.mxu0 %v4793_v41  ;;  %3455 = vmatprep.subr.bf16.mxu1 %v5597_v31 }
 0x667   :  { %1398 = vmatpush1.bf16.msra.mxu0 %v4800_v32  ;;  %3456 = vmatpush3.bf16.msra.mxu1 %v4883_v46 }
 0x668   :  { %1399 = vmatprep.subr.bf16.mxu0 %v4807_v45  ;;  %3457 = vmatprep.subr.bf16.mxu1 %v5597_v31 }
 0x66b   :  { %1400 = vmatpush1.bf16.msra.mxu0 %v4814_v33  ;;  %3458 = vmatpush3.bf16.msra.mxu1 %v4892_v48 }
 0x66c   :  { %1401 = vmatprep.subr.bf16.mxu0 %v4821_v50  ;;  %3459 = vmatprep.subr.bf16.mxu1 %v5597_v31  ;;  %v5604_v50 = vld [vmem:[#allocation15_spill] sm:$0xff] }
 0x66f   :  { %1402 = vmatpush1.bf16.msra.mxu0 %v4900_v54  ;;  %3460 = vmatpush3.bf16.msra.mxu1 %v4007_v13  ;;  %v3764_v13 = vld [vmem:[#allocation3 + $0x7c] ss:$12 sps:$4 sm:$0xff]  }
 0x670   :  { %1403 = vmatprep.subr.bf16.mxu0 %v4907_v34  ;;  %3461 = vmatprep.subr.bf16.mxu1 %v5597_v31 }
 0x673   :  { %1404 = vmatpush1.bf16.msra.mxu0 %v4914_v51  ;;  %3462 = vmatpush3.bf16.msra.mxu1 %v4008_v0  ;;  %v3765_v0 = vld [vmem:[#allocation3 + $0x80] ss:$12 sps:$4 sm:$0xff]  }
 0x674   :  { %1405 = vmatprep.subr.bf16.mxu0 %v4921_v56  ;;  %3463 = vmatprep.subr.bf16.mxu1 %v5597_v31  ;;  %v5605_v56 = vld [vmem:[#allocation17_spill] sm:$0xff] }
 0x677   :  { %1406 = vmatpush1.bf16.msra.mxu0 %v4928_v37  ;;  %3464 = vmatpush3.bf16.msra.mxu1 %v4009_v17  ;;  %v3769_v17 = vld [vmem:[#allocation3 + $0x68] ss:$12 sps:$4 sm:$0xff]  }
 0x678   :  { %1684 = vmatprep.subr.bf16.mxu0 %v3756_v26  ;;  %3469 = vmatprep.subr.bf16.mxu1 %v3757_v28  ;;  %v3766_v26 = vld [vmem:[#allocation3 + $0x60] ss:$12 sps:$4 sm:$0xff]  }
 0x71a   :  { %v1320_v30 = vpop.f32.mrf.mxu0  ;;  %v1361_v41 = vpop.f32.mrf.mxu1 }
 0x71b   :  { %v1321_v32 = vadd.f32 %v1320_v30, %v4545_v60  ;;  %v1362_v6 = vadd.f32 %v1361_v41, %v4555_v1  ;;  %v3773_v30 = vld [vmem:[#allocation3 + $0x50] ss:$12 sps:$4 sm:$0xff]   ;;  %v3770_v41 = vld [vmem:[#allocation3 + $0x48] ss:$12 sps:$4 sm:$0xff]  }
 0x71c   :  { %v1322_v45 = vpop.f32.mrf.mxu0  ;;  %v3447_v33 = vpop.f32.mrf.mxu1 }
 0x71d   :  { %v1367_v63 = vadd.f32 %v1321_v32, %v5604_v50  ;;  %v1323_v54 = vadd.f32 %v1322_v45, %v4551_v15  ;;  %v3776_v32 = vld [vmem:[#allocation3 + $0x34] ss:$12 sps:$4 sm:$0xff]   ;;  %v3777_v45 = vld [vmem:[#allocation3 + $0x38] ss:$12 sps:$4 sm:$0xff]   ;;  %v3774_v33 = vld [vmem:[#allocation3 + $0x30] ss:$12 sps:$4 sm:$0xff]  }
 0x71e   :  { %v1324_v27 = vpop.f32.mrf.mxu0  ;;  %v1364_v46 = vpop.f32.mrf.mxu1  ;;  %v3780_v50 = vld [vmem:[#allocation3 + $0x1c] ss:$12 sps:$4 sm:$0xff]  }
 0x71f   :  { %v3019_v48 = vmul.f32 -1.442695, %v1367_v63  ;;  %v1374_v37 = vadd.f32 %v1323_v54, %v5605_v56  ;;  %v3781_v63 = vld [vmem:[#allocation3 + $0x20] ss:$12 sps:$4 sm:$0xff]   ;;  %v3778_v27 = vld [vmem:[#allocation3 + $0x18] ss:$12 sps:$4 sm:$0xff]  }
 0x720   :  { %v1325_v34 = vpop.f32.mrf.mxu0  ;;  %v3448_v51 = vpop.f32.mrf.mxu1  ;;  %v3784_v46 = vld [vmem:[#allocation3 + $0x4] ss:$12 sps:$4 sm:$0xff]   ;;  %v3782_v54 = vld [vmem:[#allocation3] ss:$12 sps:$4 sm:$0xff]  }
 0x721   :  { %3886 = vpow2.f32 %v3019_v48  ;;  %v3020_v7 = vmul.f32 -1.442695, %v1374_v37  ;;  %v3785_v48 = vld [vmem:[#allocation3 + $0x8] ss:$12 sps:$4 sm:$0xff]   ;;  %v1504_v34 = vpack.c.bf16 %v4743_v14, %v4686_v35  ;;  %v1505_v51 = vpack.c.bf16 %v4947_v38, %v4850_v21  ;;  %v5028_v56 = vld [vmem:[#allocation5 + $0xac] ss:$12 sps:$4 sm:$0xff]  }
 0x722   :  { %v5030_v35 = vld [vmem:[#allocation5 + $0xa8] ss:$12 sps:$4 sm:$0xff]   ;;  %v5036_v21 = vld [vmem:[#allocation5 + $0x90] ss:$12 sps:$4 sm:$0xff]   ;;  %v5042_v37 = vld [vmem:[#allocation5 + $0x78] ss:$12 sps:$4 sm:$0xff]  }
 0x723   :  { %3888 = vpow2.f32 %v3020_v7  ;;  %v5034_v14 = vld [vmem:[#allocation5 + $0x94] ss:$12 sps:$4 sm:$0xff]   ;;  %v5046_v7 = vld [vmem:[#allocation5 + $0x64] ss:$12 sps:$4 sm:$0xff]  }
 0x72e   :  { %v3887_v53 = vpop.eup %3886 }
 0x72f   :  { %v1371_v2 = vadd.f32 1.0, %v3887_v53  ;;  %v5048_v53 = vld [vmem:[#allocation5 + $0x60] ss:$12 sps:$4 sm:$0xff]  }
 0x730   :  { %v3889_v49 = vpop.eup %3888 }
 0x731   :  { %3890 = vrcp.f32 %v1371_v2  ;;  %v1378_v24 = vadd.f32 1.0, %v3889_v49  ;;  %v5052_v2 = vld [vmem:[#allocation5 + $0x4c] ss:$12 sps:$4 sm:$0xff]   ;;  %v5054_v49 = vld [vmem:[#allocation5 + $0x48] ss:$12 sps:$4 sm:$0xff]  }
 0x733   :  { %3892 = vrcp.f32 %v1378_v24  ;;  %v5057_v24 = vld [vmem:[#allocation5 + $0x34] ss:$12 sps:$4 sm:$0xff]  }
 0x73e   :  { %v3891_v58 = vpop.eup %3890 }
 0x73f   :  { %v1381_v25 = vmul.f32 %v3891_v58, %v1362_v6  ;;  %v5060_v6 = vld [vmem:[#allocation5 + $0x30] ss:$12 sps:$4 sm:$0xff]  }
 0x740   :  { %v3893_v29 = vpop.eup %3892  ;;  %v5064_v58 = vld [vmem:[#allocation5 + $0x1c] ss:$12 sps:$4 sm:$0xff]  }
 0x741   :  { %v1382_v9 = vadd.f32 %v1381_v25, %v5606_v61  ;;  %v1384_v8 = vsub.f32 1.0, %v3893_v29  ;;  %v1386_v20 = vmul.f32 %v3893_v29, %v4947_v38  ;;  %v5066_v25 = vld [vmem:[#allocation5 + $0x18] ss:$12 sps:$4 sm:$0xff]   ;;  %v5074_v29 = vld [vmem:[#allocation5] ss:$12 sps:$4 sm:$0xff]  }
 0x742   :  { %v5068_v61 = vld [vmem:[#allocation5 + $0x4] ss:$12 sps:$4 sm:$0xff]  }
 0x743   :  { %3894 = vtanh.f32 %v1382_v9  ;;  %v5071_v9 = vld [vmem:[#allocation5 + $0xb0] ss:$12 sps:$4 sm:$0xff]  }
 0x750   :  { %v3895_v18 = vpop.eup %3894 }
 0x751   :  { %v1385_v59 = vmul.f32 %v3895_v18, %v1384_v8  ;;  %v5081_v8 = vld [vmem:[#allocation5 + $0x98] ss:$12 sps:$4 sm:$0xff]   ;;  %v5084_v18 = vld [vmem:[#allocation5 + $0x80] ss:$12 sps:$4 sm:$0xff]  }
 0x753   :  { %v1387_v12 = vadd.f32 %v1386_v20, %v1385_v59  ;;  %v5088_v59 = vld [vmem:[#allocation5 + $0x68] ss:$12 sps:$4 sm:$0xff]   ;;  %v5092_v20 = vld [vmem:[#allocation5 + $0x50] ss:$12 sps:$4 sm:$0xff]  }
 0x755   :  { %v5003_v44 = vsel %vm125_vm0, %v1387_v12, %v4947_v38  ;;  %v5040_v38 = vld [vmem:[#allocation5 + $0x7c] ss:$12 sps:$4 sm:$0xff]   ;;  %v5096_v12 = vld [vmem:[#allocation5 + $0x38] ss:$12 sps:$4 sm:$0xff]  }
 0x756   :  { %v1390_v19 = vpack.c.bf16 %v5003_v44, %v5003_v44 }
 0x758   :  { %1424 = vmatmul.mubr.bf16.vlgmr.msra.gmra.mxu0 %v1390_v19  ;;  %3466 = vmatmul.mubr.bf16.vlgmr.msra.gmra.mxu1 %v1390_v19  ;;  %v5104_v19 = vld [vmem:[#allocation5 + $0x8] ss:$12 sps:$4 sm:$0xff]  }
 0x759   :  { %1685 = vmatpush1.bf16.msra.mxu0 %v3754_v39  ;;  %3470 = vmatpush3.bf16.msra.mxu1 %v3757_v28  ;;  %v3772_v28 = vld [vmem:[#allocation3 + $0x4c] ss:$12 sps:$4 sm:$0xff]  }
 0x75a   :  { %3485 = vmatprep.mubr.msk.bf16.mxu1 %vm5011_vm2, %v3103_v52  ;;  %1686 = vmatprep.subr.bf16.mxu0 %v3760_v4  ;;  %v5100_v39 = vld [vmem:[#allocation5 + $0x20] ss:$12 sps:$4 sm:$0xff]  }
 0x75b   :  { %3471 = vmatprep.subr.bf16.mxu1 %v3761_v57  ;;  %1716 = vmatprep.mubr.bf16.mxu0 %v5598_v47 }
 0x75d   :  { %1687 = vmatpush1.bf16.msra.mxu0 %v3758_v55  ;;  %3472 = vmatpush3.bf16.msra.mxu1 %v3761_v57 }
 0x75e   :  { %1688 = vmatprep.subr.bf16.mxu0 %v3764_v13  ;;  %3473 = vmatprep.subr.bf16.mxu1 %v3765_v0  ;;  %v5610_v13 = vld [vmem:[#allocation18_spill] sm:$0xff] }
 0x761   :  { %1689 = vmatpush1.bf16.msra.mxu0 %v3762_v23  ;;  %3474 = vmatpush3.bf16.msra.mxu1 %v3765_v0 }
 0x762   :  { %1690 = vmatprep.subr.bf16.mxu0 %v3768_v40  ;;  %3475 = vmatprep.subr.bf16.mxu1 %v3769_v17 }
 0x765   :  { %1691 = vmatpush1.bf16.msra.mxu0 %v3766_v26  ;;  %3476 = vmatpush3.bf16.msra.mxu1 %v3769_v17 }
 0x766   :  { %1692 = vmatprep.subr.bf16.mxu0 %v3772_v28  ;;  %3477 = vmatprep.subr.bf16.mxu1 %v3773_v30 }
 0x769   :  { %1693 = vmatpush1.bf16.msra.mxu0 %v3770_v41  ;;  %3478 = vmatpush3.bf16.msra.mxu1 %v3773_v30  ;;  %v5611_v41 = vld [vmem:[#allocation19_spill] sm:$0xff] }
 0x76a   :  { %1694 = vmatprep.subr.bf16.mxu0 %v3776_v32  ;;  %3479 = vmatprep.subr.bf16.mxu1 %v3777_v45 }
 0x76d   :  { %1695 = vmatpush1.bf16.msra.mxu0 %v3774_v33  ;;  %3480 = vmatpush3.bf16.msra.mxu1 %v3777_v45 }
 0x76e   :  { %1696 = vmatprep.subr.bf16.mxu0 %v3780_v50  ;;  %3481 = vmatprep.subr.bf16.mxu1 %v3781_v63 }
 0x771   :  { %1697 = vmatpush1.bf16.msra.mxu0 %v3778_v27  ;;  %3482 = vmatpush3.bf16.msra.mxu1 %v3781_v63 }
 0x772   :  { %1698 = vmatprep.subr.bf16.mxu0 %v3784_v46  ;;  %3483 = vmatprep.subr.bf16.mxu1 %v3785_v48 }
 0x775   :  { %1699 = vmatpush1.bf16.msra.mxu0 %v3782_v54  ;;  %3484 = vmatpush3.bf16.msra.mxu1 %v3785_v48  ;;  %v5612_v54 = vld [vmem:[#allocation14_spill] sm:$0xff] }
 0x776   :  { %3493 = vmatprep.subr.bf16.mxu1 %v5597_v31  ;;  %1999 = vmatprep.subr.bf16.mxu0 %v5028_v56 }
 0x778   :  { %3104 = vmatmul.mubr.msk.bf16.vlgmr.msra.gmra.mxu0 %vm5011_vm2, %v3103_v52  ;;  %3486 = vmatmul.mubr.bf16.vlgmr.msra.gmra.mxu1 %v1504_v34 }
 0x779   :  { %3489 = vmatprep.mubr.bf16.mxu1 %v1505_v51  ;;  %1726 = vmatprep.mubr.bf16.mxu0 %v5598_v47 }
 0x77a   :  { %2000 = vmatpush1.bf16.msra.mxu0 %v5030_v35  ;;  %3494 = vmatpush3.bf16.msra.mxu1 %v5071_v9 }
 0x77b   :  { %2001 = vmatprep.subr.bf16.mxu0 %v5034_v14  ;;  %3495 = vmatprep.subr.bf16.mxu1 %v5597_v31 }
 0x77e   :  { %2002 = vmatpush1.bf16.msra.mxu0 %v5036_v21  ;;  %3496 = vmatpush3.bf16.msra.mxu1 %v5081_v8 }
 0x77f   :  { %2003 = vmatprep.subr.bf16.mxu0 %v5040_v38  ;;  %3497 = vmatprep.subr.bf16.mxu1 %v5597_v31 }
 0x780   :  { %1727 = vmatmul.mubr.bf16.gmra.mxu0 %v1504_v34 }
 0x781   :  { %1736 = vmatprep.mubr.bf16.mxu0 %v5598_v47 }
 0x782   :  { %2004 = vmatpush1.bf16.msra.mxu0 %v5042_v37  ;;  %3498 = vmatpush3.bf16.msra.mxu1 %v5084_v18 }
 0x783   :  { %2005 = vmatprep.subr.bf16.mxu0 %v5046_v7  ;;  %3499 = vmatprep.subr.bf16.mxu1 %v5597_v31 }
 0x786   :  { %2006 = vmatpush1.bf16.msra.mxu0 %v5048_v53  ;;  %3500 = vmatpush3.bf16.msra.mxu1 %v5088_v59 }
 0x787   :  { %2007 = vmatprep.subr.bf16.mxu0 %v5052_v2  ;;  %3501 = vmatprep.subr.bf16.mxu1 %v5597_v31 }
 0x788   :  { %1737 = vmatmul.mubr.bf16.gmra.mxu0 %v1505_v51 }
 0x789   :  { %1746 = vmatprep.mubr.bf16.mxu0 %v5598_v47 }
 0x78a   :  { %2008 = vmatpush1.bf16.msra.mxu0 %v5054_v49  ;;  %3502 = vmatpush3.bf16.msra.mxu1 %v5092_v20 }
 0x78b   :  { %2009 = vmatprep.subr.bf16.mxu0 %v5057_v24  ;;  %3503 = vmatprep.subr.bf16.mxu1 %v5597_v31 }
 0x78e   :  { %2010 = vmatpush1.bf16.msra.mxu0 %v5060_v6  ;;  %3504 = vmatpush3.bf16.msra.mxu1 %v5096_v12 }
 0x78f   :  { %2011 = vmatprep.subr.bf16.mxu0 %v5064_v58  ;;  %3505 = vmatprep.subr.bf16.mxu1 %v5597_v31 }
 0x792   :  { %2012 = vmatpush1.bf16.msra.mxu0 %v5066_v25  ;;  %3506 = vmatpush3.bf16.msra.mxu1 %v5100_v39 }
 0x793   :  { %2013 = vmatprep.subr.bf16.mxu0 %v5068_v61  ;;  %3507 = vmatprep.subr.bf16.mxu1 %v5597_v31 }
 0x796   :  { %2014 = vmatpush1.bf16.msra.mxu0 %v5074_v29  ;;  %3508 = vmatpush3.bf16.msra.mxu1 %v5104_v19 }
 0x797   :  { %2103 = vmatprep.subr.bf16.mxu0 %v5028_v56  ;;  %3513 = vmatprep.subr.bf16.mxu1 %v5597_v31 }
 0x818   :  { %v1425_v4 = vpop.f32.mrf.mxu0  ;;  %v1466_v57 = vpop.f32.mrf.mxu1 }
 0x819   :  { %v1426_v52 = vadd.f32 %v1425_v4, %v4545_v60  ;;  %v1467_v27 = vadd.f32 %v1466_v57, %v4555_v1 }
 0x81a   :  { %v1427_v43 = vpop.f32.mrf.mxu0  ;;  %v3467_v55 = vpop.f32.mrf.mxu1 }
 0x81b   :  { %v1472_v0 = vadd.f32 %v1426_v52, %v5610_v13  ;;  %v1428_v26 = vadd.f32 %v1427_v43, %v4551_v15  ;;  %v5115_v52 = vpop.permute.xlu1 %129 }
 0x81c   :  { %v1429_v23 = vpop.f32.mrf.mxu0  ;;  %v1469_v40 = vpop.f32.mrf.mxu1  ;;  %5613 = vst [vmem:[#allocation15_spill] sm:$0xff] %v5115_v52  ;;  %vm131_vm3 = vcmp.eq.s32.totalorder %v5115_v52, 1 }
 0x81d   :  { %v3021_v17 = vmul.f32 -1.442695, %v1472_v0  ;;  %v1479_v32 = vadd.f32 %v1428_v26, %v5611_v41 }
 0x81e   :  { %v1430_v28 = vpop.f32.mrf.mxu0  ;;  %v3468_v30 = vpop.f32.mrf.mxu1 }
 0x81f   :  { %3896 = vpow2.f32 %v3021_v17  ;;  %v3022_v45 = vmul.f32 -1.442695, %v1479_v32 }
 0x821   :  { %3898 = vpow2.f32 %v3022_v45 }
 0x82c   :  { %v3897_v33 = vpop.eup %3896 }
 0x82d   :  { %v1476_v50 = vadd.f32 1.0, %v3897_v33 }
 0x82e   :  { %v3899_v60 = vpop.eup %3898 }
 0x82f   :  { %3900 = vrcp.f32 %v1476_v50  ;;  %v1483_v63 = vadd.f32 1.0, %v3899_v60 }
 0x831   :  { %3902 = vrcp.f32 %v1483_v63 }
 0x838   :  { %v5175_v41 = vpop.f32.mrf.mxu1 }
 0x83a   :  { %v1791_v45 = vpop.f32.mrf.mxu1 }
 0x83c   :  { %v3901_v46 = vpop.eup %3900  ;;  %v5181_v50 = vpop.f32.mrf.mxu1 }
 0x83d   :  { %v1486_v48 = vmul.f32 %v3901_v46, %v1467_v27  ;;  %5617 = vst [vmem:[#allocation19_spill] sm:$0xff] %v5181_v50 }
 0x83e   :  { %v3903_v15 = vpop.eup %3902  ;;  %v5185_v63 = vpop.f32.mrf.mxu1 }
 0x83f   :  { %v1487_v34 = vadd.f32 %v1486_v48, %v5612_v54  ;;  %v1489_v51 = vsub.f32 1.0, %v3903_v15  ;;  %v1491_v55 = vmul.f32 %v3903_v15, %v5003_v44  ;;  %v1539_v54 = vld [vmem:[%s5566_s7] sm:$0x7] }
 0x841   :  { %3904 = vtanh.f32 %v1487_v34 }
 0x84e   :  { %v3905_v4 = vpop.eup %3904 }
 0x84f   :  { %v1490_v43 = vmul.f32 %v3905_v4, %v1489_v51  ;;  %v1854_v51 = vld [vmem:[%s5568_s9] sm:$0x7] }
 0x851   :  { %v1492_v13 = vadd.f32 %v1491_v55, %v1490_v43  ;;  %v5626_v55 = vld [vmem:[#allocation10_spill] sm:$0xff] }
 0x853   :  { %v1493_v1 = vsel %vm131_vm3, %v1492_v13, %v5003_v44  ;;  %v5208_v13 = vrot.slane %v1539_v54, %v5626_v55 }
 0x854   :  { %v1506_v57 = vpack.c.bf16 %v1493_v1, %v5003_v44  ;;  %v1718_v44 = vpop.f32.mrf.mxu0  ;;  %v5211_v1 = vrot.slane %v1854_v51, %v5626_v55 }
 0x856   :  { %1747 = vmatmul.mubr.bf16.gmra.mxu0 %v1506_v57  ;;  %3490 = vmatmul.mubr.bf16.gmra.mxu1 %v1506_v57  ;;  %v1720_v0 = vpop.f32.mrf.mxu0 }
 0x857   :  { %2031 = vmatprep.mubr.bf16.mxu0 %v5598_v47  ;;  %3509 = vmatprep.mubr.msk.bf16.mxu1 %vm4107_vm4, %v5597_v31 }
 0x858   :  { %v5163_v23 = vpop.f32.mrf.mxu0 }
 0x85a   :  { %v5165_v40 = vpop.f32.mrf.mxu0 }
 0x85c   :  { %v5167_v17 = vpop.f32.mrf.mxu0 }
 0x85e   :  { %2032 = vmatmul.mubr.bf16.vlgmr.msra.gmra.mxu0 %v5598_v47  ;;  %3510 = vmatmul.mubr.bf16.vlgmr.msra.gmra.mxu1 %v5598_v47  ;;  %v5169_v26 = vpop.f32.mrf.mxu0 }
 0x85f   :  { %2104 = vmatpush1.bf16.msra.mxu0 %v5030_v35  ;;  %3514 = vmatpush3.bf16.msra.mxu1 %v5071_v9 }
 0x860   :  { %2105 = vmatprep.subr.bf16.mxu0 %v5034_v14  ;;  %3515 = vmatprep.subr.bf16.mxu1 %v5597_v31  ;;  %v5171_v28 = vpop.f32.mrf.mxu0 }
 0x861   :  { %2135 = vmatprep.mubr.bf16.mxu0 %v5598_v47  ;;  %3529 = vmatprep.mubr.msk.bf16.mxu1 %vm4107_vm4, %v5597_v31 }
 0x862   :  { %v5173_v30 = vpop.f32.mrf.mxu0 }
 0x863   :  { %2106 = vmatpush1.bf16.msra.mxu0 %v5036_v21  ;;  %3516 = vmatpush3.bf16.msra.mxu1 %v5081_v8  ;;  %5614 = vst [vmem:[#allocation17_spill] sm:$0xff] %v5173_v30 }
 0x864   :  { %2107 = vmatprep.subr.bf16.mxu0 %v5040_v38  ;;  %3517 = vmatprep.subr.bf16.mxu1 %v5597_v31  ;;  %v5177_v32 = vpop.f32.mrf.mxu0 }
 0x865   :  { %5615 = vst [vmem:[#allocation12_spill] sm:$0xff] %v5177_v32 }
 0x866   :  { %v5179_v33 = vpop.f32.mrf.mxu0 }
 0x867   :  { %2108 = vmatpush1.bf16.msra.mxu0 %v5042_v37  ;;  %3518 = vmatpush3.bf16.msra.mxu1 %v5084_v18  ;;  %5616 = vst [vmem:[#allocation18_spill] sm:$0xff] %v5179_v33 }
 0x868   :  { %2109 = vmatprep.subr.bf16.mxu0 %v5046_v7  ;;  %3519 = vmatprep.subr.bf16.mxu1 %v5597_v31  ;;  %v5183_v60 = vpop.f32.mrf.mxu0 }
 0x869   :  { %5618 = vst [vmem:[#allocation14_spill] sm:$0xff] %v5183_v60  ;;  %v5223_v60 = vrot.slane %v1539_v54, %v5629_v42 }
 0x86a   :  { %v5187_v27 = vpop.f32.mrf.mxu0 }
 0x86b   :  { %2110 = vmatpush1.bf16.msra.mxu0 %v5048_v53  ;;  %3520 = vmatpush3.bf16.msra.mxu1 %v5088_v59  ;;  %5619 = vst [vmem:[#allocation22_spill] sm:$0xff] %v5187_v27 }
 0x86c   :  { %2111 = vmatprep.subr.bf16.mxu0 %v5052_v2  ;;  %3521 = vmatprep.subr.bf16.mxu1 %v5597_v31 }
 0x86f   :  { %2112 = vmatpush1.bf16.msra.mxu0 %v5054_v49  ;;  %3522 = vmatpush3.bf16.msra.mxu1 %v5092_v20 }
 0x870   :  { %2113 = vmatprep.subr.bf16.mxu0 %v5057_v24  ;;  %3523 = vmatprep.subr.bf16.mxu1 %v5597_v31 }
 0x873   :  { %2114 = vmatpush1.bf16.msra.mxu0 %v5060_v6  ;;  %3524 = vmatpush3.bf16.msra.mxu1 %v5096_v12 }
 0x874   :  { %2115 = vmatprep.subr.bf16.mxu0 %v5064_v58  ;;  %3525 = vmatprep.subr.bf16.mxu1 %v5597_v31 }
 0x877   :  { %2116 = vmatpush1.bf16.msra.mxu0 %v5066_v25  ;;  %3526 = vmatpush3.bf16.msra.mxu1 %v5100_v39 }
 0x878   :  { %2117 = vmatprep.subr.bf16.mxu0 %v5068_v61  ;;  %3527 = vmatprep.subr.bf16.mxu1 %v5597_v31 }
 0x87b   :  { %2118 = vmatpush1.bf16.msra.mxu0 %v5074_v29  ;;  %3528 = vmatpush3.bf16.msra.mxu1 %v5104_v19 }
 0x87c   :  { %2207 = vmatprep.subr.bf16.mxu0 %v5028_v56  ;;  %3533 = vmatprep.subr.bf16.mxu1 %v5597_v31 }
 0x916   :  { %v5189_v46 = vpop.f32.mrf.mxu0  ;;  %v5191_v48 = vpop.f32.mrf.mxu1 }
 0x917   :  { %5620 = vst [vmem:[#allocation23_spill] sm:$0xff] %v5189_v46  ;;  %5621 = vst [vmem:[#allocation24_spill] sm:$0xff] %v5191_v48 }
 0x918   :  { %v5196_v34 = vpop.f32.mrf.mxu0  ;;  %v5198_v15 = vpop.f32.mrf.mxu1 }
 0x919   :  { %5622 = vst [vmem:[#allocation25_spill] sm:$0xff] %v5196_v34  ;;  %5623 = vst [vmem:[#allocation26_spill] sm:$0xff] %v5198_v15  ;;  %v1719_v34 = vadd.f32 %v1718_v44, %v5208_v13  ;;  %v1721_v44 = vadd.f32 %v1720_v0, %v5223_v60 }
 0x91a   :  { %v5203_v4 = vpop.f32.mrf.mxu0  ;;  %v5205_v43 = vpop.f32.mrf.mxu1 }
 0x91b   :  { %5624 = vst [vmem:[#allocation27_spill] sm:$0xff] %v5203_v4  ;;  %5625 = vst [vmem:[#allocation28_spill] sm:$0xff] %v5205_v43  ;;  %v5220_v4 = vrot.slane %v1854_v51, %v5629_v42  ;;  %v5228_v42 = vrot.slane %v1854_v51, %v4488_v5 }
 0x91c   :  { %v5213_v57 = vpop.f32.mrf.mxu0  ;;  %v5215_v52 = vpop.f32.mrf.mxu1 }
 0x91d   :  { %5627 = vst [vmem:[#allocation10_spill] sm:$0xff] %v5213_v57  ;;  %5628 = vst [vmem:[#allocation29_spill] sm:$0xff] %v5215_v52 }
 0x91e   :  { %v2033_v16 = vpop.f32.mrf.mxu0  ;;  %v2074_v48 = vpop.f32.mrf.mxu1 }
 0x91f   :  { %v2034_v46 = vadd.f32 %v2033_v16, %v5211_v1 }
 0x920   :  { %v2035_v43 = vpop.f32.mrf.mxu0  ;;  %v3511_v27 = vpop.f32.mrf.mxu1 }
 0x921   :  { %v2080_v55 = vadd.f32 %v2034_v46, %v1719_v34  ;;  %v2036_v52 = vadd.f32 %v2035_v43, %v5220_v4  ;;  %v2075_v46 = vadd.f32 %v2074_v48, %v5228_v42  ;;  %v5232_v34 = vrot.slane %v1539_v54, %v4488_v5 }
 0x922   :  { %v2037_v22 = vpop.f32.mrf.mxu0  ;;  %v2077_v15 = vpop.f32.mrf.mxu1 }
 0x923   :  { %v3071_v57 = vmul.f32 -1.442695, %v2080_v55  ;;  %v2087_v16 = vadd.f32 %v2036_v52, %v1721_v44  ;;  %v1792_v0 = vadd.f32 %v1791_v45, %v5232_v34  ;;  %v1723_v45 = vadd.f32 %v5163_v23, %v5208_v13 }
 0x924   :  { %v2038_v33 = vpop.f32.mrf.mxu0  ;;  %v3512_v32 = vpop.f32.mrf.mxu1  ;;  %v1725_v44 = vadd.f32 %v5165_v40, %v5223_v60 }
 0x925   :  { %3906 = vpow2.f32 %v3071_v57  ;;  %v3072_v62 = vmul.f32 -1.442695, %v2087_v16 }
 0x927   :  { %3908 = vpow2.f32 %v3072_v62 }
 0x932   :  { %v3907_v50 = vpop.eup %3906 }
 0x933   :  { %v2084_v30 = vadd.f32 1.0, %v3907_v50 }
 0x934   :  { %v3909_v27 = vpop.eup %3908 }
 0x935   :  { %3910 = vrcp.f32 %v2084_v30  ;;  %v2091_v22 = vadd.f32 1.0, %v3909_v27 }
 0x937   :  { %3912 = vrcp.f32 %v2091_v22 }
 0x942   :  { %v3911_v32 = vpop.eup %3910 }
 0x943   :  { %v2094_v52 = vmul.f32 %v3911_v32, %v2075_v46 }
 0x944   :  { %v3913_v62 = vpop.eup %3912 }
 0x945   :  { %v2095_v33 = vadd.f32 %v2094_v52, %v1792_v0  ;;  %v2097_v50 = vsub.f32 1.0, %v3913_v62  ;;  %v2099_v51 = vmul.f32 0.0, %v3913_v62 }
 0x947   :  { %3914 = vtanh.f32 %v2095_v33 }
 0x954   :  { %v3915_v30 = vpop.eup %3914 }
 0x955   :  { %v2098_v15 = vmul.f32 %v3915_v30, %v2097_v50 }
 0x957   :  { %v5235_v43 = vadd.f32 %v2099_v51, %v2098_v15 }
 0x959   :  { %v3074_v48 = vpack.c.bf16 %v5235_v43, %v5235_v43 }
 0x95b   :  { %3075 = vmatmul.mubr.msk.bf16.vlgmr.msra.gmra.mxu0 %vm4567_vm6, %v3074_v48  ;;  %3530 = vmatmul.mubr.msk.bf16.vlgmr.msra.gmra.mxu1 %vm4567_vm6, %v3074_v48  ;;  %v1795_v48 = vadd.f32 %v5185_v63, %v5232_v34 }
 0x95c   :  { %2208 = vmatpush1.bf16.msra.mxu0 %v5030_v35  ;;  %3534 = vmatpush3.bf16.msra.mxu1 %v5071_v9 }
 0x95d   :  { %2209 = vmatprep.subr.bf16.mxu0 %v5034_v14  ;;  %3535 = vmatprep.subr.bf16.mxu1 %v5597_v31 }
 0x95e   :  { %2239 = vmatprep.mubr.bf16.mxu0 %v5598_v47  ;;  %3549 = vmatprep.mubr.msk.bf16.mxu1 %vm4107_vm4, %v5597_v31 }
 0x960   :  { %2210 = vmatpush1.bf16.msra.mxu0 %v5036_v21  ;;  %3536 = vmatpush3.bf16.msra.mxu1 %v5081_v8 }
 0x961   :  { %2211 = vmatprep.subr.bf16.mxu0 %v5040_v38  ;;  %3537 = vmatprep.subr.bf16.mxu1 %v5597_v31 }
 0x964   :  { %2212 = vmatpush1.bf16.msra.mxu0 %v5042_v37  ;;  %3538 = vmatpush3.bf16.msra.mxu1 %v5084_v18 }
 0x965   :  { %2213 = vmatprep.subr.bf16.mxu0 %v5046_v7  ;;  %3539 = vmatprep.subr.bf16.mxu1 %v5597_v31 }
 0x968   :  { %2214 = vmatpush1.bf16.msra.mxu0 %v5048_v53  ;;  %3540 = vmatpush3.bf16.msra.mxu1 %v5088_v59 }
 0x969   :  { %2215 = vmatprep.subr.bf16.mxu0 %v5052_v2  ;;  %3541 = vmatprep.subr.bf16.mxu1 %v5597_v31 }
 0x96c   :  { %2216 = vmatpush1.bf16.msra.mxu0 %v5054_v49  ;;  %3542 = vmatpush3.bf16.msra.mxu1 %v5092_v20 }
 0x96d   :  { %2217 = vmatprep.subr.bf16.mxu0 %v5057_v24  ;;  %3543 = vmatprep.subr.bf16.mxu1 %v5597_v31 }
 0x970   :  { %2218 = vmatpush1.bf16.msra.mxu0 %v5060_v6  ;;  %3544 = vmatpush3.bf16.msra.mxu1 %v5096_v12 }
 0x971   :  { %2219 = vmatprep.subr.bf16.mxu0 %v5064_v58  ;;  %3545 = vmatprep.subr.bf16.mxu1 %v5597_v31 }
 0x974   :  { %2220 = vmatpush1.bf16.msra.mxu0 %v5066_v25  ;;  %3546 = vmatpush3.bf16.msra.mxu1 %v5100_v39 }
 0x975   :  { %2221 = vmatprep.subr.bf16.mxu0 %v5068_v61  ;;  %3547 = vmatprep.subr.bf16.mxu1 %v5597_v31 }
 0x978   :  { %2222 = vmatpush1.bf16.msra.mxu0 %v5074_v29  ;;  %3548 = vmatpush3.bf16.msra.mxu1 %v5104_v19 }
 0x979   :  { %2311 = vmatprep.subr.bf16.mxu0 %v5028_v56  ;;  %3553 = vmatprep.subr.bf16.mxu1 %v5597_v31 }
 0xa1b   :  { %v2137_v5 = vpop.f32.mrf.mxu0  ;;  %v2178_v11 = vpop.f32.mrf.mxu1 }
 0xa1c   :  { %v2138_v54 = vadd.f32 %v2137_v5, %v5211_v1  ;;  %v2179_v40 = vadd.f32 %v2178_v11, %v5228_v42 }
 0xa1d   :  { %v2139_v57 = vpop.f32.mrf.mxu0  ;;  %v3531_v55 = vpop.f32.mrf.mxu1 }
 0xa1e   :  { %v2184_v16 = vadd.f32 %v2138_v54, %v1723_v45  ;;  %v2140_v27 = vadd.f32 %v2139_v57, %v5220_v4  ;;  %v2101_v54 = vsel %vm89_vm5, %v5235_v43, 0.0  ;;  %v1729_v43 = vadd.f32 %v5167_v17, %v5208_v13 }
 0xa1f   :  { %v2141_v22 = vpop.f32.mrf.mxu0  ;;  %v2181_v46 = vpop.f32.mrf.mxu1 }
 0xa20   :  { %v3079_v32 = vmul.f32 -1.442695, %v2184_v16  ;;  %v2191_v0 = vadd.f32 %v2140_v27, %v1725_v44 }
 0xa21   :  { %v2142_v52 = vpop.f32.mrf.mxu0  ;;  %v3532_v33 = vpop.f32.mrf.mxu1 }
 0xa22   :  { %3916 = vpow2.f32 %v3079_v32  ;;  %v3080_v62 = vmul.f32 -1.442695, %v2191_v0 }
 0xa24   :  { %3918 = vpow2.f32 %v3080_v62 }
 0xa2f   :  { %v3917_v23 = vpop.eup %3916 }
 0xa30   :  { %v2188_v50 = vadd.f32 1.0, %v3917_v23 }
 0xa31   :  { %v3919_v30 = vpop.eup %3918 }
 0xa32   :  { %3920 = vrcp.f32 %v2188_v50  ;;  %v2195_v15 = vadd.f32 1.0, %v3919_v30 }
 0xa34   :  { %3922 = vrcp.f32 %v2195_v15 }
 0xa3f   :  { %v3921_v51 = vpop.eup %3920 }
 0xa40   :  { %v2198_v5 = vmul.f32 %v3921_v51, %v2179_v40  ;;  %v1731_v40 = vadd.f32 %v5169_v26, %v5223_v60 }
 0xa41   :  { %v3923_v45 = vpop.eup %3922 }
 0xa42   :  { %v2199_v57 = vadd.f32 %v2198_v5, %v1795_v48  ;;  %v2203_v55 = vmul.f32 %v3923_v45, %v2101_v54  ;;  %v2201_v44 = vsub.f32 1.0, %v3923_v45 }
 0xa44   :  { %3924 = vtanh.f32 %v2199_v57 }
 0xa51   :  { %v3925_v16 = vpop.eup %3924 }
 0xa52   :  { %v2202_v27 = vmul.f32 %v3925_v16, %v2201_v44  ;;  %v1800_v44 = vadd.f32 %v5175_v41, %v5232_v34 }
 0xa54   :  { %v2204_v22 = vadd.f32 %v2203_v55, %v2202_v27 }
 0xa56   :  { %v5292_v11 = vsel %vm95_vm11, %v2204_v22, %v2101_v54 }
 0xa57   :  { %v2206_v63 = vpack.c.bf16 %v5292_v11, %v5292_v11 }
 0xa59   :  { %2240 = vmatmul.mubr.bf16.vlgmr.msra.gmra.mxu0 %v2206_v63  ;;  %3550 = vmatmul.mubr.bf16.vlgmr.msra.gmra.mxu1 %v2206_v63 }
 0xa5a   :  { %2312 = vmatpush1.bf16.msra.mxu0 %v5030_v35  ;;  %3554 = vmatpush3.bf16.msra.mxu1 %v5071_v9 }
 0xa5b   :  { %2313 = vmatprep.subr.bf16.mxu0 %v5034_v14  ;;  %3555 = vmatprep.subr.bf16.mxu1 %v5597_v31 }
 0xa5c   :  { %2343 = vmatprep.mubr.bf16.mxu0 %v5598_v47  ;;  %3569 = vmatprep.mubr.msk.bf16.mxu1 %vm4107_vm4, %v5597_v31 }
 0xa5e   :  { %2314 = vmatpush1.bf16.msra.mxu0 %v5036_v21  ;;  %3556 = vmatpush3.bf16.msra.mxu1 %v5081_v8 }
 0xa5f   :  { %2315 = vmatprep.subr.bf16.mxu0 %v5040_v38  ;;  %3557 = vmatprep.subr.bf16.mxu1 %v5597_v31 }
 0xa62   :  { %2316 = vmatpush1.bf16.msra.mxu0 %v5042_v37  ;;  %3558 = vmatpush3.bf16.msra.mxu1 %v5084_v18 }
 0xa63   :  { %2317 = vmatprep.subr.bf16.mxu0 %v5046_v7  ;;  %3559 = vmatprep.subr.bf16.mxu1 %v5597_v31 }
 0xa66   :  { %2318 = vmatpush1.bf16.msra.mxu0 %v5048_v53  ;;  %3560 = vmatpush3.bf16.msra.mxu1 %v5088_v59 }
 0xa67   :  { %2319 = vmatprep.subr.bf16.mxu0 %v5052_v2  ;;  %3561 = vmatprep.subr.bf16.mxu1 %v5597_v31 }
 0xa6a   :  { %2320 = vmatpush1.bf16.msra.mxu0 %v5054_v49  ;;  %3562 = vmatpush3.bf16.msra.mxu1 %v5092_v20 }
 0xa6b   :  { %2321 = vmatprep.subr.bf16.mxu0 %v5057_v24  ;;  %3563 = vmatprep.subr.bf16.mxu1 %v5597_v31 }
 0xa6e   :  { %2322 = vmatpush1.bf16.msra.mxu0 %v5060_v6  ;;  %3564 = vmatpush3.bf16.msra.mxu1 %v5096_v12 }
 0xa6f   :  { %2323 = vmatprep.subr.bf16.mxu0 %v5064_v58  ;;  %3565 = vmatprep.subr.bf16.mxu1 %v5597_v31 }
 0xa72   :  { %2324 = vmatpush1.bf16.msra.mxu0 %v5066_v25  ;;  %3566 = vmatpush3.bf16.msra.mxu1 %v5100_v39 }
 0xa73   :  { %2325 = vmatprep.subr.bf16.mxu0 %v5068_v61  ;;  %3567 = vmatprep.subr.bf16.mxu1 %v5597_v31 }
 0xa76   :  { %2326 = vmatpush1.bf16.msra.mxu0 %v5074_v29  ;;  %3568 = vmatpush3.bf16.msra.mxu1 %v5104_v19 }
 0xa77   :  { %2415 = vmatprep.subr.bf16.mxu0 %v5028_v56  ;;  %3573 = vmatprep.subr.bf16.mxu1 %v5597_v31 }
 0xb19   :  { %v2241_v10 = vpop.f32.mrf.mxu0  ;;  %v2282_v36 = vpop.f32.mrf.mxu1 }
 0xb1a   :  { %v2242_v46 = vadd.f32 %v2241_v10, %v5211_v1  ;;  %v2283_v57 = vadd.f32 %v2282_v36, %v5228_v42 }
 0xb1b   :  { %v2243_v32 = vpop.f32.mrf.mxu0  ;;  %v3551_v0 = vpop.f32.mrf.mxu1 }
 0xb1c   :  { %v2288_v52 = vadd.f32 %v2242_v46, %v1729_v43  ;;  %v2244_v50 = vadd.f32 %v2243_v32, %v5220_v4 }
 0xb1d   :  { %v2245_v33 = vpop.f32.mrf.mxu0  ;;  %v2285_v62 = vpop.f32.mrf.mxu1 }
 0xb1e   :  { %v3081_v23 = vmul.f32 -1.442695, %v2288_v52  ;;  %v2295_v51 = vadd.f32 %v2244_v50, %v1731_v40 }
 0xb1f   :  { %v2246_v30 = vpop.f32.mrf.mxu0  ;;  %v3552_v15 = vpop.f32.mrf.mxu1 }
 0xb20   :  { %3926 = vpow2.f32 %v3081_v23  ;;  %v3082_v48 = vmul.f32 -1.442695, %v2295_v51 }
 0xb22   :  { %3928 = vpow2.f32 %v3082_v48  ;;  %v5630_v48 = vld [vmem:[#allocation17_spill] sm:$0xff] }
 0xb2d   :  { %v3927_v17 = vpop.eup %3926 }
 0xb2e   :  { %v2292_v5 = vadd.f32 1.0, %v3927_v17  ;;  %v1735_v17 = vadd.f32 %v5630_v48, %v5223_v60 }
 0xb2f   :  { %v3929_v45 = vpop.eup %3928 }
 0xb30   :  { %3930 = vrcp.f32 %v2292_v5  ;;  %v2299_v54 = vadd.f32 1.0, %v3929_v45 }
 0xb32   :  { %3932 = vrcp.f32 %v2299_v54 }
 0xb3d   :  { %v3931_v55 = vpop.eup %3930 }
 0xb3e   :  { %v2302_v16 = vmul.f32 %v3931_v55, %v2283_v57 }
 0xb3f   :  { %v3933_v26 = vpop.eup %3932 }
 0xb40   :  { %v2303_v27 = vadd.f32 %v2302_v16, %v1800_v44  ;;  %v2305_v22 = vsub.f32 1.0, %v3933_v26  ;;  %v2307_v43 = vmul.f32 %v3933_v26, %v5292_v11 }
 0xb42   :  { %3934 = vtanh.f32 %v2303_v27  ;;  %v5631_v27 = vld [vmem:[#allocation19_spill] sm:$0xff] }
 0xb43   :  { %v1803_v26 = vadd.f32 %v5631_v27, %v5232_v34 }
 0xb4f   :  { %v3935_v63 = vpop.eup %3934 }
 0xb50   :  { %v2306_v10 = vmul.f32 %v3935_v63, %v2305_v22 }
 0xb52   :  { %v2308_v46 = vadd.f32 %v2307_v43, %v2306_v10 }
 0xb54   :  { %v5344_v32 = vsel %vm101_vm12, %v2308_v46, %v5292_v11  ;;  %v1733_v11 = vadd.f32 %v5171_v28, %v5208_v13 }
 0xb55   :  { %v2310_v36 = vpack.c.bf16 %v5344_v32, %v5344_v32 }
 0xb57   :  { %2344 = vmatmul.mubr.bf16.vlgmr.msra.gmra.mxu0 %v2310_v36  ;;  %3570 = vmatmul.mubr.bf16.vlgmr.msra.gmra.mxu1 %v2310_v36 }
 0xb58   :  { %2416 = vmatpush1.bf16.msra.mxu0 %v5030_v35  ;;  %3574 = vmatpush3.bf16.msra.mxu1 %v5071_v9 }
 0xb59   :  { %2417 = vmatprep.subr.bf16.mxu0 %v5034_v14  ;;  %3575 = vmatprep.subr.bf16.mxu1 %v5597_v31 }
 0xb5a   :  { %2447 = vmatprep.mubr.bf16.mxu0 %v5598_v47  ;;  %3589 = vmatprep.mubr.msk.bf16.mxu1 %vm4107_vm4, %v5597_v31 }
 0xb5c   :  { %2418 = vmatpush1.bf16.msra.mxu0 %v5036_v21  ;;  %3576 = vmatpush3.bf16.msra.mxu1 %v5081_v8 }
 0xb5d   :  { %2419 = vmatprep.subr.bf16.mxu0 %v5040_v38  ;;  %3577 = vmatprep.subr.bf16.mxu1 %v5597_v31 }
 0xb60   :  { %2420 = vmatpush1.bf16.msra.mxu0 %v5042_v37  ;;  %3578 = vmatpush3.bf16.msra.mxu1 %v5084_v18 }
 0xb61   :  { %2421 = vmatprep.subr.bf16.mxu0 %v5046_v7  ;;  %3579 = vmatprep.subr.bf16.mxu1 %v5597_v31 }
 0xb64   :  { %2422 = vmatpush1.bf16.msra.mxu0 %v5048_v53  ;;  %3580 = vmatpush3.bf16.msra.mxu1 %v5088_v59 }
 0xb65   :  { %2423 = vmatprep.subr.bf16.mxu0 %v5052_v2  ;;  %3581 = vmatprep.subr.bf16.mxu1 %v5597_v31 }
 0xb68   :  { %2424 = vmatpush1.bf16.msra.mxu0 %v5054_v49  ;;  %3582 = vmatpush3.bf16.msra.mxu1 %v5092_v20 }
 0xb69   :  { %2425 = vmatprep.subr.bf16.mxu0 %v5057_v24  ;;  %3583 = vmatprep.subr.bf16.mxu1 %v5597_v31 }
 0xb6c   :  { %2426 = vmatpush1.bf16.msra.mxu0 %v5060_v6  ;;  %3584 = vmatpush3.bf16.msra.mxu1 %v5096_v12 }
 0xb6d   :  { %2427 = vmatprep.subr.bf16.mxu0 %v5064_v58  ;;  %3585 = vmatprep.subr.bf16.mxu1 %v5597_v31 }
 0xb70   :  { %2428 = vmatpush1.bf16.msra.mxu0 %v5066_v25  ;;  %3586 = vmatpush3.bf16.msra.mxu1 %v5100_v39 }
 0xb71   :  { %2429 = vmatprep.subr.bf16.mxu0 %v5068_v61  ;;  %3587 = vmatprep.subr.bf16.mxu1 %v5597_v31 }
 0xb74   :  { %2430 = vmatpush1.bf16.msra.mxu0 %v5074_v29  ;;  %3588 = vmatpush3.bf16.msra.mxu1 %v5104_v19 }
 0xb75   :  { %2519 = vmatprep.subr.bf16.mxu0 %v5028_v56  ;;  %3593 = vmatprep.subr.bf16.mxu1 %v5597_v31 }
 0xc17   :  { %v2345_v3 = vpop.f32.mrf.mxu0  ;;  %v2386_v41 = vpop.f32.mrf.mxu1 }
 0xc18   :  { %v2346_v0 = vadd.f32 %v2345_v3, %v5211_v1  ;;  %v2387_v44 = vadd.f32 %v2386_v41, %v5228_v42 }
 0xc19   :  { %v2347_v52 = vpop.f32.mrf.mxu0  ;;  %v3571_v33 = vpop.f32.mrf.mxu1 }
 0xc1a   :  { %v2392_v62 = vadd.f32 %v2346_v0, %v1733_v11  ;;  %v2348_v15 = vadd.f32 %v2347_v52, %v5220_v4 }
 0xc1b   :  { %v2349_v23 = vpop.f32.mrf.mxu0  ;;  %v2389_v50 = vpop.f32.mrf.mxu1 }
 0xc1c   :  { %v3083_v30 = vmul.f32 -1.442695, %v2392_v62  ;;  %v2399_v5 = vadd.f32 %v2348_v15, %v1735_v17  ;;  %v5633_v62 = vld [vmem:[#allocation12_spill] sm:$0xff] }
 0xc1d   :  { %v2350_v40 = vpop.f32.mrf.mxu0  ;;  %v3572_v51 = vpop.f32.mrf.mxu1  ;;  %v1739_v23 = vadd.f32 %v5633_v62, %v5208_v13 }
 0xc1e   :  { %3936 = vpow2.f32 %v3083_v30  ;;  %v3084_v45 = vmul.f32 -1.442695, %v2399_v5 }
 0xc20   :  { %3938 = vpow2.f32 %v3084_v45 }
 0xc2b   :  { %v3937_v28 = vpop.eup %3936 }
 0xc2c   :  { %v2396_v54 = vadd.f32 1.0, %v3937_v28 }
 0xc2d   :  { %v3939_v57 = vpop.eup %3938 }
 0xc2e   :  { %3940 = vrcp.f32 %v2396_v54  ;;  %v2403_v55 = vadd.f32 1.0, %v3939_v57 }
 0xc30   :  { %3942 = vrcp.f32 %v2403_v55 }
 0xc3b   :  { %v3941_v16 = vpop.eup %3940 }
 0xc3c   :  { %v2406_v22 = vmul.f32 %v3941_v16, %v2387_v44 }
 0xc3d   :  { %v3943_v10 = vpop.eup %3942 }
 0xc3e   :  { %v2407_v63 = vadd.f32 %v2406_v22, %v1803_v26  ;;  %v2409_v43 = vsub.f32 1.0, %v3943_v10  ;;  %v2411_v3 = vmul.f32 %v3943_v10, %v5344_v32  ;;  %v5635_v10 = vld [vmem:[#allocation26_spill] sm:$0xff] }
 0xc40   :  { %3944 = vtanh.f32 %v2407_v63 }
 0xc4d   :  { %v3945_v46 = vpop.eup %3944 }
 0xc4e   :  { %v2410_v36 = vmul.f32 %v3945_v46, %v2409_v43  ;;  %v1808_v43 = vadd.f32 %v5635_v10, %v5232_v34  ;;  %v4016_v10 = vld [vmem:[#allocation5 + $0x7c] ss:$12 sps:$4 sm:$0xff]  }
 0xc50   :  { %v2412_v11 = vadd.f32 %v2411_v3, %v2410_v36 }
 0xc52   :  { %v5396_v52 = vsel %vm107_vm13, %v2412_v11, %v5344_v32 }
 0xc53   :  { %v2414_v41 = vpack.c.bf16 %v5396_v52, %v5396_v52 }
 0xc55   :  { %2448 = vmatmul.mubr.bf16.vlgmr.msra.gmra.mxu0 %v2414_v41  ;;  %3590 = vmatmul.mubr.bf16.vlgmr.msra.gmra.mxu1 %v2414_v41 }
 0xc56   :  { %2520 = vmatpush1.bf16.msra.mxu0 %v5030_v35  ;;  %3594 = vmatpush3.bf16.msra.mxu1 %v5071_v9 }
 0xc57   :  { %2521 = vmatprep.subr.bf16.mxu0 %v5034_v14  ;;  %3595 = vmatprep.subr.bf16.mxu1 %v5597_v31 }
 0xc58   :  { %2551 = vmatprep.mubr.bf16.mxu0 %v5598_v47  ;;  %3609 = vmatprep.mubr.msk.bf16.mxu1 %vm4107_vm4, %v5597_v31 }
 0xc5a   :  { %2522 = vmatpush1.bf16.msra.mxu0 %v5036_v21  ;;  %3596 = vmatpush3.bf16.msra.mxu1 %v5081_v8 }
 0xc5b   :  { %2523 = vmatprep.subr.bf16.mxu0 %v5040_v38  ;;  %3597 = vmatprep.subr.bf16.mxu1 %v5597_v31 }
 0xc5e   :  { %2524 = vmatpush1.bf16.msra.mxu0 %v5042_v37  ;;  %3598 = vmatpush3.bf16.msra.mxu1 %v5084_v18 }
 0xc5f   :  { %2525 = vmatprep.subr.bf16.mxu0 %v5046_v7  ;;  %3599 = vmatprep.subr.bf16.mxu1 %v5597_v31 }
 0xc62   :  { %2526 = vmatpush1.bf16.msra.mxu0 %v5048_v53  ;;  %3600 = vmatpush3.bf16.msra.mxu1 %v5088_v59 }
 0xc63   :  { %2527 = vmatprep.subr.bf16.mxu0 %v5052_v2  ;;  %3601 = vmatprep.subr.bf16.mxu1 %v5597_v31 }
 0xc66   :  { %2528 = vmatpush1.bf16.msra.mxu0 %v5054_v49  ;;  %3602 = vmatpush3.bf16.msra.mxu1 %v5092_v20 }
 0xc67   :  { %2529 = vmatprep.subr.bf16.mxu0 %v5057_v24  ;;  %3603 = vmatprep.subr.bf16.mxu1 %v5597_v31 }
 0xc6a   :  { %2530 = vmatpush1.bf16.msra.mxu0 %v5060_v6  ;;  %3604 = vmatpush3.bf16.msra.mxu1 %v5096_v12 }
 0xc6b   :  { %2531 = vmatprep.subr.bf16.mxu0 %v5064_v58  ;;  %3605 = vmatprep.subr.bf16.mxu1 %v5597_v31 }
 0xc6e   :  { %2532 = vmatpush1.bf16.msra.mxu0 %v5066_v25  ;;  %3606 = vmatpush3.bf16.msra.mxu1 %v5100_v39 }
 0xc6f   :  { %2533 = vmatprep.subr.bf16.mxu0 %v5068_v61  ;;  %3607 = vmatprep.subr.bf16.mxu1 %v5597_v31 }
 0xc72   :  { %2534 = vmatpush1.bf16.msra.mxu0 %v5074_v29  ;;  %3608 = vmatpush3.bf16.msra.mxu1 %v5104_v19 }
 0xc73   :  { %2623 = vmatprep.subr.bf16.mxu0 %v5028_v56  ;;  %3613 = vmatprep.subr.bf16.mxu1 %v5597_v31  ;;  %v5634_v56 = vld [vmem:[#allocation18_spill] sm:$0xff] }
 0xc74   :  { %v1741_v54 = vadd.f32 %v5634_v56, %v5223_v60 }
 0xd15   :  { %v2449_v32 = vpop.f32.mrf.mxu0  ;;  %v2490_v33 = vpop.f32.mrf.mxu1 }
 0xd16   :  { %v2450_v50 = vadd.f32 %v2449_v32, %v5211_v1  ;;  %v2491_v22 = vadd.f32 %v2490_v33, %v5228_v42 }
 0xd17   :  { %v2451_v30 = vpop.f32.mrf.mxu0  ;;  %v3591_v15 = vpop.f32.mrf.mxu1 }
 0xd18   :  { %v2496_v40 = vadd.f32 %v2450_v50, %v1739_v23  ;;  %v2452_v5 = vadd.f32 %v2451_v30, %v5220_v4  ;;  %v5639_v15 = vld [vmem:[#allocation29_spill] sm:$0xff] }
 0xd19   :  { %v2453_v51 = vpop.f32.mrf.mxu0  ;;  %v2493_v48 = vpop.f32.mrf.mxu1  ;;  %v4027_v23 = vld [vmem:[#allocation5 + $0x38] ss:$12 sps:$4 sm:$0xff]  }
 0xd1a   :  { %v3085_v17 = vmul.f32 -1.442695, %v2496_v40  ;;  %v2503_v57 = vadd.f32 %v2452_v5, %v1741_v54  ;;  %v1811_v40 = vadd.f32 %v5639_v15, %v5232_v34 }
 0xd1b   :  { %v2454_v45 = vpop.f32.mrf.mxu0  ;;  %v3592_v28 = vpop.f32.mrf.mxu1 }
 0xd1c   :  { %3946 = vpow2.f32 %v3085_v17  ;;  %v3086_v55 = vmul.f32 -1.442695, %v2503_v57 }
 0xd1e   :  { %3948 = vpow2.f32 %v3086_v55 }
 0xd29   :  { %v3947_v44 = vpop.eup %3946 }
 0xd2a   :  { %v2500_v16 = vadd.f32 1.0, %v3947_v44 }
 0xd2b   :  { %v3949_v27 = vpop.eup %3948 }
 0xd2c   :  { %3950 = vrcp.f32 %v2500_v16  ;;  %v2507_v26 = vadd.f32 1.0, %v3949_v27  ;;  %v4011_v16 = vld [vmem:[#allocation5 + $0xa8] ss:$12 sps:$4 sm:$0xff]   ;;  %v4012_v27 = vld [vmem:[#allocation5 + $0xb0] ss:$12 sps:$4 sm:$0xff]  }
 0xd2e   :  { %3952 = vrcp.f32 %v2507_v26  ;;  %v4013_v26 = vld [vmem:[#allocation5 + $0x94] ss:$12 sps:$4 sm:$0xff]  }
 0xd39   :  { %v3951_v63 = vpop.eup %3950 }
 0xd3a   :  { %v2510_v46 = vmul.f32 %v3951_v63, %v2491_v22  ;;  %v4014_v22 = vld [vmem:[#allocation5 + $0x90] ss:$12 sps:$4 sm:$0xff]   ;;  %v4015_v63 = vld [vmem:[#allocation5 + $0x98] ss:$12 sps:$4 sm:$0xff]  }
 0xd3b   :  { %v3953_v3 = vpop.eup %3952 }
 0xd3c   :  { %v2511_v36 = vadd.f32 %v2510_v46, %v1808_v43  ;;  %v2513_v11 = vsub.f32 1.0, %v3953_v3  ;;  %v2515_v32 = vmul.f32 %v3953_v3, %v5396_v52  ;;  %v4017_v43 = vld [vmem:[#allocation5 + $0x78] ss:$12 sps:$4 sm:$0xff]   ;;  %v4018_v46 = vld [vmem:[#allocation5 + $0x80] ss:$12 sps:$4 sm:$0xff]  }
 0xd3d   :  { %v4021_v3 = vld [vmem:[#allocation5 + $0x68] ss:$12 sps:$4 sm:$0xff]  }
 0xd3e   :  { %3954 = vtanh.f32 %v2511_v36  ;;  %v4019_v36 = vld [vmem:[#allocation5 + $0x64] ss:$12 sps:$4 sm:$0xff]  }
 0xd4b   :  { %v3955_v0 = vpop.eup %3954 }
 0xd4c   :  { %v2514_v41 = vmul.f32 %v3955_v0, %v2513_v11  ;;  %v4022_v11 = vld [vmem:[#allocation5 + $0x4c] ss:$12 sps:$4 sm:$0xff]   ;;  %v4023_v0 = vld [vmem:[#allocation5 + $0x48] ss:$12 sps:$4 sm:$0xff]  }
 0xd4e   :  { %v2516_v62 = vadd.f32 %v2515_v32, %v2514_v41  ;;  %v4024_v41 = vld [vmem:[#allocation5 + $0x50] ss:$12 sps:$4 sm:$0xff]   ;;  %v4025_v32 = vld [vmem:[#allocation5 + $0x34] ss:$12 sps:$4 sm:$0xff]  }
 0xd50   :  { %v5448_v50 = vsel %vm113_vm14, %v2516_v62, %v5396_v52  ;;  %v4026_v62 = vld [vmem:[#allocation5 + $0x30] ss:$12 sps:$4 sm:$0xff]  }
 0xd51   :  { %v2518_v33 = vpack.c.bf16 %v5448_v50, %v5448_v50 }
 0xd53   :  { %2552 = vmatmul.mubr.bf16.vlgmr.msra.gmra.mxu0 %v2518_v33  ;;  %3610 = vmatmul.mubr.bf16.vlgmr.msra.gmra.mxu1 %v2518_v33  ;;  %v4029_v33 = vld [vmem:[#allocation5 + $0x18] ss:$12 sps:$4 sm:$0xff]  }
 0xd54   :  { %2624 = vmatpush1.bf16.msra.mxu0 %v5030_v35  ;;  %3614 = vmatpush3.bf16.msra.mxu1 %v5071_v9  ;;  %v4010_v35 = vld [vmem:[#allocation5 + $0xac] ss:$12 sps:$4 sm:$0xff]  }
 0xd55   :  { %2625 = vmatprep.subr.bf16.mxu0 %v5034_v14  ;;  %3615 = vmatprep.subr.bf16.mxu1 %v5597_v31 }
 0xd56   :  { %2655 = vmatprep.mubr.bf16.mxu0 %v5598_v47  ;;  %3629 = vmatprep.mubr.msk.bf16.mxu1 %vm4107_vm4, %v5597_v31 }
 0xd58   :  { %2626 = vmatpush1.bf16.msra.mxu0 %v5036_v21  ;;  %3616 = vmatpush3.bf16.msra.mxu1 %v5081_v8 }
 0xd59   :  { %2627 = vmatprep.subr.bf16.mxu0 %v5040_v38  ;;  %3617 = vmatprep.subr.bf16.mxu1 %v5597_v31  ;;  %v5637_v38 = vld [vmem:[#allocation14_spill] sm:$0xff] }
 0xd5c   :  { %2628 = vmatpush1.bf16.msra.mxu0 %v5042_v37  ;;  %3618 = vmatpush3.bf16.msra.mxu1 %v5084_v18  ;;  %v1743_v37 = vadd.f32 %v5637_v38, %v5208_v13  ;;  %v4033_v38 = vld [vmem:[#allocation5 + $0x8] ss:$12 sps:$4 sm:$0xff]  }
 0xd5d   :  { %2629 = vmatprep.subr.bf16.mxu0 %v5046_v7  ;;  %3619 = vmatprep.subr.bf16.mxu1 %v5597_v31 }
 0xd60   :  { %2630 = vmatpush1.bf16.msra.mxu0 %v5048_v53  ;;  %3620 = vmatpush3.bf16.msra.mxu1 %v5088_v59 }
 0xd61   :  { %2631 = vmatprep.subr.bf16.mxu0 %v5052_v2  ;;  %3621 = vmatprep.subr.bf16.mxu1 %v5597_v31 }
 0xd64   :  { %2632 = vmatpush1.bf16.msra.mxu0 %v5054_v49  ;;  %3622 = vmatpush3.bf16.msra.mxu1 %v5092_v20 }
 0xd65   :  { %2633 = vmatprep.subr.bf16.mxu0 %v5057_v24  ;;  %3623 = vmatprep.subr.bf16.mxu1 %v5597_v31 }
 0xd68   :  { %2634 = vmatpush1.bf16.msra.mxu0 %v5060_v6  ;;  %3624 = vmatpush3.bf16.msra.mxu1 %v5096_v12 }
 0xd69   :  { %2635 = vmatprep.subr.bf16.mxu0 %v5064_v58  ;;  %3625 = vmatprep.subr.bf16.mxu1 %v5597_v31 }
 0xd6c   :  { %2636 = vmatpush1.bf16.msra.mxu0 %v5066_v25  ;;  %3626 = vmatpush3.bf16.msra.mxu1 %v5100_v39 }
 0xd6d   :  { %2637 = vmatprep.subr.bf16.mxu0 %v5068_v61  ;;  %3627 = vmatprep.subr.bf16.mxu1 %v5597_v31 }
 0xd70   :  { %2638 = vmatpush1.bf16.msra.mxu0 %v5074_v29  ;;  %3628 = vmatpush3.bf16.msra.mxu1 %v5104_v19  ;;  %v5638_v29 = vld [vmem:[#allocation22_spill] sm:$0xff] }
 0xd71   :  { %2727 = vmatprep.subr.bf16.mxu0 %v4010_v35  ;;  %3633 = vmatprep.subr.bf16.mxu1 %v5597_v31  ;;  %v1745_v8 = vadd.f32 %v5638_v29, %v5223_v60  ;;  %v4030_v35 = vld [vmem:[#allocation5 + $0x20] ss:$12 sps:$4 sm:$0xff]  }
 0xe13   :  { %v2553_v14 = vpop.f32.mrf.mxu0  ;;  %v2594_v21 = vpop.f32.mrf.mxu1 }
 0xe14   :  { %v2554_v7 = vadd.f32 %v2553_v14, %v5211_v1  ;;  %v2595_v52 = vadd.f32 %v2594_v21, %v5228_v42  ;;  %v4031_v14 = vld [vmem:[#allocation5 + $0x4] ss:$12 sps:$4 sm:$0xff]   ;;  %v4032_v21 = vld [vmem:[#allocation5] ss:$12 sps:$4 sm:$0xff]  }
 0xe15   :  { %v2555_v53 = vpop.f32.mrf.mxu0  ;;  %v3611_v2 = vpop.f32.mrf.mxu1 }
 0xe16   :  { %v2600_v49 = vadd.f32 %v2554_v7, %v1743_v37  ;;  %v2556_v25 = vadd.f32 %v2555_v53, %v5220_v4  ;;  %v5641_v53 = vld [vmem:[#allocation23_spill] sm:$0xff] }
 0xe17   :  { %v2557_v24 = vpop.f32.mrf.mxu0  ;;  %v2597_v6 = vpop.f32.mrf.mxu1  ;;  %v1749_v2 = vadd.f32 %v5641_v53, %v5208_v13 }
 0xe18   :  { %v3087_v58 = vmul.f32 -1.442695, %v2600_v49  ;;  %v2607_v18 = vadd.f32 %v2556_v25, %v1745_v8 }
 0xe19   :  { %v2558_v61 = vpop.f32.mrf.mxu0  ;;  %v3612_v9 = vpop.f32.mrf.mxu1 }
 0xe1a   :  { %3956 = vpow2.f32 %v3087_v58  ;;  %v3088_v59 = vmul.f32 -1.442695, %v2607_v18 }
 0xe1c   :  { %3958 = vpow2.f32 %v3088_v59  ;;  %v5642_v59 = vld [vmem:[#allocation25_spill] sm:$0xff] }
 0xe27   :  { %v3957_v20 = vpop.eup %3956 }
 0xe28   :  { %v2604_v12 = vadd.f32 1.0, %v3957_v20  ;;  %v1751_v20 = vadd.f32 %v5642_v59, %v5223_v60 }
 0xe29   :  { %v3959_v39 = vpop.eup %3958 }
 0xe2a   :  { %3960 = vrcp.f32 %v2604_v12  ;;  %v2611_v19 = vadd.f32 1.0, %v3959_v39 }
 0xe2c   :  { %3962 = vrcp.f32 %v2611_v19 }
 0xe37   :  { %v3961_v30 = vpop.eup %3960 }
 0xe38   :  { %v2614_v51 = vmul.f32 %v3961_v30, %v2595_v52 }
 0xe39   :  { %v3963_v17 = vpop.eup %3962 }
 0xe3a   :  { %v2615_v48 = vadd.f32 %v2614_v51, %v1811_v40  ;;  %v2617_v5 = vsub.f32 1.0, %v3963_v17  ;;  %v2619_v56 = vmul.f32 %v3963_v17, %v5448_v50 }
 0xe3c   :  { %3964 = vtanh.f32 %v2615_v48  ;;  %v5643_v48 = vld [vmem:[#allocation24_spill] sm:$0xff] }
 0xe3d   :  { %v1816_v17 = vadd.f32 %v5643_v48, %v5232_v34 }
 0xe49   :  { %v3965_v45 = vpop.eup %3964 }
 0xe4a   :  { %v2618_v28 = vmul.f32 %v3965_v45, %v2617_v5 }
 0xe4c   :  { %v2620_v54 = vadd.f32 %v2619_v56, %v2618_v28 }
 0xe4e   :  { %v5499_v55 = vsel %vm119_vm15, %v2620_v54, %v5448_v50  ;;  %v4028_v50 = vld [vmem:[#allocation5 + $0x1c] ss:$12 sps:$4 sm:$0xff]  }
 0xe4f   :  { %v2622_v44 = vpack.c.bf16 %v5499_v55, %v5499_v55 }
 0xe51   :  { %2656 = vmatmul.mubr.bf16.vlgmr.msra.gmra.mxu0 %v2622_v44  ;;  %3630 = vmatmul.mubr.bf16.vlgmr.msra.gmra.mxu1 %v2622_v44 }
 0xe52   :  { %2728 = vmatpush1.bf16.msra.mxu0 %v4011_v16  ;;  %3634 = vmatpush3.bf16.msra.mxu1 %v4012_v27 }
 0xe53   :  { %2729 = vmatprep.subr.bf16.mxu0 %v4013_v26  ;;  %3635 = vmatprep.subr.bf16.mxu1 %v5597_v31 }
 0xe54   :  { %2759 = vmatprep.mubr.bf16.mxu0 %v5598_v47  ;;  %3649 = vmatprep.mubr.msk.bf16.mxu1 %vm4107_vm4, %v5597_v31  ;;  %v4020_v47 = vld [vmem:[#allocation5 + $0x60] ss:$12 sps:$4 sm:$0xff]  }
 0xe56   :  { %2730 = vmatpush1.bf16.msra.mxu0 %v4014_v22  ;;  %3636 = vmatpush3.bf16.msra.mxu1 %v4015_v63  ;;  %v3818_v63 = vld [vmem:[#allocation7 + $0x38] sm:$0xff]  }
 0xe57   :  { %2731 = vmatprep.subr.bf16.mxu0 %v4016_v10  ;;  %3637 = vmatprep.subr.bf16.mxu1 %v5597_v31  ;;  %v3819_v10 = vld [vmem:[#allocation7 + $0x30] sm:$0xff]  }
 0xe5a   :  { %2732 = vmatpush1.bf16.msra.mxu0 %v4017_v43  ;;  %3638 = vmatpush3.bf16.msra.mxu1 %v4018_v46  ;;  %v3820_v43 = vld [vmem:[#allocation7 + $0x28] sm:$0xff]   ;;  %v3822_v46 = vld [vmem:[#allocation7 + $0x18] sm:$0xff]  }
 0xe5b   :  { %2733 = vmatprep.subr.bf16.mxu0 %v4019_v36  ;;  %3639 = vmatprep.subr.bf16.mxu1 %v5597_v31  ;;  %v3823_v36 = vld [vmem:[#allocation7 + $0x10] sm:$0xff]  }
 0xe5e   :  { %2734 = vmatpush1.bf16.msra.mxu0 %v4020_v47  ;;  %3640 = vmatpush3.bf16.msra.mxu1 %v4021_v3  ;;  %v3824_v47 = vld [vmem:[#allocation7 + $0x8] sm:$0xff]   ;;  %v3825_v3 = vld [vmem:[#allocation7] sm:$0xff]  }
 0xe5f   :  { %2735 = vmatprep.subr.bf16.mxu0 %v4022_v11  ;;  %3641 = vmatprep.subr.bf16.mxu1 %v5597_v31 }
 0xe62   :  { %2736 = vmatpush1.bf16.msra.mxu0 %v4023_v0  ;;  %3642 = vmatpush3.bf16.msra.mxu1 %v4024_v41  ;;  %v5645_v41 = vld [vmem:[#allocation27_spill] sm:$0xff] }
 0xe63   :  { %2737 = vmatprep.subr.bf16.mxu0 %v4025_v32  ;;  %3643 = vmatprep.subr.bf16.mxu1 %v5597_v31  ;;  %v1753_v32 = vadd.f32 %v5645_v41, %v5208_v13 }
 0xe66   :  { %2738 = vmatpush1.bf16.msra.mxu0 %v4026_v62  ;;  %3644 = vmatpush3.bf16.msra.mxu1 %v4027_v23 }
 0xe67   :  { %2739 = vmatprep.subr.bf16.mxu0 %v4028_v50  ;;  %3645 = vmatprep.subr.bf16.mxu1 %v5597_v31 }
 0xe6a   :  { %2740 = vmatpush1.bf16.msra.mxu0 %v4029_v33  ;;  %3646 = vmatpush3.bf16.msra.mxu1 %v4030_v35 }
 0xe6b   :  { %2741 = vmatprep.subr.bf16.mxu0 %v4031_v14  ;;  %3647 = vmatprep.subr.bf16.mxu1 %v5597_v31 }
 0xe6e   :  { %2742 = vmatpush1.bf16.msra.mxu0 %v4032_v21  ;;  %3648 = vmatpush3.bf16.msra.mxu1 %v4033_v38 }
 0xe6f   :  { %3653 = vmatprep.subr.bf16.mxu0 %v5597_v31 }
 0xf11   :  { %v2657_v37 = vpop.f32.mrf.mxu0  ;;  %v2698_v7 = vpop.f32.mrf.mxu1 }
 0xf12   :  { %v2658_v49 = vadd.f32 %v2657_v37, %v5211_v1  ;;  %v2699_v40 = vadd.f32 %v2698_v7, %v5228_v42 }
 0xf13   :  { %v2659_v24 = vpop.f32.mrf.mxu0  ;;  %v3631_v6 = vpop.f32.mrf.mxu1 }
 0xf14   :  { %v2704_v58 = vadd.f32 %v2658_v49, %v1749_v2  ;;  %v2660_v29 = vadd.f32 %v2659_v24, %v5220_v4 }
 0xf15   :  { %v2661_v25 = vpop.f32.mrf.mxu0  ;;  %v2701_v61 = vpop.f32.mrf.mxu1 }
 0xf16   :  { %v3089_v9 = vmul.f32 -1.442695, %v2704_v58  ;;  %v2711_v12 = vadd.f32 %v2660_v29, %v1751_v20  ;;  %v5647_v61 = vld [vmem:[#allocation28_spill] sm:$0xff] }
 0xf17   :  { %v2662_v8 = vpop.f32.mrf.mxu0  ;;  %v3632_v18 = vpop.f32.mrf.mxu1 }
 0xf18   :  { %3966 = vpow2.f32 %v3089_v9  ;;  %v3090_v39 = vmul.f32 -1.442695, %v2711_v12 }
 0xf1a   :  { %3968 = vpow2.f32 %v3090_v39 }
 0xf25   :  { %v3967_v19 = vpop.eup %3966 }
 0xf26   :  { %v2708_v52 = vadd.f32 1.0, %v3967_v19 }
 0xf27   :  { %v3969_v30 = vpop.eup %3968 }
 0xf28   :  { %3970 = vrcp.f32 %v2708_v52  ;;  %v2715_v15 = vadd.f32 1.0, %v3969_v30 }
 0xf2a   :  { %3972 = vrcp.f32 %v2715_v15 }
 0xf35   :  { %v3971_v51 = vpop.eup %3970 }
 0xf36   :  { %v2718_v5 = vmul.f32 %v3971_v51, %v2699_v40 }
 0xf37   :  { %v3973_v28 = vpop.eup %3972 }
 0xf38   :  { %v2719_v45 = vadd.f32 %v2718_v5, %v1816_v17  ;;  %v2721_v56 = vsub.f32 1.0, %v3973_v28  ;;  %v2723_v44 = vmul.f32 %v3973_v28, %v5499_v55 }
 0xf3a   :  { %3974 = vtanh.f32 %v2719_v45 }
 0xf47   :  { %v3975_v54 = vpop.eup %3974 }
 0xf48   :  { %v2722_v57 = vmul.f32 %v3975_v54, %v2721_v56 }
 0xf4a   :  { %v2724_v16 = vadd.f32 %v2723_v44, %v2722_v57 }
 0xf4c   :  { %v5527_v26 = vsel %vm125_vm0, %v2724_v16, %v5499_v55  ;;  %v3821_v55 = vld [vmem:[#allocation7 + $0x20] sm:$0xff]  }
 0xf4d   :  { %v2726_v22 = vpack.c.bf16 %v5527_v26, %v5527_v26 }
 0xf4f   :  { %2760 = vmatmul.mubr.bf16.vlgmr.msra.gmra.mxu0 %v2726_v22  ;;  %3650 = vmatmul.mubr.bf16.vlgmr.msra.gmra.mxu1 %v2726_v22 }
 0xf50   :  { %3669 = vmatprep.mubr.msk.bf16.mxu0 %vm4107_vm4, %v5597_v31  ;;  %3654 = vmatpush3.bf16.msra.mxu0 %v3818_v63 }
 0xf51   :  { %3655 = vmatprep.subr.bf16.mxu0 %v5597_v31 }
 0xf54   :  { %3656 = vmatpush3.bf16.msra.mxu0 %v3819_v10 }
 0xf55   :  { %3657 = vmatprep.subr.bf16.mxu0 %v5597_v31 }
 0xf58   :  { %3658 = vmatpush3.bf16.msra.mxu0 %v3820_v43 }
 0xf59   :  { %3659 = vmatprep.subr.bf16.mxu0 %v5597_v31 }
 0xf5c   :  { %3660 = vmatpush3.bf16.msra.mxu0 %v3821_v55 }
 0xf5d   :  { %3661 = vmatprep.subr.bf16.mxu0 %v5597_v31 }
 0xf60   :  { %3662 = vmatpush3.bf16.msra.mxu0 %v3822_v46 }
 0xf61   :  { %3663 = vmatprep.subr.bf16.mxu0 %v5597_v31 }
 0xf64   :  { %3664 = vmatpush3.bf16.msra.mxu0 %v3823_v36 }
 0xf65   :  { %3665 = vmatprep.subr.bf16.mxu0 %v5597_v31 }
 0xf68   :  { %3666 = vmatpush3.bf16.msra.mxu0 %v3824_v47 }
 0xf69   :  { %3667 = vmatprep.subr.bf16.mxu0 %v5597_v31  ;;  %v5646_v31 = vld [vmem:[#allocation10_spill] sm:$0xff] }
 0xf6a   :  { %v1755_v53 = vadd.f32 %v5646_v31, %v5223_v60 }
 0xf6c   :  { %3668 = vmatpush3.bf16.msra.mxu0 %v3825_v3 }
0x100f   :  { %v2761_v11 = vpop.f32.mrf.mxu0  ;;  %v2802_v0 = vpop.f32.mrf.mxu1 }
0x1010   :  { %v2762_v62 = vadd.f32 %v2761_v11, %v5211_v1  ;;  %v2803_v58 = vadd.f32 %v2802_v0, %v5228_v42 }
0x1011   :  { %v2763_v23 = vpop.f32.mrf.mxu0  ;;  %v3651_v50 = vpop.f32.mrf.mxu1 }
0x1012   :  { %v2808_v33 = vadd.f32 %v2762_v62, %v1753_v32  ;;  %v2764_v38 = vadd.f32 %v2763_v23, %v5220_v4  ;;  %v1819_v4 = vadd.f32 %v5647_v61, %v5232_v34  ;;  %v3093_v34 = vld [vmem:[%s5570_s11] ss:$0 sm:$0xff] }
0x1013   :  { %v2765_v35 = vpop.f32.mrf.mxu0  ;;  %v2805_v14 = vpop.f32.mrf.mxu1 }
0x1014   :  { %v3091_v21 = vmul.f32 -1.442695, %v2808_v33  ;;  %v2815_v2 = vadd.f32 %v2764_v38, %v1755_v53 }
0x1015   :  { %v2766_v37 = vpop.f32.mrf.mxu0  ;;  %v3652_v7 = vpop.f32.mrf.mxu1 }
0x1016   :  { %3976 = vpow2.f32 %v3091_v21  ;;  %v3092_v49 = vmul.f32 -1.442695, %v2815_v2 }
0x1018   :  { %3978 = vpow2.f32 %v3092_v49 }
0x1023   :  { %v3977_v13 = vpop.eup %3976 }
0x1024   :  { %v2812_v24 = vadd.f32 1.0, %v3977_v13 }
0x1025   :  { %v3979_v1 = vpop.eup %3978 }
0x1026   :  { %3980 = vrcp.f32 %v2812_v24  ;;  %v2819_v6 = vadd.f32 1.0, %v3979_v1 }
0x1028   :  { %3982 = vrcp.f32 %v2819_v6 }
0x1033   :  { %v3981_v25 = vpop.eup %3980 }
0x1034   :  { %v2822_v9 = vmul.f32 %v3981_v25, %v2803_v58 }
0x1035   :  { %v3983_v60 = vpop.eup %3982 }
0x1036   :  { %v2823_v29 = vadd.f32 %v2822_v9, %v1819_v4  ;;  %v2825_v8 = vsub.f32 1.0, %v3983_v60  ;;  %v2827_v20 = vmul.f32 %v3983_v60, %v5527_v26 }
0x1038   :  { %3984 = vtanh.f32 %v2823_v29 }
0x1045   :  { %v3985_v18 = vpop.eup %3984 }
0x1046   :  { %v2826_v59 = vmul.f32 %v3985_v18, %v2825_v8 }
0x1048   :  { %v2828_v12 = vadd.f32 %v2827_v20, %v2826_v59 }
0x104a   :  { %v2829_v19 = vsel %vm131_vm3, %v2828_v12, %v5527_v26 }
0x104b   :  { %v2830_v42 = vpack.c.bf16 %v2829_v19, %v2829_v19 }
0x104d   :  { %3670 = vmatmul.mubr.bf16.vlgmr.msra.gmra.mxu0 %v2830_v42 }
0x110d   :  { %v2936_v52 = vpop.f32.mrf.mxu0 }
0x110e   :  { %v2937_v30 = vadd.f32 %v3093_v34, %v2936_v52 }
0x110f   :  { %v3671_v15 = vpop.f32.mrf.mxu0 }
0x1110   :  { %2942 = vst [vmem:[%s5571_s12] sm:$0xff] %v2937_v30 }
0x1111   :  { %v2939_v40 = vpop.f32.mrf.mxu0 }
0x1113   :  { %v3672_v51 = vpop.f32.mrf.mxu0 }
0x1114   :  { %2947 = vsyncpa [#allocation4], 1 }
0x1115   :  { %2948 = vsyncpa [#allocation6], 1 }

</bundles_post_ra>
